<compile_context>
chip_gen: v5e
topology: v5e:2x2
jax: 0.10.0
libtpu: 0.0.40
codegen_flags: <defaults>
</compile_context>

<pallas_src>
import functools

import jax
import jax.numpy as jnp
from jax.experimental import pallas as pl
from jax.experimental.pallas import tpu as pltpu

K = 5          # Conv1d kernel size in ResConvBlock
P = 2          # padding = 2
_EPS = 1e-5    # torch.nn.GroupNorm default eps


# --------------------------------- in-kernel math ---------------------------------

def _erf(x):
    # Abramowitz & Stegun 7.1.26, |abs err| < 1.5e-7 -> matches exact erf GELU
    # to float32 precision.  Uses only exp / mul / add (safe on all TPU gens).
    ax = jnp.abs(x)
    t = 1.0 / (1.0 + 0.3275911 * ax)
    poly = ((((1.061405429 * t - 1.453152027) * t + 1.421413741) * t
             - 0.284496736) * t + 0.254829592) * t
    y = 1.0 - poly * jnp.exp(-ax * ax)
    return jnp.where(x >= 0, y, -y)


def _gelu(x):
    # torch.nn.GELU() default: exact erf form.
    return 0.5 * x * (1.0 + _erf(x * 0.7071067811865476))


def _group_norm1(h, gamma, beta):
    # GroupNorm(1, C): normalize over (C, L) per sample; affine per channel.
    # Two-pass centered variance for numerical safety (review feedback).
    mu = jnp.mean(jnp.mean(h, axis=1, keepdims=True), axis=0, keepdims=True)   # (1,1)
    c = h - mu
    var = jnp.mean(jnp.mean(c * c, axis=1, keepdims=True), axis=0, keepdims=True)
    return c * jax.lax.rsqrt(var + _EPS) * gamma + beta


def _conv5(h, w, b, slab_ref):
    # h: (Cin, L) in registers; w: (Cout, K*Cin) im2col weight; b: (Cout, 1).
    # Builds the (K*Cin, L) tap slab in VMEM (zero borders = conv padding) and
    # does ONE MXU matmul instead of K skinny ones.
    cin, length = h.shape
    rows = K * cin
    slab_ref[...] = jnp.zeros(slab_ref.shape, jnp.float32)
    for k in range(K):
        d = k - P                                   # tap shift
        src_lo, src_hi = max(0, d), min(length, length + d)
        dst_lo = max(0, -d)
        width = src_hi - src_lo
        slab_ref[k * cin:(k + 1) * cin, dst_lo:dst_lo + width] = h[:, src_lo:src_hi]
    if rows == slab_ref.shape[0]:
        slab = slab_ref[...]
    else:
        slab = slab_ref[0:rows, :]
    return jnp.dot(w, slab, preferred_element_type=jnp.float32) + b


# ----------------------------------- fused kernel ----------------------------------

def _down_block_kernel(*refs, block_meta):
    # refs = [x_cat_ref, <per-block weights...>, out_ref, slab_scratch_ref]
    x_ref = refs[0]
    o_ref = refs[-2]
    slab_ref = refs[-1]
    params = list(refs[1:-2])

    h = x_ref[...].astype(jnp.float32)              # (Cin, L)
    idx = 0
    for has_skip in block_meta:                     # 3 ResConvBlocks, unrolled
        if has_skip:
            res = jnp.dot(params[idx][...], h, preferred_element_type=jnp.float32)
            idx += 1
        else:
            res = h
        w1, b1, g1, be1, w2, b2, g2, be2 = (params[idx + j][...] for j in range(8))
        idx += 8
        h1 = _gelu(_group_norm1(_conv5(h, w1, b1, slab_ref), g1, be1))
        h2 = _gelu(_group_norm1(_conv5(h1, w2, b2, slab_ref), g2, be2))
        h = h2 + res
    o_ref[...] = h.astype(o_ref.dtype)


# ---------------------------------- python wrapper ---------------------------------

def prepare_params(raw_blocks):
    """One-time weight prep (hoisted out of the forward): im2col reshapes etc."""
    flat, meta, conv_cins = [], [], []
    for blk in raw_blocks:
        has_skip = "w_skip" in blk
        meta.append(has_skip)
        if has_skip:
            flat.append(blk["w_skip"][:, :, 0])                       # (Cout, Cin)
        co1, ci1, k = blk["w_conv1"].shape
        flat.append(jnp.transpose(blk["w_conv1"], (0, 2, 1)).reshape(co1, k * ci1))
        flat.append(blk["b_conv1"][:, None])
        flat.append(blk["gn1_w"][:, None])
        flat.append(blk["gn1_b"][:, None])
        co2, ci2, _ = blk["w_conv2"].shape
        flat.append(jnp.transpose(blk["w_conv2"], (0, 2, 1)).reshape(co2, k * ci2))
        flat.append(blk["b_conv2"][:, None])
        flat.append(blk["gn2_w"][:, None])
        flat.append(blk["gn2_b"][:, None])
        conv_cins += [ci1, ci2]
    return dict(block_meta=tuple(meta), flat=flat,
                out_channels=raw_blocks[-1]["w_conv2"].shape[0],
                slab_rows=K * max(conv_cins))


def down_block_1d_no_skip(hidden_states, temb, prep):
    # hidden_states: (B, Cx, L); temb: (B, Ct, L)
    x_cat = jnp.concatenate([hidden_states, temb], axis=1)            # channel concat
    B, cin, L = x_cat.shape
    flat = prep["flat"]
    cout = prep["out_channels"]

    in_specs = [pl.BlockSpec((None, cin, L), lambda b: (b, 0, 0))]
    for w in flat:
        in_specs.append(pl.BlockSpec(w.shape, lambda b, nd=w.ndim: (0,) * nd))

    kernel = functools.partial(_down_block_kernel, block_meta=prep["block_meta"])
    out = pl.pallas_call(
        kernel,
        out_shape=jax.ShapeDtypeStruct((B, cout, L), hidden_states.dtype),
        grid=(B,),
        in_specs=in_specs,
        out_specs=pl.BlockSpec((None, cout, L), lambda b: (b, 0, 0)),
        scratch_shapes=[pltpu.VMEM((prep["slab_rows"], L), jnp.float32)],
        compiler_params=pltpu.CompilerParams(dimension_semantics=("parallel",)),
    )(x_cat, *flat)
    return out, (out,)


# --------------------------------- pure-JAX reference ------------------------------

def _conv1d_ref(x, w, b, padding):
    out = jax.lax.conv_general_dilated(
        x, w, window_strides=(1,), padding=[(padding, padding)],
        dimension_numbers=("NCH", "OIH", "NCH"))
    if b is not None:
        out = out + b[None, :, None]
    return out


def _gn1_ref(x, g, b):
    mu = jnp.mean(x, axis=(1, 2), keepdims=True)
    var = jnp.mean((x - mu) ** 2, axis=(1, 2), keepdims=True)
    return (x - mu) * jax.lax.rsqrt(var + _EPS) * g[None, :, None] + b[None, :, None]


def down_block_ref(hidden_states, temb, raw_blocks):
    h = jnp.concatenate([hidden_states, temb], axis=1)
    for blk in raw_blocks:
        res = _conv1d_ref(h, blk["w_skip"], None, 0) if "w_skip" in blk else h
        t = _conv1d_ref(h, blk["w_conv1"], blk["b_conv1"], P)
        t = jax.nn.gelu(_gn1_ref(t, blk["gn1_w"], blk["gn1_b"]), approximate=False)
        t = _conv1d_ref(t, blk["w_conv2"], blk["b_conv2"], P)
        t = jax.nn.gelu(_gn1_ref(t, blk["gn2_w"], blk["gn2_b"]), approximate=False)
        h = t + res
    return h


# ------------------------------------- init ----------------------------------------

def init_raw_params(key, in_channels, mid_channels, out_channels, k=K):
    defs = [(in_channels, mid_channels, mid_channels),
            (mid_channels, mid_channels, mid_channels),
            (mid_channels, mid_channels, out_channels)]
    blocks = []
    for cin, cmid, cout in defs:
        key, k0, k1, k2, k3, k4, k5, k6, k7 = jax.random.split(key, 9)
        blk = dict(
            w_conv1=jax.random.normal(k0, (cmid, cin, k), jnp.float32) / jnp.sqrt(cin * k),
            b_conv1=0.1 * jax.random.normal(k1, (cmid,), jnp.float32),
            gn1_w=1.0 + 0.1 * jax.random.normal(k2, (cmid,), jnp.float32),
            gn1_b=0.1 * jax.random.normal(k3, (cmid,), jnp.float32),
            w_conv2=jax.random.normal(k4, (cout, cmid, k), jnp.float32) / jnp.sqrt(cmid * k),
            b_conv2=0.1 * jax.random.normal(k5, (cout,), jnp.float32),
            gn2_w=1.0 + 0.1 * jax.random.normal(k6, (cout,), jnp.float32),
            gn2_b=0.1 * jax.random.normal(k7, (cout,), jnp.float32),
        )
        if cin != cout:
            key, ks = jax.random.split(key)
            blk["w_skip"] = jax.random.normal(ks, (cout, cin, 1), jnp.float32) / jnp.sqrt(cin)
        blocks.append(blk)
    return blocks


if __name__ == "__main__":
    key = jax.random.PRNGKey(0)
    kx, kt, kp = jax.random.split(key, 3)

    B, Cx, Ct, L = 2, 24, 16, 16          # hidden channels, temb channels, length
    mid_channels, out_channels = 32, 16
    in_channels = Cx + Ct                 # channels after the cat([hidden, temb])

    raw = init_raw_params(kp, in_channels, mid_channels, out_channels)
    prep = prepare_params(raw)

    x = jax.random.normal(kx, (B, Cx, L), jnp.float32)
    temb = jax.random.normal(kt, (B, Ct, L), jnp.float32)

    fwd = jax.jit(lambda xx, tt: down_block_1d_no_skip(xx, tt, prep)[0])
    out = fwd(x, temb)
    jax.block_until_ready(out)
    assert out.shape == (B, out_channels, L), out.shape

    ref = down_block_ref(x, temb, raw)
    err = float(jnp.max(jnp.abs(out - ref)))
    assert err < 5e-3, f"max abs err vs reference: {err}"
    print("KERNEL_OK")
</pallas_src>

<mosaic_0001>
module attributes {stable_mosaic.version = 11 : i64} {
  func.func @_down_block_kernel(%arg0: i32, %arg1: memref<1x40x16xf32, #tpu.memory_space<vmem>>, %arg2: memref<32x40xf32, #tpu.memory_space<vmem>>, %arg3: memref<32x200xf32, #tpu.memory_space<vmem>>, %arg4: memref<32x1xf32, #tpu.memory_space<vmem>>, %arg5: memref<32x1xf32, #tpu.memory_space<vmem>>, %arg6: memref<32x1xf32, #tpu.memory_space<vmem>>, %arg7: memref<32x160xf32, #tpu.memory_space<vmem>>, %arg8: memref<32x1xf32, #tpu.memory_space<vmem>>, %arg9: memref<32x1xf32, #tpu.memory_space<vmem>>, %arg10: memref<32x1xf32, #tpu.memory_space<vmem>>, %arg11: memref<32x160xf32, #tpu.memory_space<vmem>>, %arg12: memref<32x1xf32, #tpu.memory_space<vmem>>, %arg13: memref<32x1xf32, #tpu.memory_space<vmem>>, %arg14: memref<32x1xf32, #tpu.memory_space<vmem>>, %arg15: memref<32x160xf32, #tpu.memory_space<vmem>>, %arg16: memref<32x1xf32, #tpu.memory_space<vmem>>, %arg17: memref<32x1xf32, #tpu.memory_space<vmem>>, %arg18: memref<32x1xf32, #tpu.memory_space<vmem>>, %arg19: memref<16x32xf32, #tpu.memory_space<vmem>>, %arg20: memref<32x160xf32, #tpu.memory_space<vmem>>, %arg21: memref<32x1xf32, #tpu.memory_space<vmem>>, %arg22: memref<32x1xf32, #tpu.memory_space<vmem>>, %arg23: memref<32x1xf32, #tpu.memory_space<vmem>>, %arg24: memref<16x160xf32, #tpu.memory_space<vmem>>, %arg25: memref<16x1xf32, #tpu.memory_space<vmem>>, %arg26: memref<16x1xf32, #tpu.memory_space<vmem>>, %arg27: memref<16x1xf32, #tpu.memory_space<vmem>>, %arg28: memref<1x16x16xf32, #tpu.memory_space<vmem>>, %arg29: memref<200x16xf32, #tpu.memory_space<vmem>>) attributes {dimension_semantics = [#tpu.dimension_semantics<parallel>], iteration_bounds = array<i64: 2>, scalar_prefetch = 0 : i64, scratch_operands = 1 : i64, tpu.core_type = #tpu.core_type<tc>, window_params = [{transform_indices = @transform_0, window_bounds = array<i64: 1, 40, 16>}, {pipeline_mode = #tpu.pipeline_mode<synchronous>, transform_indices = @transform_1, window_bounds = array<i64: 32, 40>}, {pipeline_mode = #tpu.pipeline_mode<synchronous>, transform_indices = @transform_2, window_bounds = array<i64: 32, 200>}, {pipeline_mode = #tpu.pipeline_mode<synchronous>, transform_indices = @transform_3, window_bounds = array<i64: 32, 1>}, {pipeline_mode = #tpu.pipeline_mode<synchronous>, transform_indices = @transform_4, window_bounds = array<i64: 32, 1>}, {pipeline_mode = #tpu.pipeline_mode<synchronous>, transform_indices = @transform_5, window_bounds = array<i64: 32, 1>}, {pipeline_mode = #tpu.pipeline_mode<synchronous>, transform_indices = @transform_6, window_bounds = array<i64: 32, 160>}, {pipeline_mode = #tpu.pipeline_mode<synchronous>, transform_indices = @transform_7, window_bounds = array<i64: 32, 1>}, {pipeline_mode = #tpu.pipeline_mode<synchronous>, transform_indices = @transform_8, window_bounds = array<i64: 32, 1>}, {pipeline_mode = #tpu.pipeline_mode<synchronous>, transform_indices = @transform_9, window_bounds = array<i64: 32, 1>}, {pipeline_mode = #tpu.pipeline_mode<synchronous>, transform_indices = @transform_10, window_bounds = array<i64: 32, 160>}, {pipeline_mode = #tpu.pipeline_mode<synchronous>, transform_indices = @transform_11, window_bounds = array<i64: 32, 1>}, {pipeline_mode = #tpu.pipeline_mode<synchronous>, transform_indices = @transform_12, window_bounds = array<i64: 32, 1>}, {pipeline_mode = #tpu.pipeline_mode<synchronous>, transform_indices = @transform_13, window_bounds = array<i64: 32, 1>}, {pipeline_mode = #tpu.pipeline_mode<synchronous>, transform_indices = @transform_14, window_bounds = array<i64: 32, 160>}, {pipeline_mode = #tpu.pipeline_mode<synchronous>, transform_indices = @transform_15, window_bounds = array<i64: 32, 1>}, {pipeline_mode = #tpu.pipeline_mode<synchronous>, transform_indices = @transform_16, window_bounds = array<i64: 32, 1>}, {pipeline_mode = #tpu.pipeline_mode<synchronous>, transform_indices = @transform_17, window_bounds = array<i64: 32, 1>}, {pipeline_mode = #tpu.pipeline_mode<synchronous>, transform_indices = @transform_18, window_bounds = array<i64: 16, 32>}, {pipeline_mode = #tpu.pipeline_mode<synchronous>, transform_indices = @transform_19, window_bounds = array<i64: 32, 160>}, {pipeline_mode = #tpu.pipeline_mode<synchronous>, transform_indices = @transform_20, window_bounds = array<i64: 32, 1>}, {pipeline_mode = #tpu.pipeline_mode<synchronous>, transform_indices = @transform_21, window_bounds = array<i64: 32, 1>}, {pipeline_mode = #tpu.pipeline_mode<synchronous>, transform_indices = @transform_22, window_bounds = array<i64: 32, 1>}, {pipeline_mode = #tpu.pipeline_mode<synchronous>, transform_indices = @transform_23, window_bounds = array<i64: 16, 160>}, {pipeline_mode = #tpu.pipeline_mode<synchronous>, transform_indices = @transform_24, window_bounds = array<i64: 16, 1>}, {pipeline_mode = #tpu.pipeline_mode<synchronous>, transform_indices = @transform_25, window_bounds = array<i64: 16, 1>}, {pipeline_mode = #tpu.pipeline_mode<synchronous>, transform_indices = @transform_26, window_bounds = array<i64: 16, 1>}, {transform_indices = @transform_27, window_bounds = array<i64: 1, 16, 16>}]} {
    %c0 = arith.constant 0 : index
    %c0_0 = arith.constant 0 : index
    %c0_1 = arith.constant 0 : index
    %0 = vector.load %arg1[%c0, %c0_0, %c0_1] : memref<1x40x16xf32, #tpu.memory_space<vmem>>, vector<1x40x16xf32>
    %1 = vector.shape_cast %0 : vector<1x40x16xf32> to vector<40x16xf32>
    %c0_2 = arith.constant 0 : index
    %c0_3 = arith.constant 0 : index
    %2 = vector.load %arg2[%c0_2, %c0_3] : memref<32x40xf32, #tpu.memory_space<vmem>>, vector<32x40xf32>
    %cst = arith.constant dense<0.000000e+00> : vector<32x16xf32>
    %3 = tpu.matmul %2, %1, %cst {dimension_numbers = #tpu.dot_dimension_numbers<[1], [0], [0], [1], [0, 0, 1, 1], [], []>} : vector<32x40xf32>, vector<40x16xf32>, vector<32x16xf32> -> vector<32x16xf32>
    %c0_4 = arith.constant 0 : index
    %c0_5 = arith.constant 0 : index
    %4 = vector.load %arg3[%c0_4, %c0_5] : memref<32x200xf32, #tpu.memory_space<vmem>>, vector<32x200xf32>
    %c0_6 = arith.constant 0 : index
    %c0_7 = arith.constant 0 : index
    %5 = vector.load %arg4[%c0_6, %c0_7] : memref<32x1xf32, #tpu.memory_space<vmem>>, vector<32x1xf32>
    %c0_8 = arith.constant 0 : index
    %c0_9 = arith.constant 0 : index
    %6 = vector.load %arg5[%c0_8, %c0_9] : memref<32x1xf32, #tpu.memory_space<vmem>>, vector<32x1xf32>
    %c0_10 = arith.constant 0 : index
    %c0_11 = arith.constant 0 : index
    %7 = vector.load %arg6[%c0_10, %c0_11] : memref<32x1xf32, #tpu.memory_space<vmem>>, vector<32x1xf32>
    %c0_12 = arith.constant 0 : index
    %c0_13 = arith.constant 0 : index
    %8 = vector.load %arg7[%c0_12, %c0_13] : memref<32x160xf32, #tpu.memory_space<vmem>>, vector<32x160xf32>
    %c0_14 = arith.constant 0 : index
    %c0_15 = arith.constant 0 : index
    %9 = vector.load %arg8[%c0_14, %c0_15] : memref<32x1xf32, #tpu.memory_space<vmem>>, vector<32x1xf32>
    %c0_16 = arith.constant 0 : index
    %c0_17 = arith.constant 0 : index
    %10 = vector.load %arg9[%c0_16, %c0_17] : memref<32x1xf32, #tpu.memory_space<vmem>>, vector<32x1xf32>
    %c0_18 = arith.constant 0 : index
    %c0_19 = arith.constant 0 : index
    %11 = vector.load %arg10[%c0_18, %c0_19] : memref<32x1xf32, #tpu.memory_space<vmem>>, vector<32x1xf32>
    %cst_20 = arith.constant 0.000000e+00 : f32
    %12 = vector.broadcast %cst_20 : f32 to vector<200x16xf32>
    %c0_21 = arith.constant 0 : index
    %c0_22 = arith.constant 0 : index
    %13 = vector.load %arg29[%c0_21, %c0_22] : memref<200x16xf32, #tpu.memory_space<vmem>>, vector<200x16xf32>
    tpu.vector_store %arg29[%c0_21, %c0_22], %12 {strides = array<i32>} : memref<200x16xf32, #tpu.memory_space<vmem>>, vector<200x16xf32>,
    %14 = vector.extract_strided_slice %1 {offsets = [0, 0], sizes = [40, 14], strides = [1, 1]} : vector<40x16xf32> to vector<40x14xf32>
    %c0_23 = arith.constant 0 : index
    %c2 = arith.constant 2 : index
    %15 = vector.load %arg29[%c0_23, %c2] : memref<200x16xf32, #tpu.memory_space<vmem>>, vector<40x14xf32>
    tpu.vector_store %arg29[%c0_23, %c2], %14 {strides = array<i32>} : memref<200x16xf32, #tpu.memory_space<vmem>>, vector<40x14xf32>,
    %16 = vector.extract_strided_slice %1 {offsets = [0, 0], sizes = [40, 15], strides = [1, 1]} : vector<40x16xf32> to vector<40x15xf32>
    %c40 = arith.constant 40 : index
    %c1 = arith.constant 1 : index
    %17 = vector.load %arg29[%c40, %c1] : memref<200x16xf32, #tpu.memory_space<vmem>>, vector<40x15xf32>
    tpu.vector_store %arg29[%c40, %c1], %16 {strides = array<i32>} : memref<200x16xf32, #tpu.memory_space<vmem>>, vector<40x15xf32>,
    %c80 = arith.constant 80 : index
    %c0_24 = arith.constant 0 : index
    %18 = vector.load %arg29[%c80, %c0_24] : memref<200x16xf32, #tpu.memory_space<vmem>>, vector<40x16xf32>
    tpu.vector_store %arg29[%c80, %c0_24], %1 {strides = array<i32>} : memref<200x16xf32, #tpu.memory_space<vmem>>, vector<40x16xf32>,
    %19 = vector.extract_strided_slice %1 {offsets = [0, 1], sizes = [40, 15], strides = [1, 1]} : vector<40x16xf32> to vector<40x15xf32>
    %c120 = arith.constant 120 : index
    %c0_25 = arith.constant 0 : index
    %20 = vector.load %arg29[%c120, %c0_25] : memref<200x16xf32, #tpu.memory_space<vmem>>, vector<40x15xf32>
    tpu.vector_store %arg29[%c120, %c0_25], %19 {strides = array<i32>} : memref<200x16xf32, #tpu.memory_space<vmem>>, vector<40x15xf32>,
    %21 = vector.extract_strided_slice %1 {offsets = [0, 2], sizes = [40, 14], strides = [1, 1]} : vector<40x16xf32> to vector<40x14xf32>
    %c160 = arith.constant 160 : index
    %c0_26 = arith.constant 0 : index
    %22 = vector.load %arg29[%c160, %c0_26] : memref<200x16xf32, #tpu.memory_space<vmem>>, vector<40x14xf32>
    tpu.vector_store %arg29[%c160, %c0_26], %21 {strides = array<i32>} : memref<200x16xf32, #tpu.memory_space<vmem>>, vector<40x14xf32>,
    %c0_27 = arith.constant 0 : index
    %c0_28 = arith.constant 0 : index
    %23 = vector.load %arg29[%c0_27, %c0_28] : memref<200x16xf32, #tpu.memory_space<vmem>>, vector<200x16xf32>
    %cst_29 = arith.constant dense<0.000000e+00> : vector<32x16xf32>
    %24 = tpu.matmul %4, %23, %cst_29 {dimension_numbers = #tpu.dot_dimension_numbers<[1], [0], [0], [1], [0, 0, 1, 1], [], []>} : vector<32x200xf32>, vector<200x16xf32>, vector<32x16xf32> -> vector<32x16xf32>
    %25 = vector.broadcast %5 : vector<32x1xf32> to vector<32x16xf32>
    %26 = arith.addf %24, %25 : vector<32x16xf32>
    %cst_30 = arith.constant dense<0.000000e+00> : vector<32xf32>
    %27 = vector.multi_reduction <add>, %26, %cst_30 [1] : vector<32x16xf32> to vector<32xf32>
    %28 = vector.shape_cast %27 : vector<32xf32> to vector<32x1xf32>
    %cst_31 = arith.constant 1.600000e+01 : f32
    %29 = vector.broadcast %cst_31 : f32 to vector<32x1xf32>
    %30 = arith.divf %28, %29 : vector<32x1xf32>
    %cst_32 = arith.constant dense<0.000000e+00> : vector<1xf32>
    %31 = vector.multi_reduction <add>, %30, %cst_32 [0] : vector<32x1xf32> to vector<1xf32>
    %32 = vector.shape_cast %31 : vector<1xf32> to vector<1x1xf32>
    %cst_33 = arith.constant 3.200000e+01 : f32
    %33 = vector.broadcast %cst_33 : f32 to vector<1x1xf32>
    %34 = arith.divf %32, %33 : vector<1x1xf32>
    %35 = vector.broadcast %34 : vector<1x1xf32> to vector<32x16xf32>
    %36 = arith.subf %26, %35 : vector<32x16xf32>
    %37 = arith.mulf %36, %36 : vector<32x16xf32>
    %cst_34 = arith.constant dense<0.000000e+00> : vector<32xf32>
    %38 = vector.multi_reduction <add>, %37, %cst_34 [1] : vector<32x16xf32> to vector<32xf32>
    %39 = vector.shape_cast %38 : vector<32xf32> to vector<32x1xf32>
    %cst_35 = arith.constant 1.600000e+01 : f32
    %40 = vector.broadcast %cst_35 : f32 to vector<32x1xf32>
    %41 = arith.divf %39, %40 : vector<32x1xf32>
    %cst_36 = arith.constant dense<0.000000e+00> : vector<1xf32>
    %42 = vector.multi_reduction <add>, %41, %cst_36 [0] : vector<32x1xf32> to vector<1xf32>
    %43 = vector.shape_cast %42 : vector<1xf32> to vector<1x1xf32>
    %cst_37 = arith.constant 3.200000e+01 : f32
    %44 = vector.broadcast %cst_37 : f32 to vector<1x1xf32>
    %45 = arith.divf %43, %44 : vector<1x1xf32>
    %cst_38 = arith.constant 9.99999974E-6 : f32
    %46 = vector.broadcast %cst_38 : f32 to vector<1x1xf32>
    %47 = arith.addf %45, %46 : vector<1x1xf32>
    %48 = math.rsqrt %47 : vector<1x1xf32>
    %49 = vector.broadcast %48 : vector<1x1xf32> to vector<32x16xf32>
    %50 = arith.mulf %36, %49 : vector<32x16xf32>
    %51 = vector.broadcast %6 : vector<32x1xf32> to vector<32x16xf32>
    %52 = arith.mulf %50, %51 : vector<32x16xf32>
    %53 = vector.broadcast %7 : vector<32x1xf32> to vector<32x16xf32>
    %54 = arith.addf %52, %53 : vector<32x16xf32>
    %cst_39 = arith.constant 5.000000e-01 : f32
    %55 = vector.broadcast %cst_39 : f32 to vector<32x16xf32>
    %56 = arith.mulf %55, %54 : vector<32x16xf32>
    %cst_40 = arith.constant 0.707106769 : f32
    %57 = vector.broadcast %cst_40 : f32 to vector<32x16xf32>
    %58 = arith.mulf %54, %57 : vector<32x16xf32>
    %59 = math.absf %58 : vector<32x16xf32>
    %cst_41 = arith.constant 0.327591091 : f32
    %60 = vector.broadcast %cst_41 : f32 to vector<32x16xf32>
    %61 = arith.mulf %60, %59 : vector<32x16xf32>
    %cst_42 = arith.constant 1.000000e+00 : f32
    %62 = vector.broadcast %cst_42 : f32 to vector<32x16xf32>
    %63 = arith.addf %62, %61 : vector<32x16xf32>
    %cst_43 = arith.constant 1.000000e+00 : f32
    %64 = vector.broadcast %cst_43 : f32 to vector<32x16xf32>
    %65 = arith.divf %64, %63 : vector<32x16xf32>
    %cst_44 = arith.constant 1.06140542 : f32
    %66 = vector.broadcast %cst_44 : f32 to vector<32x16xf32>
    %67 = arith.mulf %66, %65 : vector<32x16xf32>
    %cst_45 = arith.constant 1.45315206 : f32
    %68 = vector.broadcast %cst_45 : f32 to vector<32x16xf32>
    %69 = arith.subf %67, %68 : vector<32x16xf32>
    %70 = arith.mulf %69, %65 : vector<32x16xf32>
    %cst_46 = arith.constant 1.42141378 : f32
    %71 = vector.broadcast %cst_46 : f32 to vector<32x16xf32>
    %72 = arith.addf %70, %71 : vector<32x16xf32>
    %73 = arith.mulf %72, %65 : vector<32x16xf32>
    %cst_47 = arith.constant 0.284496725 : f32
    %74 = vector.broadcast %cst_47 : f32 to vector<32x16xf32>
    %75 = arith.subf %73, %74 : vector<32x16xf32>
    %76 = arith.mulf %75, %65 : vector<32x16xf32>
    %cst_48 = arith.constant 0.254829586 : f32
    %77 = vector.broadcast %cst_48 : f32 to vector<32x16xf32>
    %78 = arith.addf %76, %77 : vector<32x16xf32>
    %79 = arith.mulf %78, %65 : vector<32x16xf32>
    %cst_49 = arith.constant 0.000000e+00 : f32
    %80 = vector.broadcast %cst_49 : f32 to vector<32x16xf32>
    %81 = arith.subf %80, %59 : vector<32x16xf32>
    %82 = arith.mulf %81, %59 : vector<32x16xf32>
    %83 = math.exp %82 : vector<32x16xf32>
    %84 = arith.mulf %79, %83 : vector<32x16xf32>
    %cst_50 = arith.constant 1.000000e+00 : f32
    %85 = vector.broadcast %cst_50 : f32 to vector<32x16xf32>
    %86 = arith.subf %85, %84 : vector<32x16xf32>
    %cst_51 = arith.constant 0.000000e+00 : f32
    %87 = vector.broadcast %cst_51 : f32 to vector<32x16xf32>
    %88 = arith.cmpf oge, %58, %87 : vector<32x16xf32>
    %cst_52 = arith.constant 0.000000e+00 : f32
    %89 = vector.broadcast %cst_52 : f32 to vector<32x16xf32>
    %90 = arith.subf %89, %86 : vector<32x16xf32>
    %91 = arith.select %88, %86, %90 : vector<32x16xi1>, vector<32x16xf32>
    %cst_53 = arith.constant 1.000000e+00 : f32
    %92 = vector.broadcast %cst_53 : f32 to vector<32x16xf32>
    %93 = arith.addf %92, %91 : vector<32x16xf32>
    %94 = arith.mulf %56, %93 : vector<32x16xf32>
    %cst_54 = arith.constant 0.000000e+00 : f32
    %95 = vector.broadcast %cst_54 : f32 to vector<200x16xf32>
    %c0_55 = arith.constant 0 : index
    %c0_56 = arith.constant 0 : index
    %96 = vector.load %arg29[%c0_55, %c0_56] : memref<200x16xf32, #tpu.memory_space<vmem>>, vector<200x16xf32>
    tpu.vector_store %arg29[%c0_55, %c0_56], %95 {strides = array<i32>} : memref<200x16xf32, #tpu.memory_space<vmem>>, vector<200x16xf32>,
    %97 = vector.extract_strided_slice %94 {offsets = [0, 0], sizes = [32, 14], strides = [1, 1]} : vector<32x16xf32> to vector<32x14xf32>
    %c0_57 = arith.constant 0 : index
    %c2_58 = arith.constant 2 : index
    %98 = vector.load %arg29[%c0_57, %c2_58] : memref<200x16xf32, #tpu.memory_space<vmem>>, vector<32x14xf32>
    tpu.vector_store %arg29[%c0_57, %c2_58], %97 {strides = array<i32>} : memref<200x16xf32, #tpu.memory_space<vmem>>, vector<32x14xf32>,
    %99 = vector.extract_strided_slice %94 {offsets = [0, 0], sizes = [32, 15], strides = [1, 1]} : vector<32x16xf32> to vector<32x15xf32>
    %c32 = arith.constant 32 : index
    %c1_59 = arith.constant 1 : index
    %100 = vector.load %arg29[%c32, %c1_59] : memref<200x16xf32, #tpu.memory_space<vmem>>, vector<32x15xf32>
    tpu.vector_store %arg29[%c32, %c1_59], %99 {strides = array<i32>} : memref<200x16xf32, #tpu.memory_space<vmem>>, vector<32x15xf32>,
    %c64 = arith.constant 64 : index
    %c0_60 = arith.constant 0 : index
    %101 = vector.load %arg29[%c64, %c0_60] : memref<200x16xf32, #tpu.memory_space<vmem>>, vector<32x16xf32>
    tpu.vector_store %arg29[%c64, %c0_60], %94 {strides = array<i32>} : memref<200x16xf32, #tpu.memory_space<vmem>>, vector<32x16xf32>,
    %102 = vector.extract_strided_slice %94 {offsets = [0, 1], sizes = [32, 15], strides = [1, 1]} : vector<32x16xf32> to vector<32x15xf32>
    %c96 = arith.constant 96 : index
    %c0_61 = arith.constant 0 : index
    %103 = vector.load %arg29[%c96, %c0_61] : memref<200x16xf32, #tpu.memory_space<vmem>>, vector<32x15xf32>
    tpu.vector_store %arg29[%c96, %c0_61], %102 {strides = array<i32>} : memref<200x16xf32, #tpu.memory_space<vmem>>, vector<32x15xf32>,
    %104 = vector.extract_strided_slice %94 {offsets = [0, 2], sizes = [32, 14], strides = [1, 1]} : vector<32x16xf32> to vector<32x14xf32>
    %c128 = arith.constant 128 : index
    %c0_62 = arith.constant 0 : index
    %105 = vector.load %arg29[%c128, %c0_62] : memref<200x16xf32, #tpu.memory_space<vmem>>, vector<32x14xf32>
    tpu.vector_store %arg29[%c128, %c0_62], %104 {strides = array<i32>} : memref<200x16xf32, #tpu.memory_space<vmem>>, vector<32x14xf32>,
    %c0_63 = arith.constant 0 : index
    %c0_64 = arith.constant 0 : index
    %106 = vector.load %arg29[%c0_63, %c0_64] : memref<200x16xf32, #tpu.memory_space<vmem>>, vector<160x16xf32>
    %cst_65 = arith.constant dense<0.000000e+00> : vector<32x16xf32>
    %107 = tpu.matmul %8, %106, %cst_65 {dimension_numbers = #tpu.dot_dimension_numbers<[1], [0], [0], [1], [0, 0, 1, 1], [], []>} : vector<32x160xf32>, vector<160x16xf32>, vector<32x16xf32> -> vector<32x16xf32>
    %108 = vector.broadcast %9 : vector<32x1xf32> to vector<32x16xf32>
    %109 = arith.addf %107, %108 : vector<32x16xf32>
    %cst_66 = arith.constant dense<0.000000e+00> : vector<32xf32>
    %110 = vector.multi_reduction <add>, %109, %cst_66 [1] : vector<32x16xf32> to vector<32xf32>
    %111 = vector.shape_cast %110 : vector<32xf32> to vector<32x1xf32>
    %cst_67 = arith.constant 1.600000e+01 : f32
    %112 = vector.broadcast %cst_67 : f32 to vector<32x1xf32>
    %113 = arith.divf %111, %112 : vector<32x1xf32>
    %cst_68 = arith.constant dense<0.000000e+00> : vector<1xf32>
    %114 = vector.multi_reduction <add>, %113, %cst_68 [0] : vector<32x1xf32> to vector<1xf32>
    %115 = vector.shape_cast %114 : vector<1xf32> to vector<1x1xf32>
    %cst_69 = arith.constant 3.200000e+01 : f32
    %116 = vector.broadcast %cst_69 : f32 to vector<1x1xf32>
    %117 = arith.divf %115, %116 : vector<1x1xf32>
    %118 = vector.broadcast %117 : vector<1x1xf32> to vector<32x16xf32>
    %119 = arith.subf %109, %118 : vector<32x16xf32>
    %120 = arith.mulf %119, %119 : vector<32x16xf32>
    %cst_70 = arith.constant dense<0.000000e+00> : vector<32xf32>
    %121 = vector.multi_reduction <add>, %120, %cst_70 [1] : vector<32x16xf32> to vector<32xf32>
    %122 = vector.shape_cast %121 : vector<32xf32> to vector<32x1xf32>
    %cst_71 = arith.constant 1.600000e+01 : f32
    %123 = vector.broadcast %cst_71 : f32 to vector<32x1xf32>
    %124 = arith.divf %122, %123 : vector<32x1xf32>
    %cst_72 = arith.constant dense<0.000000e+00> : vector<1xf32>
    %125 = vector.multi_reduction <add>, %124, %cst_72 [0] : vector<32x1xf32> to vector<1xf32>
    %126 = vector.shape_cast %125 : vector<1xf32> to vector<1x1xf32>
    %cst_73 = arith.constant 3.200000e+01 : f32
    %127 = vector.broadcast %cst_73 : f32 to vector<1x1xf32>
    %128 = arith.divf %126, %127 : vector<1x1xf32>
    %cst_74 = arith.constant 9.99999974E-6 : f32
    %129 = vector.broadcast %cst_74 : f32 to vector<1x1xf32>
    %130 = arith.addf %128, %129 : vector<1x1xf32>
    %131 = math.rsqrt %130 : vector<1x1xf32>
    %132 = vector.broadcast %131 : vector<1x1xf32> to vector<32x16xf32>
    %133 = arith.mulf %119, %132 : vector<32x16xf32>
    %134 = vector.broadcast %10 : vector<32x1xf32> to vector<32x16xf32>
    %135 = arith.mulf %133, %134 : vector<32x16xf32>
    %136 = vector.broadcast %11 : vector<32x1xf32> to vector<32x16xf32>
    %137 = arith.addf %135, %136 : vector<32x16xf32>
    %cst_75 = arith.constant 5.000000e-01 : f32
    %138 = vector.broadcast %cst_75 : f32 to vector<32x16xf32>
    %139 = arith.mulf %138, %137 : vector<32x16xf32>
    %cst_76 = arith.constant 0.707106769 : f32
    %140 = vector.broadcast %cst_76 : f32 to vector<32x16xf32>
    %141 = arith.mulf %137, %140 : vector<32x16xf32>
    %142 = math.absf %141 : vector<32x16xf32>
    %cst_77 = arith.constant 0.327591091 : f32
    %143 = vector.broadcast %cst_77 : f32 to vector<32x16xf32>
    %144 = arith.mulf %143, %142 : vector<32x16xf32>
    %cst_78 = arith.constant 1.000000e+00 : f32
    %145 = vector.broadcast %cst_78 : f32 to vector<32x16xf32>
    %146 = arith.addf %145, %144 : vector<32x16xf32>
    %cst_79 = arith.constant 1.000000e+00 : f32
    %147 = vector.broadcast %cst_79 : f32 to vector<32x16xf32>
    %148 = arith.divf %147, %146 : vector<32x16xf32>
    %cst_80 = arith.constant 1.06140542 : f32
    %149 = vector.broadcast %cst_80 : f32 to vector<32x16xf32>
    %150 = arith.mulf %149, %148 : vector<32x16xf32>
    %cst_81 = arith.constant 1.45315206 : f32
    %151 = vector.broadcast %cst_81 : f32 to vector<32x16xf32>
    %152 = arith.subf %150, %151 : vector<32x16xf32>
    %153 = arith.mulf %152, %148 : vector<32x16xf32>
    %cst_82 = arith.constant 1.42141378 : f32
    %154 = vector.broadcast %cst_82 : f32 to vector<32x16xf32>
    %155 = arith.addf %153, %154 : vector<32x16xf32>
    %156 = arith.mulf %155, %148 : vector<32x16xf32>
    %cst_83 = arith.constant 0.284496725 : f32
    %157 = vector.broadcast %cst_83 : f32 to vector<32x16xf32>
    %158 = arith.subf %156, %157 : vector<32x16xf32>
    %159 = arith.mulf %158, %148 : vector<32x16xf32>
    %cst_84 = arith.constant 0.254829586 : f32
    %160 = vector.broadcast %cst_84 : f32 to vector<32x16xf32>
    %161 = arith.addf %159, %160 : vector<32x16xf32>
    %162 = arith.mulf %161, %148 : vector<32x16xf32>
    %cst_85 = arith.constant 0.000000e+00 : f32
    %163 = vector.broadcast %cst_85 : f32 to vector<32x16xf32>
    %164 = arith.subf %163, %142 : vector<32x16xf32>
    %165 = arith.mulf %164, %142 : vector<32x16xf32>
    %166 = math.exp %165 : vector<32x16xf32>
    %167 = arith.mulf %162, %166 : vector<32x16xf32>
    %cst_86 = arith.constant 1.000000e+00 : f32
    %168 = vector.broadcast %cst_86 : f32 to vector<32x16xf32>
    %169 = arith.subf %168, %167 : vector<32x16xf32>
    %cst_87 = arith.constant 0.000000e+00 : f32
    %170 = vector.broadcast %cst_87 : f32 to vector<32x16xf32>
    %171 = arith.cmpf oge, %141, %170 : vector<32x16xf32>
    %cst_88 = arith.constant 0.000000e+00 : f32
    %172 = vector.broadcast %cst_88 : f32 to vector<32x16xf32>
    %173 = arith.subf %172, %169 : vector<32x16xf32>
    %174 = arith.select %171, %169, %173 : vector<32x16xi1>, vector<32x16xf32>
    %cst_89 = arith.constant 1.000000e+00 : f32
    %175 = vector.broadcast %cst_89 : f32 to vector<32x16xf32>
    %176 = arith.addf %175, %174 : vector<32x16xf32>
    %177 = arith.mulf %139, %176 : vector<32x16xf32>
    %178 = arith.addf %177, %3 : vector<32x16xf32>
    %c0_90 = arith.constant 0 : index
    %c0_91 = arith.constant 0 : index
    %179 = vector.load %arg11[%c0_90, %c0_91] : memref<32x160xf32, #tpu.memory_space<vmem>>, vector<32x160xf32>
    %c0_92 = arith.constant 0 : index
    %c0_93 = arith.constant 0 : index
    %180 = vector.load %arg12[%c0_92, %c0_93] : memref<32x1xf32, #tpu.memory_space<vmem>>, vector<32x1xf32>
    %c0_94 = arith.constant 0 : index
    %c0_95 = arith.constant 0 : index
    %181 = vector.load %arg13[%c0_94, %c0_95] : memref<32x1xf32, #tpu.memory_space<vmem>>, vector<32x1xf32>
    %c0_96 = arith.constant 0 : index
    %c0_97 = arith.constant 0 : index
    %182 = vector.load %arg14[%c0_96, %c0_97] : memref<32x1xf32, #tpu.memory_space<vmem>>, vector<32x1xf32>
    %c0_98 = arith.constant 0 : index
    %c0_99 = arith.constant 0 : index
    %183 = vector.load %arg15[%c0_98, %c0_99] : memref<32x160xf32, #tpu.memory_space<vmem>>, vector<32x160xf32>
    %c0_100 = arith.constant 0 : index
    %c0_101 = arith.constant 0 : index
    %184 = vector.load %arg16[%c0_100, %c0_101] : memref<32x1xf32, #tpu.memory_space<vmem>>, vector<32x1xf32>
    %c0_102 = arith.constant 0 : index
    %c0_103 = arith.constant 0 : index
    %185 = vector.load %arg17[%c0_102, %c0_103] : memref<32x1xf32, #tpu.memory_space<vmem>>, vector<32x1xf32>
    %c0_104 = arith.constant 0 : index
    %c0_105 = arith.constant 0 : index
    %186 = vector.load %arg18[%c0_104, %c0_105] : memref<32x1xf32, #tpu.memory_space<vmem>>, vector<32x1xf32>
    %cst_106 = arith.constant 0.000000e+00 : f32
    %187 = vector.broadcast %cst_106 : f32 to vector<200x16xf32>
    %c0_107 = arith.constant 0 : index
    %c0_108 = arith.constant 0 : index
    %188 = vector.load %arg29[%c0_107, %c0_108] : memref<200x16xf32, #tpu.memory_space<vmem>>, vector<200x16xf32>
    tpu.vector_store %arg29[%c0_107, %c0_108], %187 {strides = array<i32>} : memref<200x16xf32, #tpu.memory_space<vmem>>, vector<200x16xf32>,
    %189 = vector.extract_strided_slice %178 {offsets = [0, 0], sizes = [32, 14], strides = [1, 1]} : vector<32x16xf32> to vector<32x14xf32>
    %c0_109 = arith.constant 0 : index
    %c2_110 = arith.constant 2 : index
    %190 = vector.load %arg29[%c0_109, %c2_110] : memref<200x16xf32, #tpu.memory_space<vmem>>, vector<32x14xf32>
    tpu.vector_store %arg29[%c0_109, %c2_110], %189 {strides = array<i32>} : memref<200x16xf32, #tpu.memory_space<vmem>>, vector<32x14xf32>,
    %191 = vector.extract_strided_slice %178 {offsets = [0, 0], sizes = [32, 15], strides = [1, 1]} : vector<32x16xf32> to vector<32x15xf32>
    %c32_111 = arith.constant 32 : index
    %c1_112 = arith.constant 1 : index
    %192 = vector.load %arg29[%c32_111, %c1_112] : memref<200x16xf32, #tpu.memory_space<vmem>>, vector<32x15xf32>
    tpu.vector_store %arg29[%c32_111, %c1_112], %191 {strides = array<i32>} : memref<200x16xf32, #tpu.memory_space<vmem>>, vector<32x15xf32>,
    %c64_113 = arith.constant 64 : index
    %c0_114 = arith.constant 0 : index
    %193 = vector.load %arg29[%c64_113, %c0_114] : memref<200x16xf32, #tpu.memory_space<vmem>>, vector<32x16xf32>
    tpu.vector_store %arg29[%c64_113, %c0_114], %178 {strides = array<i32>} : memref<200x16xf32, #tpu.memory_space<vmem>>, vector<32x16xf32>,
    %194 = vector.extract_strided_slice %178 {offsets = [0, 1], sizes = [32, 15], strides = [1, 1]} : vector<32x16xf32> to vector<32x15xf32>
    %c96_115 = arith.constant 96 : index
    %c0_116 = arith.constant 0 : index
    %195 = vector.load %arg29[%c96_115, %c0_116] : memref<200x16xf32, #tpu.memory_space<vmem>>, vector<32x15xf32>
    tpu.vector_store %arg29[%c96_115, %c0_116], %194 {strides = array<i32>} : memref<200x16xf32, #tpu.memory_space<vmem>>, vector<32x15xf32>,
    %196 = vector.extract_strided_slice %178 {offsets = [0, 2], sizes = [32, 14], strides = [1, 1]} : vector<32x16xf32> to vector<32x14xf32>
    %c128_117 = arith.constant 128 : index
    %c0_118 = arith.constant 0 : index
    %197 = vector.load %arg29[%c128_117, %c0_118] : memref<200x16xf32, #tpu.memory_space<vmem>>, vector<32x14xf32>
    tpu.vector_store %arg29[%c128_117, %c0_118], %196 {strides = array<i32>} : memref<200x16xf32, #tpu.memory_space<vmem>>, vector<32x14xf32>,
    %c0_119 = arith.constant 0 : index
    %c0_120 = arith.constant 0 : index
    %198 = vector.load %arg29[%c0_119, %c0_120] : memref<200x16xf32, #tpu.memory_space<vmem>>, vector<160x16xf32>
    %cst_121 = arith.constant dense<0.000000e+00> : vector<32x16xf32>
    %199 = tpu.matmul %179, %198, %cst_121 {dimension_numbers = #tpu.dot_dimension_numbers<[1], [0], [0], [1], [0, 0, 1, 1], [], []>} : vector<32x160xf32>, vector<160x16xf32>, vector<32x16xf32> -> vector<32x16xf32>
    %200 = vector.broadcast %180 : vector<32x1xf32> to vector<32x16xf32>
    %201 = arith.addf %199, %200 : vector<32x16xf32>
    %cst_122 = arith.constant dense<0.000000e+00> : vector<32xf32>
    %202 = vector.multi_reduction <add>, %201, %cst_122 [1] : vector<32x16xf32> to vector<32xf32>
    %203 = vector.shape_cast %202 : vector<32xf32> to vector<32x1xf32>
    %cst_123 = arith.constant 1.600000e+01 : f32
    %204 = vector.broadcast %cst_123 : f32 to vector<32x1xf32>
    %205 = arith.divf %203, %204 : vector<32x1xf32>
    %cst_124 = arith.constant dense<0.000000e+00> : vector<1xf32>
    %206 = vector.multi_reduction <add>, %205, %cst_124 [0] : vector<32x1xf32> to vector<1xf32>
    %207 = vector.shape_cast %206 : vector<1xf32> to vector<1x1xf32>
    %cst_125 = arith.constant 3.200000e+01 : f32
    %208 = vector.broadcast %cst_125 : f32 to vector<1x1xf32>
    %209 = arith.divf %207, %208 : vector<1x1xf32>
    %210 = vector.broadcast %209 : vector<1x1xf32> to vector<32x16xf32>
    %211 = arith.subf %201, %210 : vector<32x16xf32>
    %212 = arith.mulf %211, %211 : vector<32x16xf32>
    %cst_126 = arith.constant dense<0.000000e+00> : vector<32xf32>
    %213 = vector.multi_reduction <add>, %212, %cst_126 [1] : vector<32x16xf32> to vector<32xf32>
    %214 = vector.shape_cast %213 : vector<32xf32> to vector<32x1xf32>
    %cst_127 = arith.constant 1.600000e+01 : f32
    %215 = vector.broadcast %cst_127 : f32 to vector<32x1xf32>
    %216 = arith.divf %214, %215 : vector<32x1xf32>
    %cst_128 = arith.constant dense<0.000000e+00> : vector<1xf32>
    %217 = vector.multi_reduction <add>, %216, %cst_128 [0] : vector<32x1xf32> to vector<1xf32>
    %218 = vector.shape_cast %217 : vector<1xf32> to vector<1x1xf32>
    %cst_129 = arith.constant 3.200000e+01 : f32
    %219 = vector.broadcast %cst_129 : f32 to vector<1x1xf32>
    %220 = arith.divf %218, %219 : vector<1x1xf32>
    %cst_130 = arith.constant 9.99999974E-6 : f32
    %221 = vector.broadcast %cst_130 : f32 to vector<1x1xf32>
    %222 = arith.addf %220, %221 : vector<1x1xf32>
    %223 = math.rsqrt %222 : vector<1x1xf32>
    %224 = vector.broadcast %223 : vector<1x1xf32> to vector<32x16xf32>
    %225 = arith.mulf %211, %224 : vector<32x16xf32>
    %226 = vector.broadcast %181 : vector<32x1xf32> to vector<32x16xf32>
    %227 = arith.mulf %225, %226 : vector<32x16xf32>
    %228 = vector.broadcast %182 : vector<32x1xf32> to vector<32x16xf32>
    %229 = arith.addf %227, %228 : vector<32x16xf32>
    %cst_131 = arith.constant 5.000000e-01 : f32
    %230 = vector.broadcast %cst_131 : f32 to vector<32x16xf32>
    %231 = arith.mulf %230, %229 : vector<32x16xf32>
    %cst_132 = arith.constant 0.707106769 : f32
    %232 = vector.broadcast %cst_132 : f32 to vector<32x16xf32>
    %233 = arith.mulf %229, %232 : vector<32x16xf32>
    %234 = math.absf %233 : vector<32x16xf32>
    %cst_133 = arith.constant 0.327591091 : f32
    %235 = vector.broadcast %cst_133 : f32 to vector<32x16xf32>
    %236 = arith.mulf %235, %234 : vector<32x16xf32>
    %cst_134 = arith.constant 1.000000e+00 : f32
    %237 = vector.broadcast %cst_134 : f32 to vector<32x16xf32>
    %238 = arith.addf %237, %236 : vector<32x16xf32>
    %cst_135 = arith.constant 1.000000e+00 : f32
    %239 = vector.broadcast %cst_135 : f32 to vector<32x16xf32>
    %240 = arith.divf %239, %238 : vector<32x16xf32>
    %cst_136 = arith.constant 1.06140542 : f32
    %241 = vector.broadcast %cst_136 : f32 to vector<32x16xf32>
    %242 = arith.mulf %241, %240 : vector<32x16xf32>
    %cst_137 = arith.constant 1.45315206 : f32
    %243 = vector.broadcast %cst_137 : f32 to vector<32x16xf32>
    %244 = arith.subf %242, %243 : vector<32x16xf32>
    %245 = arith.mulf %244, %240 : vector<32x16xf32>
    %cst_138 = arith.constant 1.42141378 : f32
    %246 = vector.broadcast %cst_138 : f32 to vector<32x16xf32>
    %247 = arith.addf %245, %246 : vector<32x16xf32>
    %248 = arith.mulf %247, %240 : vector<32x16xf32>
    %cst_139 = arith.constant 0.284496725 : f32
    %249 = vector.broadcast %cst_139 : f32 to vector<32x16xf32>
    %250 = arith.subf %248, %249 : vector<32x16xf32>
    %251 = arith.mulf %250, %240 : vector<32x16xf32>
    %cst_140 = arith.constant 0.254829586 : f32
    %252 = vector.broadcast %cst_140 : f32 to vector<32x16xf32>
    %253 = arith.addf %251, %252 : vector<32x16xf32>
    %254 = arith.mulf %253, %240 : vector<32x16xf32>
    %cst_141 = arith.constant 0.000000e+00 : f32
    %255 = vector.broadcast %cst_141 : f32 to vector<32x16xf32>
    %256 = arith.subf %255, %234 : vector<32x16xf32>
    %257 = arith.mulf %256, %234 : vector<32x16xf32>
    %258 = math.exp %257 : vector<32x16xf32>
    %259 = arith.mulf %254, %258 : vector<32x16xf32>
    %cst_142 = arith.constant 1.000000e+00 : f32
    %260 = vector.broadcast %cst_142 : f32 to vector<32x16xf32>
    %261 = arith.subf %260, %259 : vector<32x16xf32>
    %cst_143 = arith.constant 0.000000e+00 : f32
    %262 = vector.broadcast %cst_143 : f32 to vector<32x16xf32>
    %263 = arith.cmpf oge, %233, %262 : vector<32x16xf32>
    %cst_144 = arith.constant 0.000000e+00 : f32
    %264 = vector.broadcast %cst_144 : f32 to vector<32x16xf32>
    %265 = arith.subf %264, %261 : vector<32x16xf32>
    %266 = arith.select %263, %261, %265 : vector<32x16xi1>, vector<32x16xf32>
    %cst_145 = arith.constant 1.000000e+00 : f32
    %267 = vector.broadcast %cst_145 : f32 to vector<32x16xf32>
    %268 = arith.addf %267, %266 : vector<32x16xf32>
    %269 = arith.mulf %231, %268 : vector<32x16xf32>
    %cst_146 = arith.constant 0.000000e+00 : f32
    %270 = vector.broadcast %cst_146 : f32 to vector<200x16xf32>
    %c0_147 = arith.constant 0 : index
    %c0_148 = arith.constant 0 : index
    %271 = vector.load %arg29[%c0_147, %c0_148] : memref<200x16xf32, #tpu.memory_space<vmem>>, vector<200x16xf32>
    tpu.vector_store %arg29[%c0_147, %c0_148], %270 {strides = array<i32>} : memref<200x16xf32, #tpu.memory_space<vmem>>, vector<200x16xf32>,
    %272 = vector.extract_strided_slice %269 {offsets = [0, 0], sizes = [32, 14], strides = [1, 1]} : vector<32x16xf32> to vector<32x14xf32>
    %c0_149 = arith.constant 0 : index
    %c2_150 = arith.constant 2 : index
    %273 = vector.load %arg29[%c0_149, %c2_150] : memref<200x16xf32, #tpu.memory_space<vmem>>, vector<32x14xf32>
    tpu.vector_store %arg29[%c0_149, %c2_150], %272 {strides = array<i32>} : memref<200x16xf32, #tpu.memory_space<vmem>>, vector<32x14xf32>,
    %274 = vector.extract_strided_slice %269 {offsets = [0, 0], sizes = [32, 15], strides = [1, 1]} : vector<32x16xf32> to vector<32x15xf32>
    %c32_151 = arith.constant 32 : index
    %c1_152 = arith.constant 1 : index
    %275 = vector.load %arg29[%c32_151, %c1_152] : memref<200x16xf32, #tpu.memory_space<vmem>>, vector<32x15xf32>
    tpu.vector_store %arg29[%c32_151, %c1_152], %274 {strides = array<i32>} : memref<200x16xf32, #tpu.memory_space<vmem>>, vector<32x15xf32>,
    %c64_153 = arith.constant 64 : index
    %c0_154 = arith.constant 0 : index
    %276 = vector.load %arg29[%c64_153, %c0_154] : memref<200x16xf32, #tpu.memory_space<vmem>>, vector<32x16xf32>
    tpu.vector_store %arg29[%c64_153, %c0_154], %269 {strides = array<i32>} : memref<200x16xf32, #tpu.memory_space<vmem>>, vector<32x16xf32>,
    %277 = vector.extract_strided_slice %269 {offsets = [0, 1], sizes = [32, 15], strides = [1, 1]} : vector<32x16xf32> to vector<32x15xf32>
    %c96_155 = arith.constant 96 : index
    %c0_156 = arith.constant 0 : index
    %278 = vector.load %arg29[%c96_155, %c0_156] : memref<200x16xf32, #tpu.memory_space<vmem>>, vector<32x15xf32>
    tpu.vector_store %arg29[%c96_155, %c0_156], %277 {strides = array<i32>} : memref<200x16xf32, #tpu.memory_space<vmem>>, vector<32x15xf32>,
    %279 = vector.extract_strided_slice %269 {offsets = [0, 2], sizes = [32, 14], strides = [1, 1]} : vector<32x16xf32> to vector<32x14xf32>
    %c128_157 = arith.constant 128 : index
    %c0_158 = arith.constant 0 : index
    %280 = vector.load %arg29[%c128_157, %c0_158] : memref<200x16xf32, #tpu.memory_space<vmem>>, vector<32x14xf32>
    tpu.vector_store %arg29[%c128_157, %c0_158], %279 {strides = array<i32>} : memref<200x16xf32, #tpu.memory_space<vmem>>, vector<32x14xf32>,
    %c0_159 = arith.constant 0 : index
    %c0_160 = arith.constant 0 : index
    %281 = vector.load %arg29[%c0_159, %c0_160] : memref<200x16xf32, #tpu.memory_space<vmem>>, vector<160x16xf32>
    %cst_161 = arith.constant dense<0.000000e+00> : vector<32x16xf32>
    %282 = tpu.matmul %183, %281, %cst_161 {dimension_numbers = #tpu.dot_dimension_numbers<[1], [0], [0], [1], [0, 0, 1, 1], [], []>} : vector<32x160xf32>, vector<160x16xf32>, vector<32x16xf32> -> vector<32x16xf32>
    %283 = vector.broadcast %184 : vector<32x1xf32> to vector<32x16xf32>
    %284 = arith.addf %282, %283 : vector<32x16xf32>
    %cst_162 = arith.constant dense<0.000000e+00> : vector<32xf32>
    %285 = vector.multi_reduction <add>, %284, %cst_162 [1] : vector<32x16xf32> to vector<32xf32>
    %286 = vector.shape_cast %285 : vector<32xf32> to vector<32x1xf32>
    %cst_163 = arith.constant 1.600000e+01 : f32
    %287 = vector.broadcast %cst_163 : f32 to vector<32x1xf32>
    %288 = arith.divf %286, %287 : vector<32x1xf32>
    %cst_164 = arith.constant dense<0.000000e+00> : vector<1xf32>
    %289 = vector.multi_reduction <add>, %288, %cst_164 [0] : vector<32x1xf32> to vector<1xf32>
    %290 = vector.shape_cast %289 : vector<1xf32> to vector<1x1xf32>
    %cst_165 = arith.constant 3.200000e+01 : f32
    %291 = vector.broadcast %cst_165 : f32 to vector<1x1xf32>
    %292 = arith.divf %290, %291 : vector<1x1xf32>
    %293 = vector.broadcast %292 : vector<1x1xf32> to vector<32x16xf32>
    %294 = arith.subf %284, %293 : vector<32x16xf32>
    %295 = arith.mulf %294, %294 : vector<32x16xf32>
    %cst_166 = arith.constant dense<0.000000e+00> : vector<32xf32>
    %296 = vector.multi_reduction <add>, %295, %cst_166 [1] : vector<32x16xf32> to vector<32xf32>
    %297 = vector.shape_cast %296 : vector<32xf32> to vector<32x1xf32>
    %cst_167 = arith.constant 1.600000e+01 : f32
    %298 = vector.broadcast %cst_167 : f32 to vector<32x1xf32>
    %299 = arith.divf %297, %298 : vector<32x1xf32>
    %cst_168 = arith.constant dense<0.000000e+00> : vector<1xf32>
    %300 = vector.multi_reduction <add>, %299, %cst_168 [0] : vector<32x1xf32> to vector<1xf32>
    %301 = vector.shape_cast %300 : vector<1xf32> to vector<1x1xf32>
    %cst_169 = arith.constant 3.200000e+01 : f32
    %302 = vector.broadcast %cst_169 : f32 to vector<1x1xf32>
    %303 = arith.divf %301, %302 : vector<1x1xf32>
    %cst_170 = arith.constant 9.99999974E-6 : f32
    %304 = vector.broadcast %cst_170 : f32 to vector<1x1xf32>
    %305 = arith.addf %303, %304 : vector<1x1xf32>
    %306 = math.rsqrt %305 : vector<1x1xf32>
    %307 = vector.broadcast %306 : vector<1x1xf32> to vector<32x16xf32>
    %308 = arith.mulf %294, %307 : vector<32x16xf32>
    %309 = vector.broadcast %185 : vector<32x1xf32> to vector<32x16xf32>
    %310 = arith.mulf %308, %309 : vector<32x16xf32>
    %311 = vector.broadcast %186 : vector<32x1xf32> to vector<32x16xf32>
    %312 = arith.addf %310, %311 : vector<32x16xf32>
    %cst_171 = arith.constant 5.000000e-01 : f32
    %313 = vector.broadcast %cst_171 : f32 to vector<32x16xf32>
    %314 = arith.mulf %313, %312 : vector<32x16xf32>
    %cst_172 = arith.constant 0.707106769 : f32
    %315 = vector.broadcast %cst_172 : f32 to vector<32x16xf32>
    %316 = arith.mulf %312, %315 : vector<32x16xf32>
    %317 = math.absf %316 : vector<32x16xf32>
    %cst_173 = arith.constant 0.327591091 : f32
    %318 = vector.broadcast %cst_173 : f32 to vector<32x16xf32>
    %319 = arith.mulf %318, %317 : vector<32x16xf32>
    %cst_174 = arith.constant 1.000000e+00 : f32
    %320 = vector.broadcast %cst_174 : f32 to vector<32x16xf32>
    %321 = arith.addf %320, %319 : vector<32x16xf32>
    %cst_175 = arith.constant 1.000000e+00 : f32
    %322 = vector.broadcast %cst_175 : f32 to vector<32x16xf32>
    %323 = arith.divf %322, %321 : vector<32x16xf32>
    %cst_176 = arith.constant 1.06140542 : f32
    %324 = vector.broadcast %cst_176 : f32 to vector<32x16xf32>
    %325 = arith.mulf %324, %323 : vector<32x16xf32>
    %cst_177 = arith.constant 1.45315206 : f32
    %326 = vector.broadcast %cst_177 : f32 to vector<32x16xf32>
    %327 = arith.subf %325, %326 : vector<32x16xf32>
    %328 = arith.mulf %327, %323 : vector<32x16xf32>
    %cst_178 = arith.constant 1.42141378 : f32
    %329 = vector.broadcast %cst_178 : f32 to vector<32x16xf32>
    %330 = arith.addf %328, %329 : vector<32x16xf32>
    %331 = arith.mulf %330, %323 : vector<32x16xf32>
    %cst_179 = arith.constant 0.284496725 : f32
    %332 = vector.broadcast %cst_179 : f32 to vector<32x16xf32>
    %333 = arith.subf %331, %332 : vector<32x16xf32>
    %334 = arith.mulf %333, %323 : vector<32x16xf32>
    %cst_180 = arith.constant 0.254829586 : f32
    %335 = vector.broadcast %cst_180 : f32 to vector<32x16xf32>
    %336 = arith.addf %334, %335 : vector<32x16xf32>
    %337 = arith.mulf %336, %323 : vector<32x16xf32>
    %cst_181 = arith.constant 0.000000e+00 : f32
    %338 = vector.broadcast %cst_181 : f32 to vector<32x16xf32>
    %339 = arith.subf %338, %317 : vector<32x16xf32>
    %340 = arith.mulf %339, %317 : vector<32x16xf32>
    %341 = math.exp %340 : vector<32x16xf32>
    %342 = arith.mulf %337, %341 : vector<32x16xf32>
    %cst_182 = arith.constant 1.000000e+00 : f32
    %343 = vector.broadcast %cst_182 : f32 to vector<32x16xf32>
    %344 = arith.subf %343, %342 : vector<32x16xf32>
    %cst_183 = arith.constant 0.000000e+00 : f32
    %345 = vector.broadcast %cst_183 : f32 to vector<32x16xf32>
    %346 = arith.cmpf oge, %316, %345 : vector<32x16xf32>
    %cst_184 = arith.constant 0.000000e+00 : f32
    %347 = vector.broadcast %cst_184 : f32 to vector<32x16xf32>
    %348 = arith.subf %347, %344 : vector<32x16xf32>
    %349 = arith.select %346, %344, %348 : vector<32x16xi1>, vector<32x16xf32>
    %cst_185 = arith.constant 1.000000e+00 : f32
    %350 = vector.broadcast %cst_185 : f32 to vector<32x16xf32>
    %351 = arith.addf %350, %349 : vector<32x16xf32>
    %352 = arith.mulf %314, %351 : vector<32x16xf32>
    %353 = arith.addf %352, %178 : vector<32x16xf32>
    %c0_186 = arith.constant 0 : index
    %c0_187 = arith.constant 0 : index
    %354 = vector.load %arg19[%c0_186, %c0_187] : memref<16x32xf32, #tpu.memory_space<vmem>>, vector<16x32xf32>
    %cst_188 = arith.constant dense<0.000000e+00> : vector<16x16xf32>
    %355 = tpu.matmul %354, %353, %cst_188 {dimension_numbers = #tpu.dot_dimension_numbers<[1], [0], [0], [1], [0, 0, 1, 1], [], []>} : vector<16x32xf32>, vector<32x16xf32>, vector<16x16xf32> -> vector<16x16xf32>
    %c0_189 = arith.constant 0 : index
    %c0_190 = arith.constant 0 : index
    %356 = vector.load %arg20[%c0_189, %c0_190] : memref<32x160xf32, #tpu.memory_space<vmem>>, vector<32x160xf32>
    %c0_191 = arith.constant 0 : index
    %c0_192 = arith.constant 0 : index
    %357 = vector.load %arg21[%c0_191, %c0_192] : memref<32x1xf32, #tpu.memory_space<vmem>>, vector<32x1xf32>
    %c0_193 = arith.constant 0 : index
    %c0_194 = arith.constant 0 : index
    %358 = vector.load %arg22[%c0_193, %c0_194] : memref<32x1xf32, #tpu.memory_space<vmem>>, vector<32x1xf32>
    %c0_195 = arith.constant 0 : index
    %c0_196 = arith.constant 0 : index
    %359 = vector.load %arg23[%c0_195, %c0_196] : memref<32x1xf32, #tpu.memory_space<vmem>>, vector<32x1xf32>
    %c0_197 = arith.constant 0 : index
    %c0_198 = arith.constant 0 : index
    %360 = vector.load %arg24[%c0_197, %c0_198] : memref<16x160xf32, #tpu.memory_space<vmem>>, vector<16x160xf32>
    %c0_199 = arith.constant 0 : index
    %c0_200 = arith.constant 0 : index
    %361 = vector.load %arg25[%c0_199, %c0_200] : memref<16x1xf32, #tpu.memory_space<vmem>>, vector<16x1xf32>
    %c0_201 = arith.constant 0 : index
    %c0_202 = arith.constant 0 : index
    %362 = vector.load %arg26[%c0_201, %c0_202] : memref<16x1xf32, #tpu.memory_space<vmem>>, vector<16x1xf32>
    %c0_203 = arith.constant 0 : index
    %c0_204 = arith.constant 0 : index
    %363 = vector.load %arg27[%c0_203, %c0_204] : memref<16x1xf32, #tpu.memory_space<vmem>>, vector<16x1xf32>
    %cst_205 = arith.constant 0.000000e+00 : f32
    %364 = vector.broadcast %cst_205 : f32 to vector<200x16xf32>
    %c0_206 = arith.constant 0 : index
    %c0_207 = arith.constant 0 : index
    %365 = vector.load %arg29[%c0_206, %c0_207] : memref<200x16xf32, #tpu.memory_space<vmem>>, vector<200x16xf32>
    tpu.vector_store %arg29[%c0_206, %c0_207], %364 {strides = array<i32>} : memref<200x16xf32, #tpu.memory_space<vmem>>, vector<200x16xf32>,
    %366 = vector.extract_strided_slice %353 {offsets = [0, 0], sizes = [32, 14], strides = [1, 1]} : vector<32x16xf32> to vector<32x14xf32>
    %c0_208 = arith.constant 0 : index
    %c2_209 = arith.constant 2 : index
    %367 = vector.load %arg29[%c0_208, %c2_209] : memref<200x16xf32, #tpu.memory_space<vmem>>, vector<32x14xf32>
    tpu.vector_store %arg29[%c0_208, %c2_209], %366 {strides = array<i32>} : memref<200x16xf32, #tpu.memory_space<vmem>>, vector<32x14xf32>,
    %368 = vector.extract_strided_slice %353 {offsets = [0, 0], sizes = [32, 15], strides = [1, 1]} : vector<32x16xf32> to vector<32x15xf32>
    %c32_210 = arith.constant 32 : index
    %c1_211 = arith.constant 1 : index
    %369 = vector.load %arg29[%c32_210, %c1_211] : memref<200x16xf32, #tpu.memory_space<vmem>>, vector<32x15xf32>
    tpu.vector_store %arg29[%c32_210, %c1_211], %368 {strides = array<i32>} : memref<200x16xf32, #tpu.memory_space<vmem>>, vector<32x15xf32>,
    %c64_212 = arith.constant 64 : index
    %c0_213 = arith.constant 0 : index
    %370 = vector.load %arg29[%c64_212, %c0_213] : memref<200x16xf32, #tpu.memory_space<vmem>>, vector<32x16xf32>
    tpu.vector_store %arg29[%c64_212, %c0_213], %353 {strides = array<i32>} : memref<200x16xf32, #tpu.memory_space<vmem>>, vector<32x16xf32>,
    %371 = vector.extract_strided_slice %353 {offsets = [0, 1], sizes = [32, 15], strides = [1, 1]} : vector<32x16xf32> to vector<32x15xf32>
    %c96_214 = arith.constant 96 : index
    %c0_215 = arith.constant 0 : index
    %372 = vector.load %arg29[%c96_214, %c0_215] : memref<200x16xf32, #tpu.memory_space<vmem>>, vector<32x15xf32>
    tpu.vector_store %arg29[%c96_214, %c0_215], %371 {strides = array<i32>} : memref<200x16xf32, #tpu.memory_space<vmem>>, vector<32x15xf32>,
    %373 = vector.extract_strided_slice %353 {offsets = [0, 2], sizes = [32, 14], strides = [1, 1]} : vector<32x16xf32> to vector<32x14xf32>
    %c128_216 = arith.constant 128 : index
    %c0_217 = arith.constant 0 : index
    %374 = vector.load %arg29[%c128_216, %c0_217] : memref<200x16xf32, #tpu.memory_space<vmem>>, vector<32x14xf32>
    tpu.vector_store %arg29[%c128_216, %c0_217], %373 {strides = array<i32>} : memref<200x16xf32, #tpu.memory_space<vmem>>, vector<32x14xf32>,
    %c0_218 = arith.constant 0 : index
    %c0_219 = arith.constant 0 : index
    %375 = vector.load %arg29[%c0_218, %c0_219] : memref<200x16xf32, #tpu.memory_space<vmem>>, vector<160x16xf32>
    %cst_220 = arith.constant dense<0.000000e+00> : vector<32x16xf32>
    %376 = tpu.matmul %356, %375, %cst_220 {dimension_numbers = #tpu.dot_dimension_numbers<[1], [0], [0], [1], [0, 0, 1, 1], [], []>} : vector<32x160xf32>, vector<160x16xf32>, vector<32x16xf32> -> vector<32x16xf32>
    %377 = vector.broadcast %357 : vector<32x1xf32> to vector<32x16xf32>
    %378 = arith.addf %376, %377 : vector<32x16xf32>
    %cst_221 = arith.constant dense<0.000000e+00> : vector<32xf32>
    %379 = vector.multi_reduction <add>, %378, %cst_221 [1] : vector<32x16xf32> to vector<32xf32>
    %380 = vector.shape_cast %379 : vector<32xf32> to vector<32x1xf32>
    %cst_222 = arith.constant 1.600000e+01 : f32
    %381 = vector.broadcast %cst_222 : f32 to vector<32x1xf32>
    %382 = arith.divf %380, %381 : vector<32x1xf32>
    %cst_223 = arith.constant dense<0.000000e+00> : vector<1xf32>
    %383 = vector.multi_reduction <add>, %382, %cst_223 [0] : vector<32x1xf32> to vector<1xf32>
    %384 = vector.shape_cast %383 : vector<1xf32> to vector<1x1xf32>
    %cst_224 = arith.constant 3.200000e+01 : f32
    %385 = vector.broadcast %cst_224 : f32 to vector<1x1xf32>
    %386 = arith.divf %384, %385 : vector<1x1xf32>
    %387 = vector.broadcast %386 : vector<1x1xf32> to vector<32x16xf32>
    %388 = arith.subf %378, %387 : vector<32x16xf32>
    %389 = arith.mulf %388, %388 : vector<32x16xf32>
    %cst_225 = arith.constant dense<0.000000e+00> : vector<32xf32>
    %390 = vector.multi_reduction <add>, %389, %cst_225 [1] : vector<32x16xf32> to vector<32xf32>
    %391 = vector.shape_cast %390 : vector<32xf32> to vector<32x1xf32>
    %cst_226 = arith.constant 1.600000e+01 : f32
    %392 = vector.broadcast %cst_226 : f32 to vector<32x1xf32>
    %393 = arith.divf %391, %392 : vector<32x1xf32>
    %cst_227 = arith.constant dense<0.000000e+00> : vector<1xf32>
    %394 = vector.multi_reduction <add>, %393, %cst_227 [0] : vector<32x1xf32> to vector<1xf32>
    %395 = vector.shape_cast %394 : vector<1xf32> to vector<1x1xf32>
    %cst_228 = arith.constant 3.200000e+01 : f32
    %396 = vector.broadcast %cst_228 : f32 to vector<1x1xf32>
    %397 = arith.divf %395, %396 : vector<1x1xf32>
    %cst_229 = arith.constant 9.99999974E-6 : f32
    %398 = vector.broadcast %cst_229 : f32 to vector<1x1xf32>
    %399 = arith.addf %397, %398 : vector<1x1xf32>
    %400 = math.rsqrt %399 : vector<1x1xf32>
    %401 = vector.broadcast %400 : vector<1x1xf32> to vector<32x16xf32>
    %402 = arith.mulf %388, %401 : vector<32x16xf32>
    %403 = vector.broadcast %358 : vector<32x1xf32> to vector<32x16xf32>
    %404 = arith.mulf %402, %403 : vector<32x16xf32>
    %405 = vector.broadcast %359 : vector<32x1xf32> to vector<32x16xf32>
    %406 = arith.addf %404, %405 : vector<32x16xf32>
    %cst_230 = arith.constant 5.000000e-01 : f32
    %407 = vector.broadcast %cst_230 : f32 to vector<32x16xf32>
    %408 = arith.mulf %407, %406 : vector<32x16xf32>
    %cst_231 = arith.constant 0.707106769 : f32
    %409 = vector.broadcast %cst_231 : f32 to vector<32x16xf32>
    %410 = arith.mulf %406, %409 : vector<32x16xf32>
    %411 = math.absf %410 : vector<32x16xf32>
    %cst_232 = arith.constant 0.327591091 : f32
    %412 = vector.broadcast %cst_232 : f32 to vector<32x16xf32>
    %413 = arith.mulf %412, %411 : vector<32x16xf32>
    %cst_233 = arith.constant 1.000000e+00 : f32
    %414 = vector.broadcast %cst_233 : f32 to vector<32x16xf32>
    %415 = arith.addf %414, %413 : vector<32x16xf32>
    %cst_234 = arith.constant 1.000000e+00 : f32
    %416 = vector.broadcast %cst_234 : f32 to vector<32x16xf32>
    %417 = arith.divf %416, %415 : vector<32x16xf32>
    %cst_235 = arith.constant 1.06140542 : f32
    %418 = vector.broadcast %cst_235 : f32 to vector<32x16xf32>
    %419 = arith.mulf %418, %417 : vector<32x16xf32>
    %cst_236 = arith.constant 1.45315206 : f32
    %420 = vector.broadcast %cst_236 : f32 to vector<32x16xf32>
    %421 = arith.subf %419, %420 : vector<32x16xf32>
    %422 = arith.mulf %421, %417 : vector<32x16xf32>
    %cst_237 = arith.constant 1.42141378 : f32
    %423 = vector.broadcast %cst_237 : f32 to vector<32x16xf32>
    %424 = arith.addf %422, %423 : vector<32x16xf32>
    %425 = arith.mulf %424, %417 : vector<32x16xf32>
    %cst_238 = arith.constant 0.284496725 : f32
    %426 = vector.broadcast %cst_238 : f32 to vector<32x16xf32>
    %427 = arith.subf %425, %426 : vector<32x16xf32>
    %428 = arith.mulf %427, %417 : vector<32x16xf32>
    %cst_239 = arith.constant 0.254829586 : f32
    %429 = vector.broadcast %cst_239 : f32 to vector<32x16xf32>
    %430 = arith.addf %428, %429 : vector<32x16xf32>
    %431 = arith.mulf %430, %417 : vector<32x16xf32>
    %cst_240 = arith.constant 0.000000e+00 : f32
    %432 = vector.broadcast %cst_240 : f32 to vector<32x16xf32>
    %433 = arith.subf %432, %411 : vector<32x16xf32>
    %434 = arith.mulf %433, %411 : vector<32x16xf32>
    %435 = math.exp %434 : vector<32x16xf32>
    %436 = arith.mulf %431, %435 : vector<32x16xf32>
    %cst_241 = arith.constant 1.000000e+00 : f32
    %437 = vector.broadcast %cst_241 : f32 to vector<32x16xf32>
    %438 = arith.subf %437, %436 : vector<32x16xf32>
    %cst_242 = arith.constant 0.000000e+00 : f32
    %439 = vector.broadcast %cst_242 : f32 to vector<32x16xf32>
    %440 = arith.cmpf oge, %410, %439 : vector<32x16xf32>
    %cst_243 = arith.constant 0.000000e+00 : f32
    %441 = vector.broadcast %cst_243 : f32 to vector<32x16xf32>
    %442 = arith.subf %441, %438 : vector<32x16xf32>
    %443 = arith.select %440, %438, %442 : vector<32x16xi1>, vector<32x16xf32>
    %cst_244 = arith.constant 1.000000e+00 : f32
    %444 = vector.broadcast %cst_244 : f32 to vector<32x16xf32>
    %445 = arith.addf %444, %443 : vector<32x16xf32>
    %446 = arith.mulf %408, %445 : vector<32x16xf32>
    %cst_245 = arith.constant 0.000000e+00 : f32
    %447 = vector.broadcast %cst_245 : f32 to vector<200x16xf32>
    %c0_246 = arith.constant 0 : index
    %c0_247 = arith.constant 0 : index
    %448 = vector.load %arg29[%c0_246, %c0_247] : memref<200x16xf32, #tpu.memory_space<vmem>>, vector<200x16xf32>
    tpu.vector_store %arg29[%c0_246, %c0_247], %447 {strides = array<i32>} : memref<200x16xf32, #tpu.memory_space<vmem>>, vector<200x16xf32>,
    %449 = vector.extract_strided_slice %446 {offsets = [0, 0], sizes = [32, 14], strides = [1, 1]} : vector<32x16xf32> to vector<32x14xf32>
    %c0_248 = arith.constant 0 : index
    %c2_249 = arith.constant 2 : index
    %450 = vector.load %arg29[%c0_248, %c2_249] : memref<200x16xf32, #tpu.memory_space<vmem>>, vector<32x14xf32>
    tpu.vector_store %arg29[%c0_248, %c2_249], %449 {strides = array<i32>} : memref<200x16xf32, #tpu.memory_space<vmem>>, vector<32x14xf32>,
    %451 = vector.extract_strided_slice %446 {offsets = [0, 0], sizes = [32, 15], strides = [1, 1]} : vector<32x16xf32> to vector<32x15xf32>
    %c32_250 = arith.constant 32 : index
    %c1_251 = arith.constant 1 : index
    %452 = vector.load %arg29[%c32_250, %c1_251] : memref<200x16xf32, #tpu.memory_space<vmem>>, vector<32x15xf32>
    tpu.vector_store %arg29[%c32_250, %c1_251], %451 {strides = array<i32>} : memref<200x16xf32, #tpu.memory_space<vmem>>, vector<32x15xf32>,
    %c64_252 = arith.constant 64 : index
    %c0_253 = arith.constant 0 : index
    %453 = vector.load %arg29[%c64_252, %c0_253] : memref<200x16xf32, #tpu.memory_space<vmem>>, vector<32x16xf32>
    tpu.vector_store %arg29[%c64_252, %c0_253], %446 {strides = array<i32>} : memref<200x16xf32, #tpu.memory_space<vmem>>, vector<32x16xf32>,
    %454 = vector.extract_strided_slice %446 {offsets = [0, 1], sizes = [32, 15], strides = [1, 1]} : vector<32x16xf32> to vector<32x15xf32>
    %c96_254 = arith.constant 96 : index
    %c0_255 = arith.constant 0 : index
    %455 = vector.load %arg29[%c96_254, %c0_255] : memref<200x16xf32, #tpu.memory_space<vmem>>, vector<32x15xf32>
    tpu.vector_store %arg29[%c96_254, %c0_255], %454 {strides = array<i32>} : memref<200x16xf32, #tpu.memory_space<vmem>>, vector<32x15xf32>,
    %456 = vector.extract_strided_slice %446 {offsets = [0, 2], sizes = [32, 14], strides = [1, 1]} : vector<32x16xf32> to vector<32x14xf32>
    %c128_256 = arith.constant 128 : index
    %c0_257 = arith.constant 0 : index
    %457 = vector.load %arg29[%c128_256, %c0_257] : memref<200x16xf32, #tpu.memory_space<vmem>>, vector<32x14xf32>
    tpu.vector_store %arg29[%c128_256, %c0_257], %456 {strides = array<i32>} : memref<200x16xf32, #tpu.memory_space<vmem>>, vector<32x14xf32>,
    %c0_258 = arith.constant 0 : index
    %c0_259 = arith.constant 0 : index
    %458 = vector.load %arg29[%c0_258, %c0_259] : memref<200x16xf32, #tpu.memory_space<vmem>>, vector<160x16xf32>
    %cst_260 = arith.constant dense<0.000000e+00> : vector<16x16xf32>
    %459 = tpu.matmul %360, %458, %cst_260 {dimension_numbers = #tpu.dot_dimension_numbers<[1], [0], [0], [1], [0, 0, 1, 1], [], []>} : vector<16x160xf32>, vector<160x16xf32>, vector<16x16xf32> -> vector<16x16xf32>
    %460 = vector.broadcast %361 : vector<16x1xf32> to vector<16x16xf32>
    %461 = arith.addf %459, %460 : vector<16x16xf32>
    %cst_261 = arith.constant dense<0.000000e+00> : vector<16xf32>
    %462 = vector.multi_reduction <add>, %461, %cst_261 [1] : vector<16x16xf32> to vector<16xf32>
    %463 = vector.shape_cast %462 : vector<16xf32> to vector<16x1xf32>
    %cst_262 = arith.constant 1.600000e+01 : f32
    %464 = vector.broadcast %cst_262 : f32 to vector<16x1xf32>
    %465 = arith.divf %463, %464 : vector<16x1xf32>
    %cst_263 = arith.constant dense<0.000000e+00> : vector<1xf32>
    %466 = vector.multi_reduction <add>, %465, %cst_263 [0] : vector<16x1xf32> to vector<1xf32>
    %467 = vector.shape_cast %466 : vector<1xf32> to vector<1x1xf32>
    %cst_264 = arith.constant 1.600000e+01 : f32
    %468 = vector.broadcast %cst_264 : f32 to vector<1x1xf32>
    %469 = arith.divf %467, %468 : vector<1x1xf32>
    %470 = vector.broadcast %469 : vector<1x1xf32> to vector<16x16xf32>
    %471 = arith.subf %461, %470 : vector<16x16xf32>
    %472 = arith.mulf %471, %471 : vector<16x16xf32>
    %cst_265 = arith.constant dense<0.000000e+00> : vector<16xf32>
    %473 = vector.multi_reduction <add>, %472, %cst_265 [1] : vector<16x16xf32> to vector<16xf32>
    %474 = vector.shape_cast %473 : vector<16xf32> to vector<16x1xf32>
    %cst_266 = arith.constant 1.600000e+01 : f32
    %475 = vector.broadcast %cst_266 : f32 to vector<16x1xf32>
    %476 = arith.divf %474, %475 : vector<16x1xf32>
    %cst_267 = arith.constant dense<0.000000e+00> : vector<1xf32>
    %477 = vector.multi_reduction <add>, %476, %cst_267 [0] : vector<16x1xf32> to vector<1xf32>
    %478 = vector.shape_cast %477 : vector<1xf32> to vector<1x1xf32>
    %cst_268 = arith.constant 1.600000e+01 : f32
    %479 = vector.broadcast %cst_268 : f32 to vector<1x1xf32>
    %480 = arith.divf %478, %479 : vector<1x1xf32>
    %cst_269 = arith.constant 9.99999974E-6 : f32
    %481 = vector.broadcast %cst_269 : f32 to vector<1x1xf32>
    %482 = arith.addf %480, %481 : vector<1x1xf32>
    %483 = math.rsqrt %482 : vector<1x1xf32>
    %484 = vector.broadcast %483 : vector<1x1xf32> to vector<16x16xf32>
    %485 = arith.mulf %471, %484 : vector<16x16xf32>
    %486 = vector.broadcast %362 : vector<16x1xf32> to vector<16x16xf32>
    %487 = arith.mulf %485, %486 : vector<16x16xf32>
    %488 = vector.broadcast %363 : vector<16x1xf32> to vector<16x16xf32>
    %489 = arith.addf %487, %488 : vector<16x16xf32>
    %cst_270 = arith.constant 5.000000e-01 : f32
    %490 = vector.broadcast %cst_270 : f32 to vector<16x16xf32>
    %491 = arith.mulf %490, %489 : vector<16x16xf32>
    %cst_271 = arith.constant 0.707106769 : f32
    %492 = vector.broadcast %cst_271 : f32 to vector<16x16xf32>
    %493 = arith.mulf %489, %492 : vector<16x16xf32>
    %494 = math.absf %493 : vector<16x16xf32>
    %cst_272 = arith.constant 0.327591091 : f32
    %495 = vector.broadcast %cst_272 : f32 to vector<16x16xf32>
    %496 = arith.mulf %495, %494 : vector<16x16xf32>
    %cst_273 = arith.constant 1.000000e+00 : f32
    %497 = vector.broadcast %cst_273 : f32 to vector<16x16xf32>
    %498 = arith.addf %497, %496 : vector<16x16xf32>
    %cst_274 = arith.constant 1.000000e+00 : f32
    %499 = vector.broadcast %cst_274 : f32 to vector<16x16xf32>
    %500 = arith.divf %499, %498 : vector<16x16xf32>
    %cst_275 = arith.constant 1.06140542 : f32
    %501 = vector.broadcast %cst_275 : f32 to vector<16x16xf32>
    %502 = arith.mulf %501, %500 : vector<16x16xf32>
    %cst_276 = arith.constant 1.45315206 : f32
    %503 = vector.broadcast %cst_276 : f32 to vector<16x16xf32>
    %504 = arith.subf %502, %503 : vector<16x16xf32>
    %505 = arith.mulf %504, %500 : vector<16x16xf32>
    %cst_277 = arith.constant 1.42141378 : f32
    %506 = vector.broadcast %cst_277 : f32 to vector<16x16xf32>
    %507 = arith.addf %505, %506 : vector<16x16xf32>
    %508 = arith.mulf %507, %500 : vector<16x16xf32>
    %cst_278 = arith.constant 0.284496725 : f32
    %509 = vector.broadcast %cst_278 : f32 to vector<16x16xf32>
    %510 = arith.subf %508, %509 : vector<16x16xf32>
    %511 = arith.mulf %510, %500 : vector<16x16xf32>
    %cst_279 = arith.constant 0.254829586 : f32
    %512 = vector.broadcast %cst_279 : f32 to vector<16x16xf32>
    %513 = arith.addf %511, %512 : vector<16x16xf32>
    %514 = arith.mulf %513, %500 : vector<16x16xf32>
    %cst_280 = arith.constant 0.000000e+00 : f32
    %515 = vector.broadcast %cst_280 : f32 to vector<16x16xf32>
    %516 = arith.subf %515, %494 : vector<16x16xf32>
    %517 = arith.mulf %516, %494 : vector<16x16xf32>
    %518 = math.exp %517 : vector<16x16xf32>
    %519 = arith.mulf %514, %518 : vector<16x16xf32>
    %cst_281 = arith.constant 1.000000e+00 : f32
    %520 = vector.broadcast %cst_281 : f32 to vector<16x16xf32>
    %521 = arith.subf %520, %519 : vector<16x16xf32>
    %cst_282 = arith.constant 0.000000e+00 : f32
    %522 = vector.broadcast %cst_282 : f32 to vector<16x16xf32>
    %523 = arith.cmpf oge, %493, %522 : vector<16x16xf32>
    %cst_283 = arith.constant 0.000000e+00 : f32
    %524 = vector.broadcast %cst_283 : f32 to vector<16x16xf32>
    %525 = arith.subf %524, %521 : vector<16x16xf32>
    %526 = arith.select %523, %521, %525 : vector<16x16xi1>, vector<16x16xf32>
    %cst_284 = arith.constant 1.000000e+00 : f32
    %527 = vector.broadcast %cst_284 : f32 to vector<16x16xf32>
    %528 = arith.addf %527, %526 : vector<16x16xf32>
    %529 = arith.mulf %491, %528 : vector<16x16xf32>
    %530 = arith.addf %529, %355 : vector<16x16xf32>
    %c0_285 = arith.constant 0 : index
    %c0_286 = arith.constant 0 : index
    %c0_287 = arith.constant 0 : index
    %531 = vector.load %arg28[%c0_285, %c0_286, %c0_287] : memref<1x16x16xf32, #tpu.memory_space<vmem>>, vector<1x16x16xf32>
    %532 = vector.shape_cast %531 : vector<1x16x16xf32> to vector<16x16xf32>
    %533 = vector.shape_cast %530 : vector<16x16xf32> to vector<1x16x16xf32>
    tpu.vector_store %arg28[%c0_285, %c0_286, %c0_287], %533 {strides = array<i32>} : memref<1x16x16xf32, #tpu.memory_space<vmem>>, vector<1x16x16xf32>,
    return
  }
  func.func @transform_0(%arg0: i32) -> (i32, i32, i32) {
    %c0_i32 = arith.constant 0 : i32
    %c0_i32_0 = arith.constant 0 : i32
    %c0_i32_1 = arith.constant 0 : i32
    return %arg0, %c0_i32, %c0_i32_0 : i32, i32, i32
  }
  func.func @transform_1(%arg0: i32) -> (i32, i32) {
    %c0_i32 = arith.constant 0 : i32
    %c0_i32_0 = arith.constant 0 : i32
    %c0_i32_1 = arith.constant 0 : i32
    return %c0_i32, %c0_i32_0 : i32, i32
  }
  func.func @transform_2(%arg0: i32) -> (i32, i32) {
    %c0_i32 = arith.constant 0 : i32
    %c0_i32_0 = arith.constant 0 : i32
    %c0_i32_1 = arith.constant 0 : i32
    return %c0_i32, %c0_i32_0 : i32, i32
  }
  func.func @transform_3(%arg0: i32) -> (i32, i32) {
    %c0_i32 = arith.constant 0 : i32
    %c0_i32_0 = arith.constant 0 : i32
    %c0_i32_1 = arith.constant 0 : i32
    return %c0_i32, %c0_i32_0 : i32, i32
  }
  func.func @transform_4(%arg0: i32) -> (i32, i32) {
    %c0_i32 = arith.constant 0 : i32
    %c0_i32_0 = arith.constant 0 : i32
    %c0_i32_1 = arith.constant 0 : i32
    return %c0_i32, %c0_i32_0 : i32, i32
  }
  func.func @transform_5(%arg0: i32) -> (i32, i32) {
    %c0_i32 = arith.constant 0 : i32
    %c0_i32_0 = arith.constant 0 : i32
    %c0_i32_1 = arith.constant 0 : i32
    return %c0_i32, %c0_i32_0 : i32, i32
  }
  func.func @transform_6(%arg0: i32) -> (i32, i32) {
    %c0_i32 = arith.constant 0 : i32
    %c0_i32_0 = arith.constant 0 : i32
    %c0_i32_1 = arith.constant 0 : i32
    return %c0_i32, %c0_i32_0 : i32, i32
  }
  func.func @transform_7(%arg0: i32) -> (i32, i32) {
    %c0_i32 = arith.constant 0 : i32
    %c0_i32_0 = arith.constant 0 : i32
    %c0_i32_1 = arith.constant 0 : i32
    return %c0_i32, %c0_i32_0 : i32, i32
  }
  func.func @transform_8(%arg0: i32) -> (i32, i32) {
    %c0_i32 = arith.constant 0 : i32
    %c0_i32_0 = arith.constant 0 : i32
    %c0_i32_1 = arith.constant 0 : i32
    return %c0_i32, %c0_i32_0 : i32, i32
  }
  func.func @transform_9(%arg0: i32) -> (i32, i32) {
    %c0_i32 = arith.constant 0 : i32
    %c0_i32_0 = arith.constant 0 : i32
    %c0_i32_1 = arith.constant 0 : i32
    return %c0_i32, %c0_i32_0 : i32, i32
  }
  func.func @transform_10(%arg0: i32) -> (i32, i32) {
    %c0_i32 = arith.constant 0 : i32
    %c0_i32_0 = arith.constant 0 : i32
    %c0_i32_1 = arith.constant 0 : i32
    return %c0_i32, %c0_i32_0 : i32, i32
  }
  func.func @transform_11(%arg0: i32) -> (i32, i32) {
    %c0_i32 = arith.constant 0 : i32
    %c0_i32_0 = arith.constant 0 : i32
    %c0_i32_1 = arith.constant 0 : i32
    return %c0_i32, %c0_i32_0 : i32, i32
  }
  func.func @transform_12(%arg0: i32) -> (i32, i32) {
    %c0_i32 = arith.constant 0 : i32
    %c0_i32_0 = arith.constant 0 : i32
    %c0_i32_1 = arith.constant 0 : i32
    return %c0_i32, %c0_i32_0 : i32, i32
  }
  func.func @transform_13(%arg0: i32) -> (i32, i32) {
    %c0_i32 = arith.constant 0 : i32
    %c0_i32_0 = arith.constant 0 : i32
    %c0_i32_1 = arith.constant 0 : i32
    return %c0_i32, %c0_i32_0 : i32, i32
  }
  func.func @transform_14(%arg0: i32) -> (i32, i32) {
    %c0_i32 = arith.constant 0 : i32
    %c0_i32_0 = arith.constant 0 : i32
    %c0_i32_1 = arith.constant 0 : i32
    return %c0_i32, %c0_i32_0 : i32, i32
  }
  func.func @transform_15(%arg0: i32) -> (i32, i32) {
    %c0_i32 = arith.constant 0 : i32
    %c0_i32_0 = arith.constant 0 : i32
    %c0_i32_1 = arith.constant 0 : i32
    return %c0_i32, %c0_i32_0 : i32, i32
  }
  func.func @transform_16(%arg0: i32) -> (i32, i32) {
    %c0_i32 = arith.constant 0 : i32
    %c0_i32_0 = arith.constant 0 : i32
    %c0_i32_1 = arith.constant 0 : i32
    return %c0_i32, %c0_i32_0 : i32, i32
  }
  func.func @transform_17(%arg0: i32) -> (i32, i32) {
    %c0_i32 = arith.constant 0 : i32
    %c0_i32_0 = arith.constant 0 : i32
    %c0_i32_1 = arith.constant 0 : i32
    return %c0_i32, %c0_i32_0 : i32, i32
  }
  func.func @transform_18(%arg0: i32) -> (i32, i32) {
    %c0_i32 = arith.constant 0 : i32
    %c0_i32_0 = arith.constant 0 : i32
    %c0_i32_1 = arith.constant 0 : i32
    return %c0_i32, %c0_i32_0 : i32, i32
  }
  func.func @transform_19(%arg0: i32) -> (i32, i32) {
    %c0_i32 = arith.constant 0 : i32
    %c0_i32_0 = arith.constant 0 : i32
    %c0_i32_1 = arith.constant 0 : i32
    return %c0_i32, %c0_i32_0 : i32, i32
  }
  func.func @transform_20(%arg0: i32) -> (i32, i32) {
    %c0_i32 = arith.constant 0 : i32
    %c0_i32_0 = arith.constant 0 : i32
    %c0_i32_1 = arith.constant 0 : i32
    return %c0_i32, %c0_i32_0 : i32, i32
  }
  func.func @transform_21(%arg0: i32) -> (i32, i32) {
    %c0_i32 = arith.constant 0 : i32
    %c0_i32_0 = arith.constant 0 : i32
    %c0_i32_1 = arith.constant 0 : i32
    return %c0_i32, %c0_i32_0 : i32, i32
  }
  func.func @transform_22(%arg0: i32) -> (i32, i32) {
    %c0_i32 = arith.constant 0 : i32
    %c0_i32_0 = arith.constant 0 : i32
    %c0_i32_1 = arith.constant 0 : i32
    return %c0_i32, %c0_i32_0 : i32, i32
  }
  func.func @transform_23(%arg0: i32) -> (i32, i32) {
    %c0_i32 = arith.constant 0 : i32
    %c0_i32_0 = arith.constant 0 : i32
    %c0_i32_1 = arith.constant 0 : i32
    return %c0_i32, %c0_i32_0 : i32, i32
  }
  func.func @transform_24(%arg0: i32) -> (i32, i32) {
    %c0_i32 = arith.constant 0 : i32
    %c0_i32_0 = arith.constant 0 : i32
    %c0_i32_1 = arith.constant 0 : i32
    return %c0_i32, %c0_i32_0 : i32, i32
  }
  func.func @transform_25(%arg0: i32) -> (i32, i32) {
    %c0_i32 = arith.constant 0 : i32
    %c0_i32_0 = arith.constant 0 : i32
    %c0_i32_1 = arith.constant 0 : i32
    return %c0_i32, %c0_i32_0 : i32, i32
  }
  func.func @transform_26(%arg0: i32) -> (i32, i32) {
    %c0_i32 = arith.constant 0 : i32
    %c0_i32_0 = arith.constant 0 : i32
    %c0_i32_1 = arith.constant 0 : i32
    return %c0_i32, %c0_i32_0 : i32, i32
  }
  func.func @transform_27(%arg0: i32) -> (i32, i32, i32) {
    %c0_i32 = arith.constant 0 : i32
    %c0_i32_0 = arith.constant 0 : i32
    %c0_i32_1 = arith.constant 0 : i32
    return %arg0, %c0_i32, %c0_i32_0 : i32, i32, i32
  }
}

</mosaic_0001>

<bundles_post_ra>
// kernel: _lambda_.1
= control target key start
LH: loop header
LB: loop body
LE: loop exit
PB: predicated region body
PF: predicated region fallthrough
CT: control target
= control target key end

     0   :  { %s7491_s0 = inlined_call_operand.vmem [shape: f32[2,40,16], index: 0, kind: input, shape index: {}]   ;;  %s7492_s1 = inlined_call_operand.hbm [shape: f32[32,40], index: 1, kind: input, shape index: {}]   ;;  %s7493_s2 = inlined_call_operand.hbm [shape: f32[32,200], index: 2, kind: input, shape index: {}]   ;;  %s7494_s3 = inlined_call_operand.hbm [shape: f32[32,1], index: 3, kind: input, shape index: {}]   ;;  %s7495_s4 = inlined_call_operand.hbm [shape: f32[32,1], index: 4, kind: input, shape index: {}]   ;;  %s7496_s5 = inlined_call_operand.hbm [shape: f32[32,1], index: 5, kind: input, shape index: {}]   ;;  %s7497_s6 = inlined_call_operand.hbm [shape: f32[32,160], index: 6, kind: input, shape index: {}]   ;;  %s7498_s7 = inlined_call_operand.hbm [shape: f32[32,1], index: 7, kind: input, shape index: {}]   ;;  %s7499_s8 = inlined_call_operand.hbm [shape: f32[32,1], index: 8, kind: input, shape index: {}]   ;;  %s7500_s9 = inlined_call_operand.hbm [shape: f32[32,1], index: 9, kind: input, shape index: {}]   ;;  %s7501_s10 = inlined_call_operand.vmem [shape: f32[32,160], index: 10, kind: input, shape index: {}]   ;;  %s7502_s11 = inlined_call_operand.hbm [shape: f32[32,1], index: 11, kind: input, shape index: {}]   ;;  %s7503_s12 = inlined_call_operand.hbm [shape: f32[32,1], index: 12, kind: input, shape index: {}]   ;;  %s7504_s13 = inlined_call_operand.hbm [shape: f32[32,1], index: 13, kind: input, shape index: {}]   ;;  %s7505_s14 = inlined_call_operand.vmem [shape: f32[32,160], index: 14, kind: input, shape index: {}]   ;;  %s7506_s15 = inlined_call_operand.hbm [shape: f32[32,1], index: 15, kind: input, shape index: {}]   ;;  %s7507_s16 = inlined_call_operand.hbm [shape: f32[32,1], index: 16, kind: input, shape index: {}]   ;;  %s7508_s17 = inlined_call_operand.hbm [shape: f32[32,1], index: 17, kind: input, shape index: {}]   ;;  %s7509_s18 = inlined_call_operand.hbm [shape: f32[16,32], index: 18, kind: input, shape index: {}]   ;;  %s7510_s19 = inlined_call_operand.vmem [shape: f32[32,160], index: 19, kind: input, shape index: {}]   ;;  %s7511_s20 = inlined_call_operand.hbm [shape: f32[32,1], index: 20, kind: input, shape index: {}]   ;;  %s7512_s21 = inlined_call_operand.hbm [shape: f32[32,1], index: 21, kind: input, shape index: {}]   ;;  %s7513_s22 = inlined_call_operand.hbm [shape: f32[32,1], index: 22, kind: input, shape index: {}]   ;;  %s7514_s23 = inlined_call_operand.vmem [shape: f32[16,160], index: 23, kind: input, shape index: {}]   ;;  %s7515_s24 = inlined_call_operand.hbm [shape: f32[16,1], index: 24, kind: input, shape index: {}]   ;;  %s7516_s25 = inlined_call_operand.hbm [shape: f32[16,1], index: 25, kind: input, shape index: {}]   ;;  %s7517_s26 = inlined_call_operand.hbm [shape: f32[16,1], index: 26, kind: input, shape index: {}]   ;;  %s7518_s27 = inlined_call_operand.hbm [shape: f32[2,16,16], index: 27, kind: output, shape index: {}]  }
   0x1   :  { %7536 = sst [smem:[#allocation61_spill]] %s7491_s0 }
   0x2   :  { %7537 = sst [smem:[#allocation62_spill]] %s7492_s1 }
   0x3   :  { %7538 = sst [smem:[#allocation63_spill]] %s7493_s2 }
   0x4   :  { %7539 = sst [smem:[#allocation64_spill]] %s7494_s3 }
   0x5   :  { %7540 = sst [smem:[#allocation65_spill]] %s7495_s4 }
   0x6   :  { %7541 = sst [smem:[#allocation66_spill]] %s7496_s5 }
   0x7   :  { %7542 = sst [smem:[#allocation67_spill]] %s7497_s6 }
   0x8   :  { %7543 = sst [smem:[#allocation68_spill]] %s7498_s7 }
   0x9   :  { %7544 = sst [smem:[#allocation69_spill]] %s7499_s8 }
   0xa   :  { %7545 = sst [smem:[#allocation70_spill]] %s7500_s9 }
   0xb   :  { %7546 = sst [smem:[#allocation71_spill]] %s7501_s10 }
   0xc   :  { %7547 = sst [smem:[#allocation72_spill]] %s7502_s11 }
   0xd   :  { %7548 = sst [smem:[#allocation73_spill]] %s7505_s14 }
   0xe   :  { %7549 = sst [smem:[#allocation74_spill]] %s7510_s19 }
   0xf   :  { %7550 = sst [smem:[#allocation75_spill]] %s7514_s23 }
  0x10   :  { %7551 = sst [smem:[#allocation76_spill]] %s7517_s26 }
  0x11   :  { %7552 = sst [smem:[#allocation77_spill]] %s7518_s27 }
  0x12   :  { %32 = vsyncpa [#allocation4], 0 }
  0x13   :  { %33 = vsyncpa [#allocation7], 0 }
  0x14   :  { %34 = vsyncpa [#allocation10], 0 }
  0x15   :  { %35 = vsyncpa [#allocation13], 0 }
  0x16   :  { %36 = vsyncpa [#allocation16], 0 }
  0x17   :  { %37 = vsyncpa [#allocation19], 0 }
  0x18   :  { %38 = vsyncpa [#allocation22], 0 }
  0x19   :  { %39 = vsyncpa [#allocation25], 0 }
  0x1a   :  { %40 = vsyncpa [#allocation28], 0 }
  0x1b   :  { %41 = vsyncpa [#allocation31], 0 }
  0x1c   :  { %42 = vsyncpa [#allocation34], 0 }
  0x1d   :  { %43 = vsyncpa [#allocation37], 0 }
  0x1e   :  { %44 = vsyncpa [#allocation5], 0 }
  0x1f   :  { %46 = vsyncpa [#allocation5 + $0x1], 0  ;;  %s5848_s7 = smov 0   ;;  %s5850_s4 = smov 0  }
  0x20   :  { %s5852_s8 = smov 0   ;;  %s5854_s30 = smov 0  }
  0x21 LB: > { %7553 = sst [smem:[#allocation52_spill]] %s5658_s7  ;;  %s5869_s9 = sadd.s32 4294967295, %s5670_s30   ;;  %s5670_s30 = sphi %s5854_s30, %s7609_s30   ;;  %s5666_s8 = sphi %s5852_s8, %s7612_s8   ;;  %s5662_s4 = sphi %s5850_s4, %s7611_s4   ;;  %s5658_s7 = sphi %s5848_s7, %s7610_s7  }
  0x22   : > { %7554 = sst [smem:[#allocation53_spill]] %s5662_s4  ;;  %s4501_s5 = sadd.s32 4294967294, %s5670_s30  }
  0x23   : > { %7555 = sst [smem:[#allocation54_spill]] %s5666_s8  ;;  %s5873_s28 = sadd.s32 1, %s5670_s30  }
  0x24   : > { %7556 = sst [smem:[#allocation55_spill]] %s5670_s30  ;;  %s631_s0 = sadd.s32 1, %s5666_s8 }
  0x25   : > { %7557 = sst [smem:[#allocation56_spill]] %s5873_s28  ;;  %s628_s10 = ssub.s32 %s5670_s30, %s5873_s28 }
  0x26   : > { %p641_p0 = scmp.ne.s32.totalorder %s5666_s8, %s5662_s4  ;;  %p629_p1 = scmp.eq.s32.totalorder %s628_s10, 0 }
  0x27   : > { %p642_p2 = scmp.eq.s32.totalorder %s5869_s9, 1  ;;  %p647_p3 = scmp.ne.s32.totalorder %s5662_s4, %s5658_s7 }
  0x28   : > { %p648_p4 = scmp.eq.s32.totalorder %s4501_s5, 1  ;;  %p4502_p7 = scmp.ge.s32.totalorder %s5670_s30, 1 }
  0x29   : > { %s5884_s29 = scalar_select %p629_p1, %s5666_s8, %s631_s0  }
  0x2a   : > { %p5886_p5 = por %p642_p2, %p641_p0  ;;  %p5890_p6 = por %p648_p4, %p647_p3 }
  0x2b   : > { %7558 = sst [smem:[#allocation57_spill]] %s5884_s29  ;;  %p655_p8 = scmp.lt.s32.totalorder %s5670_s30, 3 }
  0x2c   : > { %s7559_s1 = scalar_select %p5886_p5, 1, 0 }
  0x2d   : > { %s7561_s6 = scalar_select %p5890_p6, 1, 0 }
  0x2e   : > { %7560 = sst [smem:[#allocation58_spill]] %s7559_s1  ;;  %p5896_p9 = pnand %p4502_p7, %p655_p8 }
  0x2f   : > { %7562 = sst [smem:[#allocation59_spill]] %s7561_s6  ;;  %p4724_p10 = scmp.eq.s32.totalorder (!%p5896_p9), %s5869_s9, 0 }
  0x30   : > { %s7563_s11 = scalar_select %p5896_p9, 1, 0 }
  0x31   : > { %659 = sbr.rel (%p5896_p9) target bundleno = 114 (0x72), region = 12  ;;  %s7565_s5 = sld [smem:[#allocation63_spill]] (!%p5896_p9) }
  0x32   : > { %7564 = sst [smem:[#allocation60_spill]] %s7563_s11  ;;  %s5672_s10 = smov (!%p5896_p9), [#allocation6]  }
  0x33   : > { %s682_s29 = sshll.u32 (!%p5896_p9), %s5672_s10, 4  ;;  %s5673_s8 = smov (!%p5896_p9), 256   ;;  %s683_s29 = int_to_ptr.vmem [resolvable:$true] %s682_s29 }
  0x34   : > { %s5674_s28 = smov (!%p5896_p9), 16   ;;  %s7566_s30 = sld [smem:[#allocation65_spill]] (!%p5896_p9) }
  0x35   : > { %s5675_s27 = smov (!%p5896_p9), [#allocation9]   ;;  %s5676_s10 = smov (!%p5896_p9), 128  }
  0x36   : > { %s710_s4 = sshll.u32 %s5675_s27, 4  ;;  %s5677_s19 = smov 8   ;;  %s711_s4 = int_to_ptr.vmem [resolvable:$true] %s710_s4 }
  0x37   : > { %s680_s0 = sshll.u32 %s7565_s5, 4  ;;  %s7567_s5 = sld [smem:[#allocation67_spill]]  ;;  %s681_s0 = int_to_ptr.hbm [resolvable:$true] %s680_s0 }
  0x38   : > { %4633 = dma.hbm_to_vmem [thread:$0]  (%p4724_p10), %s681_s0, 1024, %s683_s29, [#allocation7], %s5673_s8, %s5673_s8, %s5674_s28  }
  0x39   : > { %s5678_s7 = smov [#allocation12]   ;;  %s7568_s0 = sld [smem:[#allocation69_spill]] }
  0x3a   : > { %s708_s1 = sshll.u32 %s7566_s30, 4  ;;  %s738_s29 = sshll.u32 %s5678_s7, 4  ;;  %s709_s1 = int_to_ptr.hbm [resolvable:$true] %s708_s1  ;;  %s739_s29 = int_to_ptr.vmem [resolvable:$true] %s738_s29 }
  0x3b   : > { %4637 = dma.hbm_to_vmem [thread:$0]  (%p4724_p10), %s709_s1, 512, %s711_s4, [#allocation10], %s5676_s10, %s5676_s10, %s5677_s19  }
  0x3c   : > { %s5679_s11 = smov [#allocation15]   ;;  %s5680_s4 = smov [#allocation18]  }
  0x3d   : > { %s736_s23 = sshll.u32 %s7567_s5, 4  ;;  %s7569_s5 = sld [smem:[#allocation72_spill]]  ;;  %s737_s23 = int_to_ptr.hbm [resolvable:$true] %s736_s23 }
  0x3e   : > { %4641 = dma.hbm_to_vmem [thread:$0]  (%p4724_p10), %s737_s23, 1024, %s739_s29, [#allocation13], %s5673_s8, %s5673_s8, %s5674_s28  }
  0x3f   : > { %s764_s27 = sshll.u32 %s7568_s0, 4  ;;  %s766_s26 = sshll.u32 %s5679_s11, 4  ;;  %s765_s27 = int_to_ptr.hbm [resolvable:$true] %s764_s27  ;;  %s767_s26 = int_to_ptr.vmem [resolvable:$true] %s766_s26 }
  0x40   : > { %4645 = dma.hbm_to_vmem [thread:$0]  (%p4724_p10), %s765_s27, 512, %s767_s26, [#allocation16], %s5676_s10, %s5676_s10, %s5677_s19  }
  0x41   : > { %s797_s1 = sshll.u32 %s5680_s4, 4  ;;  %s823_s23 = sshll.u32 %s7504_s13, 4  ;;  %s798_s1 = int_to_ptr.vmem [resolvable:$true] %s797_s1  ;;  %s824_s23 = int_to_ptr.hbm [resolvable:$true] %s823_s23 }
  0x42   : > { %s854_s11 = sshll.u32 %s7507_s16, 4  ;;  %s5681_s29 = smov [#allocation21]   ;;  %s855_s11 = int_to_ptr.hbm [resolvable:$true] %s854_s11 }
  0x43   : > { %s795_s14 = sshll.u32 %s7569_s5, 4  ;;  %s825_s26 = sshll.u32 %s5681_s29, 4  ;;  %s796_s14 = int_to_ptr.hbm [resolvable:$true] %s795_s14  ;;  %s826_s26 = int_to_ptr.vmem [resolvable:$true] %s825_s26 }
  0x44   : > { %4649 = dma.hbm_to_vmem [thread:$0]  (%p4724_p10), %s796_s14, 512, %s798_s1, [#allocation19], %s5676_s10, %s5676_s10, %s5677_s19  }
  0x45   : > { %4653 = dma.hbm_to_vmem [thread:$0]  (%p4724_p10), %s824_s23, 512, %s826_s26, [#allocation22], %s5676_s10, %s5676_s10, %s5677_s19  }
  0x46   : > { %s5682_s6 = smov [#allocation24]   ;;  %s882_s14 = sshll.u32 %s7509_s18, 4  ;;  %s883_s14 = int_to_ptr.hbm [resolvable:$true] %s882_s14 }
  0x47   : > { %s856_s0 = sshll.u32 %s5682_s6, 4  ;;  %s913_s4 = sshll.u32 %s7512_s21, 4  ;;  %s857_s0 = int_to_ptr.vmem [resolvable:$true] %s856_s0  ;;  %s914_s4 = int_to_ptr.hbm [resolvable:$true] %s913_s4 }
  0x48   : > { %4657 = dma.hbm_to_vmem [thread:$0]  (%p4724_p10), %s855_s11, 512, %s857_s0, [#allocation25], %s5676_s10, %s5676_s10, %s5677_s19  }
  0x49   : > { %s5683_s1 = smov [#allocation27]   ;;  %s5684_s30 = smov [#allocation30]  }
  0x4a   : > { %s884_s7 = sshll.u32 %s5683_s1, 4  ;;  %s915_s23 = sshll.u32 %s5684_s30, 4  ;;  %s885_s7 = int_to_ptr.vmem [resolvable:$true] %s884_s7  ;;  %s916_s23 = int_to_ptr.vmem [resolvable:$true] %s915_s23 }
  0x4b   : > { %4661 = dma.hbm_to_vmem [thread:$0]  (%p4724_p10), %s883_s14, 256, %s885_s7, [#allocation28], %s5676_s10, %s5676_s10, %s5677_s19  }
  0x4c   : > { %s944_s11 = sshll.u32 %s7515_s24, 4  ;;  %s5685_s29 = smov [#allocation33]   ;;  %s945_s11 = int_to_ptr.hbm [resolvable:$true] %s944_s11 }
  0x4d   : > { %4665 = dma.hbm_to_vmem [thread:$0]  (%p4724_p10), %s914_s4, 512, %s916_s23, [#allocation31], %s5676_s10, %s5676_s10, %s5677_s19  }
  0x4e   : > { %s946_s26 = sshll.u32 %s5685_s29, 4  ;;  %s7570_s27 = sld [smem:[#allocation62_spill]]  ;;  %s947_s26 = int_to_ptr.vmem [resolvable:$true] %s946_s26 }
  0x4f   : > { %4669 = dma.hbm_to_vmem [thread:$0]  (%p4724_p10), %s945_s11, 256, %s947_s26, [#allocation34], %s5676_s10, %s5676_s10, %s5677_s19  }
  0x50   : > { %s7571_s5 = sld [smem:[#allocation64_spill]]  ;;  %s5686_s7 = smov [#allocation3]  }
  0x51   : > { %s668_s4 = sshll.u32 %s5686_s7, 4  ;;  %s5687_s30 = smov [#allocation8]   ;;  %s669_s4 = int_to_ptr.vmem [resolvable:$true] %s668_s4 }
  0x52   : > { %s696_s23 = sshll.u32 %s5687_s30, 4  ;;  %s7572_s29 = sld [smem:[#allocation66_spill]]  ;;  %s697_s23 = int_to_ptr.vmem [resolvable:$true] %s696_s23 }
  0x53   : > { %s7573_s0 = sld [smem:[#allocation68_spill]]  ;;  %s5688_s14 = smov [#allocation11]  }
  0x54   : > { %s666_s2 = sshll.u32 %s7570_s27, 4  ;;  %s5689_s3 = smov [#allocation14]   ;;  %s667_s2 = int_to_ptr.hbm [resolvable:$true] %s666_s2 }
  0x55   : > { %4631 = dma.hbm_to_vmem [thread:$0]  (%p4724_p10), %s667_s2, 512, %s669_s4, [#allocation4], %s5676_s10, %s5676_s10, %s5677_s19  }
  0x56   : > { %s694_s1 = sshll.u32 %s7571_s5, 4  ;;  %s724_s2 = sshll.u32 %s5688_s14, 4  ;;  %s695_s1 = int_to_ptr.hbm [resolvable:$true] %s694_s1  ;;  %s725_s2 = int_to_ptr.vmem [resolvable:$true] %s724_s2 }
  0x57   : > { %4635 = dma.hbm_to_vmem [thread:$0]  (%p4724_p10), %s695_s1, 512, %s697_s23, [#allocation7], %s5676_s10, %s5676_s10, %s5677_s19  }
  0x58   : > { %s722_s11 = sshll.u32 %s7572_s29, 4  ;;  %s752_s5 = sshll.u32 %s5689_s3, 4  ;;  %s723_s11 = int_to_ptr.hbm [resolvable:$true] %s722_s11  ;;  %s753_s5 = int_to_ptr.vmem [resolvable:$true] %s752_s5 }
  0x59   : > { %s750_s27 = sshll.u32 %s7573_s0, 4  ;;  %s7574_s30 = sld [smem:[#allocation70_spill]]  ;;  %s751_s27 = int_to_ptr.hbm [resolvable:$true] %s750_s27 }
  0x5a   : > { %4639 = dma.hbm_to_vmem [thread:$0]  (%p4724_p10), %s723_s11, 512, %s725_s2, [#allocation10], %s5676_s10, %s5676_s10, %s5677_s19  }
  0x5b   : > { %4643 = dma.hbm_to_vmem [thread:$0]  (%p4724_p10), %s751_s27, 512, %s753_s5, [#allocation13], %s5676_s10, %s5676_s10, %s5677_s19  }
  0x5c   : > { %s809_s28 = sshll.u32 %s7503_s12, 4  ;;  %s5690_s29 = smov [#allocation17]   ;;  %s810_s28 = int_to_ptr.hbm [resolvable:$true] %s809_s28 }
  0x5d   : > { %s780_s11 = sshll.u32 %s5690_s29, 4  ;;  %s5691_s26 = smov [#allocation20]   ;;  %s781_s11 = int_to_ptr.vmem [resolvable:$true] %s780_s11 }
  0x5e   : > { %s811_s6 = sshll.u32 %s5691_s26, 4  ;;  %s840_s27 = sshll.u32 %s7506_s15, 4  ;;  %s812_s6 = int_to_ptr.vmem [resolvable:$true] %s811_s6  ;;  %s841_s27 = int_to_ptr.hbm [resolvable:$true] %s840_s27 }
  0x5f   : > { %s778_s1 = sshll.u32 %s7574_s30, 4  ;;  %s868_s5 = sshll.u32 %s7508_s17, 4  ;;  %s779_s1 = int_to_ptr.hbm [resolvable:$true] %s778_s1  ;;  %s869_s5 = int_to_ptr.hbm [resolvable:$true] %s868_s5 }
  0x60   : > { %4647 = dma.hbm_to_vmem [thread:$0]  (%p4724_p10), %s779_s1, 512, %s781_s11, [#allocation16], %s5676_s10, %s5676_s10, %s5677_s19  }
  0x61   : > { %4651 = dma.hbm_to_vmem [thread:$0]  (%p4724_p10), %s810_s28, 512, %s812_s6, [#allocation19], %s5676_s10, %s5676_s10, %s5677_s19  }
  0x62   : > { %s5692_s7 = smov [#allocation23]   ;;  %s5693_s30 = smov [#allocation26]  }
  0x63   : > { %s842_s4 = sshll.u32 %s5692_s7, 4  ;;  %s870_s1 = sshll.u32 %s5693_s30, 4  ;;  %s843_s4 = int_to_ptr.vmem [resolvable:$true] %s842_s4  ;;  %s871_s1 = int_to_ptr.vmem [resolvable:$true] %s870_s1 }
  0x64   : > { %4655 = dma.hbm_to_vmem [thread:$0]  (%p4724_p10), %s841_s27, 512, %s843_s4, [#allocation22], %s5676_s10, %s5676_s10, %s5677_s19  }
  0x65   : > { %s899_s28 = sshll.u32 %s7511_s20, 4  ;;  %s927_s26 = sshll.u32 %s7513_s22, 4  ;;  %s900_s28 = int_to_ptr.hbm [resolvable:$true] %s899_s28  ;;  %s928_s26 = int_to_ptr.hbm [resolvable:$true] %s927_s26 }
  0x66   : > { %4659 = dma.hbm_to_vmem [thread:$0]  (%p4724_p10), %s869_s5, 512, %s871_s1, [#allocation25], %s5676_s10, %s5676_s10, %s5677_s19  }
  0x67   : > { %s5694_s6 = smov [#allocation29]   ;;  %s5695_s14 = smov [#allocation32]  }
  0x68   : > { %s901_s0 = sshll.u32 %s5694_s6, 4  ;;  %s929_s27 = sshll.u32 %s5695_s14, 4  ;;  %s902_s0 = int_to_ptr.vmem [resolvable:$true] %s901_s0  ;;  %s930_s27 = int_to_ptr.vmem [resolvable:$true] %s929_s27 }
  0x69   : > { %4663 = dma.hbm_to_vmem [thread:$0]  (%p4724_p10), %s900_s28, 512, %s902_s0, [#allocation28], %s5676_s10, %s5676_s10, %s5677_s19  }
  0x6a   : > { %s958_s5 = sshll.u32 %s7516_s25, 4  ;;  %s7575_s30 = sld [smem:[#allocation76_spill]]  ;;  %s959_s5 = int_to_ptr.hbm [resolvable:$true] %s958_s5 }
  0x6b   : > { %4667 = dma.hbm_to_vmem [thread:$0]  (%p4724_p10), %s928_s26, 512, %s930_s27, [#allocation31], %s5676_s10, %s5676_s10, %s5677_s19  }
  0x6c   : > { %s5696_s23 = smov [#allocation35]   ;;  %s5697_s28 = smov [#allocation36]  }
  0x6d   : > { %s960_s8 = sshll.u32 %s5696_s23, 4  ;;  %s974_s29 = sshll.u32 %s5697_s28, 4  ;;  %s961_s8 = int_to_ptr.vmem [resolvable:$true] %s960_s8  ;;  %s975_s29 = int_to_ptr.vmem [resolvable:$true] %s974_s29 }
  0x6e   : > { %4671 = dma.hbm_to_vmem [thread:$0]  (%p4724_p10), %s959_s5, 256, %s961_s8, [#allocation34], %s5676_s10, %s5676_s10, %s5677_s19  }
  0x70   : > { %s972_s1 = sshll.u32 %s7575_s30, 4  ;;  %s973_s1 = int_to_ptr.hbm [resolvable:$true] %s972_s1 }
  0x71   : > { %4673 = dma.hbm_to_vmem [thread:$0]  (%p4724_p10), %s973_s1, 256, %s975_s29, [#allocation37], %s5676_s10, %s5676_s10, %s5677_s19  }
  0x72 PF: > { %998 = sbr.rel (%p5896_p9) target bundleno = 4284 (0x10bc), region = 128  ;;  %p4746_p11 = scmp.eq.s32.totalorder (!%p5896_p9), %s5869_s9, 0 }
  0x77   : > { %5605 = dma.done.wait (%p4746_p11), [#allocation4], 512  }
  0x78   : > { %5607 = vsyncadd (%p4746_p11), [#allocation4], 4294966784 }
  0x79   : > { %5609 = dma.done.wait (%p4746_p11), [#allocation7], 1536  }
  0x7a   : > { %5611 = vsyncadd (%p4746_p11), [#allocation7], 4294965760 }
  0x7b   : > { %5613 = dma.done.wait (%p4746_p11), [#allocation10], 1024  }
  0x7c   : > { %5615 = vsyncadd (%p4746_p11), [#allocation10], 4294966272 }
  0x7d   : > { %5617 = dma.done.wait (%p4746_p11), [#allocation13], 1536  }
  0x7e   : > { %5619 = vsyncadd (%p4746_p11), [#allocation13], 4294965760 }
  0x7f   : > { %5621 = dma.done.wait (%p4746_p11), [#allocation16], 1024  }
  0x80   : > { %5623 = vsyncadd (%p4746_p11), [#allocation16], 4294966272 }
  0x81   : > { %5625 = dma.done.wait (%p4746_p11), [#allocation19], 1024  }
  0x82   : > { %5627 = vsyncadd (%p4746_p11), [#allocation19], 4294966272 }
  0x83   : > { %5629 = dma.done.wait (%p4746_p11), [#allocation22], 1024  }
  0x84   : > { %5631 = vsyncadd (%p4746_p11), [#allocation22], 4294966272 }
  0x85   : > { %5633 = dma.done.wait (%p4746_p11), [#allocation25], 1024  }
  0x86   : > { %5635 = vsyncadd (%p4746_p11), [#allocation25], 4294966272 }
  0x87   : > { %5637 = dma.done.wait (%p4746_p11), [#allocation28], 768  }
  0x88   : > { %5639 = vsyncadd (%p4746_p11), [#allocation28], 4294966528 }
  0x89   : > { %5641 = dma.done.wait (%p4746_p11), [#allocation31], 1024  }
  0x8a   : > { %5643 = vsyncadd (%p4746_p11), [#allocation31], 4294966272 }
  0x8b   : > { %5645 = dma.done.wait (%p4746_p11), [#allocation34], 512  }
  0x8c   : > { %5647 = vsyncadd (%p4746_p11), [#allocation34], 4294966784 }
  0x8d   : > { %5649 = dma.done.wait (%p4746_p11), [#allocation37], 256  }
  0x8e   : > { %5651 = vsyncadd (%p4746_p11), [#allocation37], 4294967040  ;;  %p1176_p12 = scmp.lt.s32.totalorder %s5869_s9, 1  ;;  %s7577_s0 = sld [smem:[#allocation61_spill]]  ;;  %vm1272_vm0 = vcmask 130048   ;;  %v5701_v5 = vmov 0.0  }
  0x8f   : > { %s5698_s27 = smov 127   ;;  %s5699_s2 = smov 1   ;;  %1288 = vst.msk [vmem:[#allocation2 + $0x78] sm:$0xff] %vm1272_vm0, %v5701_v5  ;;  %vm1339_vm1 = vcmask 130056   ;;  %vm1386_vm2 = vcmask 113664   ;;  %vm1365_vm3 = vcmask 121856  }
  0x90   : > { %s1177_s19 = scalar_select %p1176_p12, %s5869_s9, 1  ;;  %1273 = vst.msk [vmem:[#allocation2] sm:$0xff] %vm1272_vm0, %v5701_v5  ;;  %vm1318_vm4 = vcmask 130064   ;;  %v1241_v43 = vld [vmem:[#allocation8 + $0x8] sm:$0xff]  ;;  %v5703_v44 = vmov 0   ;;  %v1242_v49 = vld [vmem:[#allocation8 + $0x10] sm:$0xff] }
  0x91   : > { %s5700_s3 = smov 126   ;;  %1274 = vst.msk [vmem:[#allocation2 + $0x8] sm:$0xff] %vm1272_vm0, %v5701_v5  ;;  %s5702_s5 = smov 2   ;;  %4838 = vset.pattern.permute.xlu0 %v5703_v44  ;;  %4839 = vset.pattern.permute.xlu1 %v5703_v44  ;;  %v1240_v50 = vld [vmem:[#allocation8] sm:$0xff]  ;;  %v1233_v52 = vld [vmem:[#allocation6 + $0x8] sm:$0xff]  ;;  %vm1437_vm5 = vcmask 588800  }
  0x92   : > { %s4629_s10 = smul.u32 40, %s1177_s19  ;;  %1275 = vst.msk [vmem:[#allocation2 + $0x10] sm:$0xff] %vm1272_vm0, %v5701_v5  ;;  %4837 = vset.pattern.permute.xlu2 %v5703_v44  ;;  %v1232_v55 = vld [vmem:[#allocation6] sm:$0xff]  ;;  %v1243_v57 = vld [vmem:[#allocation8 + $0x18] sm:$0xff]  ;;  %v1234_v59 = vld [vmem:[#allocation6 + $0x10] sm:$0xff]  ;;  %s7586_s30 = sld [smem:[#allocation71_spill]] }
  0x93   : > { %1276 = vst.msk [vmem:[#allocation2 + $0x18] sm:$0xff] %vm1272_vm0, %v5701_v5  ;;  %v1235_v58 = vld [vmem:[#allocation6 + $0x18] sm:$0xff]  ;;  %v1237_v60 = vld [vmem:[#allocation6 + $0x28] sm:$0xff]  ;;  %v1236_v61 = vld [vmem:[#allocation6 + $0x20] sm:$0xff]  ;;  %s7592_s28 = sld [smem:[#allocation73_spill]]  ;;  %s4628_s11 = sshll.u32 %s5869_s9, 4 }
  0x94   : > { %s1180_s14 = scalar_lea.vmem %s7577_s0, %s4629_s10  ;;  %1277 = vst.msk [vmem:[#allocation2 + $0x20] sm:$0xff] %vm1272_vm0, %v5701_v5  ;;  %v1239_v62 = vld [vmem:[#allocation6 + $0x38] sm:$0xff]  ;;  %v1238_v63 = vld [vmem:[#allocation6 + $0x30] sm:$0xff]  ;;  %s7597_s10 = sld [smem:[#allocation74_spill]] }
  0x95   : > { %v6129_v0 = vld [vmem:[%s1180_s14] sm:$0xff]  ;;  %v1184_v2 = vld [vmem:[%s1180_s14 + $0x18] sm:$0xff]  ;;  %v1183_v3 = vld [vmem:[%s1180_s14 + $0x10] sm:$0xff]  ;;  %1278 = vst.msk [vmem:[#allocation2 + $0x28] sm:$0xff] %vm1272_vm0, %v5701_v5  ;;  %s7603_s23 = sld [smem:[#allocation53_spill]] }
  0x96   : > { %v1185_v1 = vld [vmem:[%s1180_s14 + $0x20] sm:$0xff]  ;;  %1350 = vrot.lane.b32.xlu0 %v6129_v0, %s5698_s27  ;;  %1330 = vrot.lane.b32.xlu2 %v1184_v2, %s5699_s2  ;;  %v1182_v4 = vld [vmem:[%s1180_s14 + $0x8] sm:$0xff]  ;;  %1279 = vst.msk [vmem:[#allocation2 + $0x30] sm:$0xff] %vm1272_vm0, %v5701_v5  ;;  %s7604_s6 = sld [smem:[#allocation77_spill]] }
  0x97   : > { %1332 = vrot.lane.b32.xlu1 %v1185_v1, %s5699_s2  ;;  %1214 = vmatpush.msra.mxu0 %v1185_v1  ;;  %1280 = vst.msk [vmem:[#allocation2 + $0x38] sm:$0xff] %vm1272_vm0, %v5701_v5 }
  0x98   : > { %1281 = vst.msk [vmem:[#allocation2 + $0x40] sm:$0xff] %vm1272_vm0, %v5701_v5  ;;  %s7587_s1 = smov %s7586_s30 }
  0x99   : > { %1215 = vmatpush.msra.mxu0 %v1184_v2  ;;  %1282 = vst.msk [vmem:[#allocation2 + $0x48] sm:$0xff] %vm1272_vm0, %v5701_v5 }
  0x9a   : > { %1283 = vst.msk [vmem:[#allocation2 + $0x50] sm:$0xff] %vm1272_vm0, %v5701_v5 }
  0x9b   : > { %1216 = vmatpush.msra.mxu0 %v1183_v3  ;;  %1284 = vst.msk [vmem:[#allocation2 + $0x58] sm:$0xff] %vm1272_vm0, %v5701_v5  ;;  %s1173_s8 = sand.u32 1, %s7603_s23  }
  0x9c   : > { %1285 = vst.msk [vmem:[#allocation2 + $0x60] sm:$0xff] %vm1272_vm0, %v5701_v5  ;;  %s4549_s29 = sshll.u32 %s1173_s8, 4  ;;  %s4212_s14 = scalar_lea.sflag [#allocation5], %s1173_s8 }
  0x9d   : > { %1217 = vmatpush.msra.mxu0 %v1182_v4  ;;  %1286 = vst.msk [vmem:[#allocation2 + $0x68] sm:$0xff] %vm1272_vm0, %v5701_v5  ;;  %s1175_s9 = scalar_lea.vmem [#allocation38], %s4549_s29 }
  0x9e   : > { %1379 = vrot.lane.b32.xlu0 %v1185_v1, %s5700_s3  ;;  %1375 = vrot.lane.b32.xlu2 %v1183_v3, %s5700_s3  ;;  %1287 = vst.msk [vmem:[#allocation2 + $0x70] sm:$0xff] %vm1272_vm0, %v5701_v5 }
  0x9f   : > { %1377 = vrot.lane.b32.xlu1 %v1184_v2, %s5700_s3  ;;  %1218 = vmatpush.msra.mxu0 %v6129_v0  ;;  %1289 = vst.msk [vmem:[#allocation2 + $0x80] sm:$0xff] %vm1272_vm0, %v5701_v5 }
  0xa0   : > { %1290 = vst.msk [vmem:[#allocation2 + $0x88] sm:$0xff] %vm1272_vm0, %v5701_v5 }
  0xa1   : > { %1291 = vst.msk [vmem:[#allocation2 + $0x90] sm:$0xff] %vm1272_vm0, %v5701_v5 }
  0xa2   : > { %1292 = vst.msk [vmem:[#allocation2 + $0x98] sm:$0xff] %vm1272_vm0, %v5701_v5 }
  0xa3   : > { %1293 = vst.msk [vmem:[#allocation2 + $0xa0] sm:$0xff] %vm1272_vm0, %v5701_v5 }
  0xa4   : > { %1294 = vst.msk [vmem:[#allocation2 + $0xa8] sm:$0xff] %vm1272_vm0, %v5701_v5 }
  0xa5   : > { %1295 = vst.msk [vmem:[#allocation2 + $0xb0] sm:$0xff] %vm1272_vm0, %v5701_v5 }
  0xa6   : > { %1328 = vrot.lane.b32.xlu0 %v1183_v3, %s5699_s2  ;;  %1326 = vrot.lane.b32.xlu2 %v1182_v4, %s5699_s2  ;;  %1296 = vst.msk [vmem:[#allocation2 + $0xb8] sm:$0xff] %vm1272_vm0, %v5701_v5 }
  0xa7   : > { %1373 = vrot.lane.b32.xlu1 %v1182_v4, %s5700_s3  ;;  %1297 = vst.msk [vmem:[#allocation2 + $0xc0] sm:$0xff] %vm1272_vm0, %v5701_v5 }
  0xa8   : > { %1345 = vst.msk [vmem:[#allocation2 + $0x50] sm:$0xff] %vm1272_vm0, %v6129_v0 }
  0xa9   : > { %1346 = vst.msk [vmem:[#allocation2 + $0x58] sm:$0xff] %vm1272_vm0, %v1182_v4 }
  0xaa   : > { %1347 = vst.msk [vmem:[#allocation2 + $0x60] sm:$0xff] %vm1272_vm0, %v1183_v3 }
  0xab   : > { %1348 = vst.msk [vmem:[#allocation2 + $0x68] sm:$0xff] %vm1272_vm0, %v1184_v2 }
  0xac   : > { %1349 = vst.msk [vmem:[#allocation2 + $0x70] sm:$0xff] %vm1272_vm0, %v1185_v1 }
  0xae   : > { %1371 = vrot.lane.b32.xlu0 %v6129_v0, %s5700_s3  ;;  %1358 = vrot.lane.b32.xlu2 %v1185_v1, %s5698_s27 }
  0xaf   : > { %1324 = vrot.lane.b32.xlu1 %v6129_v0, %s5699_s2  ;;  %v1402_v13 = vld [vmem:[#allocation2 + $0x50] sm:$0xff] }
  0xb0   : > { %v1403_v10 = vld [vmem:[#allocation2 + $0x58] sm:$0xff]  ;;  %1815 = vst.msk [vmem:[#allocation2 + $0x50] sm:$0xff] %vm1272_vm0, %v5701_v5 }
  0xb1   : > { %v1404_v9 = vld [vmem:[#allocation2 + $0x60] sm:$0xff]  ;;  %1816 = vst.msk [vmem:[#allocation2 + $0x58] sm:$0xff] %vm1272_vm0, %v5701_v5 }
  0xb2   : > { %v1405_v8 = vld [vmem:[#allocation2 + $0x68] sm:$0xff]  ;;  %1817 = vst.msk [vmem:[#allocation2 + $0x60] sm:$0xff] %vm1272_vm0, %v5701_v5 }
  0xb3   : > { %v1406_v7 = vld [vmem:[#allocation2 + $0x70] sm:$0xff]  ;;  %1818 = vst.msk [vmem:[#allocation2 + $0x68] sm:$0xff] %vm1272_vm0, %v5701_v5 }
  0xb4   : > { %1819 = vst.msk [vmem:[#allocation2 + $0x70] sm:$0xff] %vm1272_vm0, %v5701_v5 }
  0xb6   : > { %1311 = vrot.lane.b32.xlu0 %v1185_v1, %s5702_s5  ;;  %1309 = vrot.lane.b32.xlu2 %v1184_v2, %s5702_s5 }
  0xb7   : > { %1356 = vrot.lane.b32.xlu1 %v1184_v2, %s5698_s27 }
  0xbe   : > { %1354 = vrot.lane.b32.xlu0 %v1183_v3, %s5698_s27  ;;  %1352 = vrot.lane.b32.xlu2 %v1182_v4, %s5698_s27 }
  0xbf   : > { %1307 = vrot.lane.b32.xlu1 %v1183_v3, %s5702_s5 }
  0xc6   : > { %1305 = vrot.lane.b32.xlu0 %v1182_v4, %s5702_s5  ;;  %1419 = vperm.xlu2 %4837, %v1240_v50  }
  0xc7   : > { %1303 = vrot.lane.b32.xlu1 %v6129_v0, %s5702_s5 }
  0xce   : > { %1424 = vperm.xlu0 %4838, %v1241_v43   ;;  %1434 = vperm.xlu2 %4837, %v1243_v57  }
  0xcf   : > { %1429 = vperm.xlu1 %4839, %v1242_v49  }
  0xf0   : > { %v1331_v6 = vpop.permute.xlu2 %1330 }
  0xf1   : > { %1343 = vst.msk [vmem:[#allocation2 + $0x40] sm:$0xff] %vm1339_vm1, %v1331_v6 }
  0xf8   : > { %v1376_v11 = vpop.permute.xlu2 %1375  ;;  %v1400_v12 = vld [vmem:[#allocation2 + $0x40] sm:$0xff] }
  0xf9   : > { %1389 = vst.msk [vmem:[#allocation2 + $0xb0] sm:$0xff] %vm1386_vm2, %v1376_v11 }
  0xfa   : > { %1813 = vst.msk [vmem:[#allocation2 + $0x40] sm:$0xff] %vm1272_vm0, %v5701_v5 }
 0x100   : > { %v1327_v14 = vpop.permute.xlu2 %1326  ;;  %v1414_v15 = vld [vmem:[#allocation2 + $0xb0] sm:$0xff] }
 0x101   : > { %1341 = vst.msk [vmem:[#allocation2 + $0x30] sm:$0xff] %vm1339_vm1, %v1327_v14 }
 0x102   : > { %1827 = vst.msk [vmem:[#allocation2 + $0xb0] sm:$0xff] %vm1272_vm0, %v5701_v5 }
 0x103   : > { %2362 = vst.msk [vmem:[#allocation2 + $0xb0] sm:$0xff] %vm1272_vm0, %v5701_v5 }
 0x104   : > { %2852 = vst.msk [vmem:[#allocation2 + $0xb0] sm:$0xff] %vm1272_vm0, %v5701_v5 }
 0x105   : > { %3407 = vst.msk [vmem:[#allocation2 + $0xb0] sm:$0xff] %vm1272_vm0, %v5701_v5 }
 0x106   : > { %3897 = vst.msk [vmem:[#allocation2 + $0xb0] sm:$0xff] %vm1272_vm0, %v5701_v5 }
 0x108   : > { %v1351_v16 = vpop.permute.xlu0 %1350  ;;  %v1359_v18 = vpop.permute.xlu2 %1358  ;;  %v1398_v19 = vld [vmem:[#allocation2 + $0x30] sm:$0xff] }
 0x109   : > { %v1333_v17 = vpop.permute.xlu1 %1332  ;;  %1366 = vst.msk [vmem:[#allocation2 + $0x78] sm:$0xff] %vm1365_vm3, %v1351_v16 }
 0x10a   : > { %1344 = vst.msk [vmem:[#allocation2 + $0x48] sm:$0xff] %vm1339_vm1, %v1333_v17 }
 0x10b   : > { %1370 = vst.msk [vmem:[#allocation2 + $0x98] sm:$0xff] %vm1365_vm3, %v1359_v18 }
 0x10c   : > { %1811 = vst.msk [vmem:[#allocation2 + $0x30] sm:$0xff] %vm1272_vm0, %v5701_v5 }
 0x110   : > { %v1380_v20 = vpop.permute.xlu0 %1379  ;;  %v1407_v21 = vld [vmem:[#allocation2 + $0x78] sm:$0xff]  ;;  %v1310_v24 = vpop.permute.xlu2 %1309 }
 0x111   : > { %v1378_v22 = vpop.permute.xlu1 %1377  ;;  %1391 = vst.msk [vmem:[#allocation2 + $0xc0] sm:$0xff] %vm1386_vm2, %v1380_v20  ;;  %1450 = vmatpush.msra.mxu1 %v1407_v21  ;;  %v1401_v23 = vld [vmem:[#allocation2 + $0x48] sm:$0xff] }
 0x112   : > { %1820 = vst.msk [vmem:[#allocation2 + $0x78] sm:$0xff] %vm1272_vm0, %v5701_v5  ;;  %v1411_v25 = vld [vmem:[#allocation2 + $0x98] sm:$0xff] }
 0x113   : > { %1390 = vst.msk [vmem:[#allocation2 + $0xb8] sm:$0xff] %vm1386_vm2, %v1378_v22  ;;  %1451 = vmatpush.msra.mxu1 %v1406_v7 }
 0x114   : > { %1814 = vst.msk [vmem:[#allocation2 + $0x48] sm:$0xff] %vm1272_vm0, %v5701_v5 }
 0x115   : > { %1452 = vmatpush.msra.mxu1 %v1405_v8  ;;  %1322 = vst.msk [vmem:[#allocation2 + $0x18] sm:$0xff] %vm1318_vm4, %v1310_v24 }
 0x116   : > { %1824 = vst.msk [vmem:[#allocation2 + $0x98] sm:$0xff] %vm1272_vm0, %v5701_v5 }
 0x117   : > { %1453 = vmatpush.msra.mxu1 %v1404_v9 }
 0x118   : > { %v1329_v26 = vpop.permute.xlu0 %1328  ;;  %v1416_v27 = vld [vmem:[#allocation2 + $0xc0] sm:$0xff]  ;;  %v1353_v42 = vpop.permute.xlu2 %1352 }
 0x119   : > { %v1374_v28 = vpop.permute.xlu1 %1373  ;;  %1342 = vst.msk [vmem:[#allocation2 + $0x38] sm:$0xff] %vm1339_vm1, %v1329_v26  ;;  %1454 = vmatpush.msra.mxu1 %v1403_v10  ;;  %1486 = vmatpush.msra.mxu2 %v1416_v27  ;;  %v5704_v26 = vmov 16.0  }
 0x11a   : > { %1829 = vst.msk [vmem:[#allocation2 + $0xc0] sm:$0xff] %vm1272_vm0, %v5701_v5  ;;  %v1415_v29 = vld [vmem:[#allocation2 + $0xb8] sm:$0xff]  ;;  %4840 = vrcp.f32 %v5704_v26 }
 0x11b   : > { %2364 = vst.msk [vmem:[#allocation2 + $0xc0] sm:$0xff] %vm1272_vm0, %v5701_v5  ;;  %1455 = vmatpush.msra.mxu1 %v1402_v13  ;;  %1487 = vmatpush.msra.mxu2 %v1415_v29 }
 0x11c   : > { %2854 = vst.msk [vmem:[#allocation2 + $0xc0] sm:$0xff] %vm1272_vm0, %v5701_v5  ;;  %v1395_v41 = vld [vmem:[#allocation2 + $0x18] sm:$0xff] }
 0x11d   : > { %3409 = vst.msk [vmem:[#allocation2 + $0xc0] sm:$0xff] %vm1272_vm0, %v5701_v5  ;;  %1456 = vmatpush.msra.mxu1 %v1401_v23  ;;  %1488 = vmatpush.msra.mxu2 %v1414_v15 }
 0x11e   : > { %3899 = vst.msk [vmem:[#allocation2 + $0xc0] sm:$0xff] %vm1272_vm0, %v5701_v5 }
 0x11f   : > { %1388 = vst.msk [vmem:[#allocation2 + $0xa8] sm:$0xff] %vm1386_vm2, %v1374_v28  ;;  %1457 = vmatpush.msra.mxu1 %v1400_v12 }
 0x120   : > { %1828 = vst.msk [vmem:[#allocation2 + $0xb8] sm:$0xff] %vm1272_vm0, %v5701_v5  ;;  %v1372_v30 = vpop.permute.xlu0 %1371  ;;  %v1399_v31 = vld [vmem:[#allocation2 + $0x38] sm:$0xff]  ;;  %v1420_v0 = vpop.permute.xlu2 %1419 }
 0x121   : > { %v1325_v32 = vpop.permute.xlu1 %1324  ;;  %2363 = vst.msk [vmem:[#allocation2 + $0xb8] sm:$0xff] %vm1272_vm0, %v5701_v5  ;;  %1458 = vmatpush.msra.mxu1 %v1399_v31  ;;  %v4841_v27 = vpop.eup %4840  ;;  %v5705_v31 = vmov 32.0  }
 0x122   : > { %2853 = vst.msk [vmem:[#allocation2 + $0xb8] sm:$0xff] %vm1272_vm0, %v5701_v5  ;;  %v1521_v28 = vmul.f32 16.0, %v4841_v27  ;;  %4842 = vrcp.f32 %v5705_v31  ;;  %vm1525_vm6 = vweird.f32 %v4841_v27 }
 0x123   : > { %3408 = vst.msk [vmem:[#allocation2 + $0xb8] sm:$0xff] %vm1272_vm0, %v5701_v5  ;;  %1459 = vmatpush.msra.mxu1 %v1398_v19 }
 0x124   : > { %3898 = vst.msk [vmem:[#allocation2 + $0xb8] sm:$0xff] %vm1272_vm0, %v5701_v5  ;;  %v1522_v29 = vsub.f32 1.0, %v1521_v28 }
 0x125   : > { %1387 = vst.msk [vmem:[#allocation2 + $0xa0] sm:$0xff] %vm1386_vm2, %v1372_v30 }
 0x126   : > { %1812 = vst.msk [vmem:[#allocation2 + $0x38] sm:$0xff] %vm1272_vm0, %v5701_v5  ;;  %v1413_v33 = vld [vmem:[#allocation2 + $0xa8] sm:$0xff]  ;;  %v1523_v30 = vmul.f32 %v4841_v27, %v1522_v29 }
 0x127   : > { %1340 = vst.msk [vmem:[#allocation2 + $0x28] sm:$0xff] %vm1339_vm1, %v1325_v32  ;;  %1489 = vmatpush.msra.mxu2 %v1413_v33 }
 0x128   : > { %1826 = vst.msk [vmem:[#allocation2 + $0xa8] sm:$0xff] %vm1272_vm0, %v5701_v5  ;;  %v1312_v34 = vpop.permute.xlu0 %1311  ;;  %v1435_v19 = vpop.permute.xlu2 %1434  ;;  %v1524_v32 = vadd.f32 %v4841_v27, %v1523_v30 }
 0x129   : > { %v1357_v35 = vpop.permute.xlu1 %1356  ;;  %2361 = vst.msk [vmem:[#allocation2 + $0xa8] sm:$0xff] %vm1272_vm0, %v5701_v5 }
 0x12a   : > { %2851 = vst.msk [vmem:[#allocation2 + $0xa8] sm:$0xff] %vm1272_vm0, %v5701_v5 }
 0x12b   : > { %3406 = vst.msk [vmem:[#allocation2 + $0xa8] sm:$0xff] %vm1272_vm0, %v5701_v5 }
 0x12c   : > { %3896 = vst.msk [vmem:[#allocation2 + $0xa8] sm:$0xff] %vm1272_vm0, %v5701_v5  ;;  %v1412_v36 = vld [vmem:[#allocation2 + $0xa0] sm:$0xff] }
 0x12d   : > { %1323 = vst.msk [vmem:[#allocation2 + $0x20] sm:$0xff] %vm1318_vm4, %v1312_v34  ;;  %1490 = vmatpush.msra.mxu2 %v1412_v36  ;;  %v6333_v34 = vsel %vm1525_vm6, %v4841_v27, %v1524_v32 }
 0x12e   : > { %1825 = vst.msk [vmem:[#allocation2 + $0xa0] sm:$0xff] %vm1272_vm0, %v5701_v5  ;;  %v1397_v37 = vld [vmem:[#allocation2 + $0x28] sm:$0xff] }
 0x12f   : > { %2360 = vst.msk [vmem:[#allocation2 + $0xa0] sm:$0xff] %vm1272_vm0, %v5701_v5  ;;  %1460 = vmatpush.msra.mxu1 %v1397_v37  ;;  %1491 = vmatpush.msra.mxu2 %v1411_v25  ;;  %v1246_v25 = vld [vmem:[#allocation9 + $0x10] sm:$0xff]  ;;  %v4843_v37 = vpop.eup %4842 }
 0x130   : > { %2850 = vst.msk [vmem:[#allocation2 + $0xa0] sm:$0xff] %vm1272_vm0, %v5701_v5  ;;  %v1355_v38 = vpop.permute.xlu0 %1354  ;;  %vm1545_vm7 = vweird.f32 %v4843_v37 }
 0x131   : > { %v1308_v39 = vpop.permute.xlu1 %1307  ;;  %3405 = vst.msk [vmem:[#allocation2 + $0xa0] sm:$0xff] %vm1272_vm0, %v5701_v5 }
 0x132   : > { %3895 = vst.msk [vmem:[#allocation2 + $0xa0] sm:$0xff] %vm1272_vm0, %v5701_v5 }
 0x133   : > { %1369 = vst.msk [vmem:[#allocation2 + $0x90] sm:$0xff] %vm1365_vm3, %v1357_v35 }
 0x134   : > { %1810 = vst.msk [vmem:[#allocation2 + $0x28] sm:$0xff] %vm1272_vm0, %v5701_v5  ;;  %v1396_v40 = vld [vmem:[#allocation2 + $0x20] sm:$0xff] }
 0x135   : > { %1368 = vst.msk [vmem:[#allocation2 + $0x88] sm:$0xff] %vm1365_vm3, %v1355_v38  ;;  %1461 = vmatpush.msra.mxu1 %v1396_v40 }
 0x136   : > { %1809 = vst.msk [vmem:[#allocation2 + $0x20] sm:$0xff] %vm1272_vm0, %v5701_v5 }
 0x137   : > { %1321 = vst.msk [vmem:[#allocation2 + $0x10] sm:$0xff] %vm1318_vm4, %v1308_v39  ;;  %1462 = vmatpush.msra.mxu1 %v1395_v41  ;;  %v1541_v41 = vmul.f32 32.0, %v4843_v37 }
 0x138   : > { %1367 = vst.msk [vmem:[#allocation2 + $0x80] sm:$0xff] %vm1365_vm3, %v1353_v42  ;;  %v1306_v45 = vpop.permute.xlu0 %1305 }
 0x139   : > { %1808 = vst.msk [vmem:[#allocation2 + $0x18] sm:$0xff] %vm1272_vm0, %v5701_v5  ;;  %v1304_v46 = vpop.permute.xlu1 %1303 }
 0x13a   : > { %v1410_v47 = vld [vmem:[#allocation2 + $0x90] sm:$0xff]  ;;  %1320 = vst.msk [vmem:[#allocation2 + $0x8] sm:$0xff] %vm1318_vm4, %v1306_v45 }
 0x13b   : > { %1492 = vmatpush.msra.mxu2 %v1410_v47  ;;  %1823 = vst.msk [vmem:[#allocation2 + $0x90] sm:$0xff] %vm1272_vm0, %v5701_v5 }
 0x13c   : > { %v1409_v48 = vld [vmem:[#allocation2 + $0x88] sm:$0xff]  ;;  %1319 = vst.msk [vmem:[#allocation2] sm:$0xff] %vm1318_vm4, %v1304_v46  ;;  %v1542_v46 = vsub.f32 1.0, %v1541_v41 }
 0x13d   : > { %1493 = vmatpush.msra.mxu2 %v1409_v48  ;;  %1822 = vst.msk [vmem:[#allocation2 + $0x88] sm:$0xff] %vm1272_vm0, %v5701_v5 }
 0x13e   : > { %v1394_v51 = vld [vmem:[#allocation2 + $0x10] sm:$0xff]  ;;  %v1543_v49 = vmul.f32 %v4843_v37, %v1542_v46 }
 0x13f   : > { %1463 = vmatpush.msra.mxu1 %v1394_v51  ;;  %1807 = vst.msk [vmem:[#allocation2 + $0x10] sm:$0xff] %vm1272_vm0, %v5701_v5  ;;  %v1408_v53 = vld [vmem:[#allocation2 + $0x80] sm:$0xff] }
 0x140   : > { %1494 = vmatpush.msra.mxu2 %v1408_v53  ;;  %1821 = vst.msk [vmem:[#allocation2 + $0x80] sm:$0xff] %vm1272_vm0, %v5701_v5  ;;  %v1425_v7 = vpop.permute.xlu0 %1424 }
 0x141   : > { %4555 = vmatmul.msk.f32.vlgmr.msra.gmra.mxu2 %vm1437_vm5, %v1233_v52  ;;  %v1393_v54 = vld [vmem:[#allocation2 + $0x8] sm:$0xff]  ;;  %v1430_v13 = vpop.permute.xlu1 %1429  ;;  %v1544_v52 = vadd.f32 %v4843_v37, %v1543_v49 }
 0x142   : > { %1464 = vmatpush.msra.mxu1 %v1393_v54  ;;  %1806 = vst.msk [vmem:[#allocation2 + $0x8] sm:$0xff] %vm1272_vm0, %v5701_v5 }
 0x143   : > { %v1392_v56 = vld [vmem:[#allocation2] sm:$0xff] }
 0x144   : > { %1465 = vmatpush.msra.mxu1 %v1392_v56  ;;  %1805 = vst.msk [vmem:[#allocation2] sm:$0xff] %vm1272_vm0, %v5701_v5 }
 0x145   : > { %1466 = vmatmul.f32.vlgmr.msra.gmra.mxu1 %v1232_v55  ;;  %v6339_v55 = vsel %vm1545_vm7, %v4843_v37, %v1544_v52 }
 0x149   : > { %4556 = vmatmul.msk.f32.gmra.mxu2 %vm1437_vm5, %v1235_v58 }
 0x14d   : > { %1469 = vmatmul.f32.gmra.mxu1 %v1234_v59 }
 0x151   : > { %4557 = vmatmul.msk.f32.gmra.mxu2 %vm1437_vm5, %v1237_v60 }
 0x155   : > { %1472 = vmatmul.f32.gmra.mxu1 %v1236_v61 }
 0x159   : > { %4558 = vmatmul.msk.f32.gmra.mxu2 %vm1437_vm5, %v1239_v62 }
 0x15d   : > { %1475 = vmatmul.f32.gmra.mxu1 %v1238_v63 }
 0x1c2   : > { %v1467_v1 = vpop.f32.mrf.mxu1 }
 0x1c3   : > { %v1468_v2 = vadd.f32 %v1467_v1, %v1420_v0 }
 0x1c4   : > { %v1496_v3 = vpop.f32.mrf.mxu2 }
 0x1c5   : > { %v6326_v4 = vadd.f32 %v1496_v3, %v1468_v2 }
 0x1c7   : > { %v1508_v6 = vsel %vm1272_vm0, %v6326_v4, 0.0 }
 0x1c8   : > { %1509 = vadd.xlane.f32.xlu1 %v1508_v6 }
 0x1ca   : > { %v1470_v8 = vpop.f32.mrf.mxu1 }
 0x1cb   : > { %v1471_v9 = vadd.f32 %v1470_v8, %v1425_v7  ;;  %v1245_v7 = vld [vmem:[#allocation9 + $0x8] sm:$0xff]  ;;  %v1247_v8 = vld [vmem:[#allocation9 + $0x18] sm:$0xff] }
 0x1cc   : > { %v1499_v10 = vpop.f32.mrf.mxu2 }
 0x1cd   : > { %v1500_v11 = vadd.f32 %v1499_v10, %v1471_v9  ;;  %v1249_v9 = vld [vmem:[#allocation11 + $0x8] sm:$0xff]  ;;  %v1250_v10 = vld [vmem:[#allocation11 + $0x10] sm:$0xff] }
 0x1cf   : > { %v1511_v12 = vsel %vm1272_vm0, %v1500_v11, 0.0 }
 0x1d0   : > { %1512 = vadd.xlane.f32.xlu2 %v1511_v12  ;;  %v1248_v12 = vld [vmem:[#allocation11] sm:$0xff] }
 0x1d2   : > { %v1473_v14 = vpop.f32.mrf.mxu1 }
 0x1d3   : > { %v1474_v15 = vadd.f32 %v1473_v14, %v1430_v13  ;;  %v1244_v13 = vld [vmem:[#allocation9] sm:$0xff] }
 0x1d4   : > { %v1502_v16 = vpop.f32.mrf.mxu2 }
 0x1d5   : > { %v1503_v17 = vadd.f32 %v1502_v16, %v1474_v15 }
 0x1d7   : > { %v1514_v18 = vsel %vm1272_vm0, %v1503_v17, 0.0 }
 0x1d8   : > { %1515 = vadd.xlane.f32.xlu0 %v1514_v18 }
 0x1da   : > { %v1476_v20 = vpop.f32.mrf.mxu1 }
 0x1db   : > { %v1477_v21 = vadd.f32 %v1476_v20, %v1435_v19 }
 0x1dc   : > { %v1505_v22 = vpop.f32.mrf.mxu2 }
 0x1dd   : > { %v1506_v23 = vadd.f32 %v1505_v22, %v1477_v21 }
 0x1df   : > { %v1517_v24 = vsel %vm1272_vm0, %v1506_v23, 0.0 }
 0x1e0   : > { %1518 = vadd.xlane.f32.xlu2 %v1517_v24 }
 0x1ec   : > { %1609 = vperm.xlu0 %4838, %v1246_v25  }
 0x23b   : > { %v1510_v35 = vpop.xlane.xlu1 %1509 }
 0x23c   : > { %v1527_v39 = vmul.f32 %v6333_v34, %v1510_v35 }
 0x243   : > { %v1513_v33 = vpop.xlane.xlu2 %1512 }
 0x244   : > { %v1528_v38 = vmul.f32 %v6333_v34, %v1513_v33 }
 0x246   : > { %v1531_v42 = vadd.f32 %v1528_v38, %v1527_v39 }
 0x24b   : > { %v1516_v36 = vpop.xlane.xlu0 %1515 }
 0x24c   : > { %v1529_v40 = vmul.f32 %v6333_v34, %v1516_v36 }
 0x24e   : > { %v1532_v44 = vadd.f32 %v1531_v42, %v1529_v40 }
 0x253   : > { %v1519_v43 = vpop.xlane.xlu2 %1518 }
 0x254   : > { %v1530_v45 = vmul.f32 %v6333_v34, %v1519_v43 }
 0x256   : > { %v1533_v47 = vadd.f32 %v1532_v44, %v1530_v45 }
 0x258   : > { %v1534_v48 = vrot.slane %v1533_v47, 4 }
 0x25a   : > { %v1535_v50 = vadd.f32 %v1534_v48, %v1533_v47 }
 0x25c   : > { %v1536_v51 = vrot.slane %v1535_v50, 2 }
 0x25e   : > { %v1537_v53 = vadd.f32 %v1536_v51, %v1535_v50  ;;  %v1610_v14 = vpop.permute.xlu0 %1609 }
 0x260   : > { %v1538_v54 = vrot.slane %v1537_v53, 1 }
 0x262   : > { %v1539_v56 = vadd.f32 %v1538_v54, %v1537_v53 }
 0x264   : > { %v1547_v57 = vmul.f32 %v6339_v55, %v1539_v56 }
 0x266   : > { %v6342_v58 = vsub.f32 %v1503_v17, %v1547_v57  ;;  %v6344_v59 = vsub.f32 %v1500_v11, %v1547_v57  ;;  %v6347_v60 = vsub.f32 %v6326_v4, %v1547_v57  ;;  %v1551_v3 = vsub.f32 %v1506_v23, %v1547_v57  ;;  %v1251_v11 = vld [vmem:[#allocation11 + $0x18] sm:$0xff] }
 0x268   : > { %v1554_v61 = vmul.f32 %v6342_v58, %v6342_v58  ;;  %v1553_v62 = vmul.f32 %v6344_v59, %v6344_v59  ;;  %v1552_v63 = vmul.f32 %v6347_v60, %v6347_v60  ;;  %v1555_v4 = vmul.f32 %v1551_v3, %v1551_v3 }
 0x26a   : > { %v1562_v0 = vsel %vm1272_vm0, %v1554_v61, 0.0  ;;  %v1559_v1 = vsel %vm1272_vm0, %v1553_v62, 0.0  ;;  %v1556_v2 = vsel %vm1272_vm0, %v1552_v63, 0.0  ;;  %v1565_v6 = vsel %vm1272_vm0, %v1555_v4, 0.0 }
 0x26b   : > { %1563 = vadd.xlane.f32.xlu0 %v1562_v0  ;;  %1560 = vadd.xlane.f32.xlu2 %v1559_v1 }
 0x26c   : > { %1557 = vadd.xlane.f32.xlu1 %v1556_v2 }
 0x274   : > { %1566 = vadd.xlane.f32.xlu1 %v1565_v6 }
 0x27f   : > { %1604 = vperm.xlu0 %4838, %v1245_v7  }
 0x283   : > { %1614 = vperm.xlu2 %4837, %v1247_v8  }
 0x287   : > { %1628 = vperm.xlu0 %4838, %v1249_v9  }
 0x28b   : > { %1633 = vperm.xlu2 %4837, %v1250_v10  }
 0x28d   : > { %1638 = vperm.xlu1 %4839, %v1251_v11  }
 0x293   : > { %1623 = vperm.xlu2 %4837, %v1248_v12  }
 0x295   : > { %1599 = vperm.xlu1 %4839, %v1244_v13  }
 0x2de   : > { %v1561_v15 = vpop.xlane.xlu2 %1560  ;;  %v1564_v19 = vpop.xlane.xlu0 %1563 }
 0x2df   : > { %v1558_v16 = vpop.xlane.xlu1 %1557  ;;  %v1569_v17 = vmul.f32 %v1561_v15, %v6333_v34  ;;  %v1570_v21 = vmul.f32 %v1564_v19, %v6333_v34 }
 0x2e0   : > { %v1568_v18 = vmul.f32 %v1558_v16, %v6333_v34 }
 0x2e2   : > { %v1572_v20 = vadd.f32 %v1569_v17, %v1568_v18 }
 0x2e4   : > { %v1573_v23 = vadd.f32 %v1572_v20, %v1570_v21 }
 0x2e6   : > { %v1615_v35 = vpop.permute.xlu2 %1614 }
 0x2e7   : > { %v1567_v22 = vpop.xlane.xlu1 %1566 }
 0x2e8   : > { %v1571_v24 = vmul.f32 %v1567_v22, %v6333_v34 }
 0x2ea   : > { %v1574_v25 = vadd.f32 %v1573_v23, %v1571_v24 }
 0x2ec   : > { %v1575_v26 = vrot.slane %v1574_v25, 4 }
 0x2ee   : > { %v1576_v27 = vadd.f32 %v1575_v26, %v1574_v25  ;;  %v1634_v40 = vpop.permute.xlu2 %1633 }
 0x2f0   : > { %v1577_v28 = vrot.slane %v1576_v27, 2 }
 0x2f1   : > { %v1605_v42 = vpop.permute.xlu0 %1604 }
 0x2f2   : > { %v1578_v29 = vadd.f32 %v1577_v28, %v1576_v27 }
 0x2f4   : > { %v1579_v30 = vrot.slane %v1578_v29, 1 }
 0x2f6   : > { %v1580_v31 = vadd.f32 %v1579_v30, %v1578_v29  ;;  %v1624_v56 = vpop.permute.xlu2 %1623 }
 0x2f8   : > { %v1581_v32 = vmul.f32 %v1580_v31, %v6339_v55 }
 0x2f9   : > { %v1629_v57 = vpop.permute.xlu0 %1628 }
 0x2fa   : > { %v1582_v33 = vadd.f32 1e-05, %v1581_v32 }
 0x2fc   : > { %4844 = vrsqrt.f32 %v1582_v33  ;;  %vm1589_vm9 = vweird.f32 %v1582_v33 }
 0x2ff   : > { %v1639_v39 = vpop.permute.xlu1 %1638 }
 0x302   : > { %v4845_v36 = vpop.eup %4844 }
 0x303   : > { %v1584_v37 = vmul.f32 %v4845_v36, %v1582_v33  ;;  %vm1590_vm8 = vweird.f32 %v4845_v36 }
 0x304   : > { %vm1591_vm10 = vmor %vm1589_vm9, %vm1590_vm8 }
 0x305   : > { %v1585_v38 = vmul.f32 %v4845_v36, %v1584_v37 }
 0x307   : > { %v1586_v41 = vmul.f32 0.5, %v1585_v38  ;;  %v1600_v50 = vpop.permute.xlu1 %1599 }
 0x309   : > { %v1587_v43 = vsub.f32 1.5, %v1586_v41 }
 0x30b   : > { %v1588_v44 = vmul.f32 %v4845_v36, %v1587_v43 }
 0x30d   : > { %v1592_v45 = vsel %vm1591_vm10, %v4845_v36, %v1588_v44 }
 0x30e   : > { %v1595_v46 = vmul.f32 %v1592_v45, %v6342_v58  ;;  %v1594_v47 = vmul.f32 %v1592_v45, %v6344_v59  ;;  %v1596_v48 = vmul.f32 %v1592_v45, %v1551_v3  ;;  %v1593_v49 = vmul.f32 %v1592_v45, %v6347_v60 }
 0x310   : > { %v1619_v51 = vmul.f32 %v1610_v14, %v1595_v46  ;;  %v1618_v52 = vmul.f32 %v1605_v42, %v1594_v47  ;;  %v1620_v53 = vmul.f32 %v1615_v35, %v1596_v48  ;;  %v1617_v54 = vmul.f32 %v1600_v50, %v1593_v49 }
 0x312   : > { %v6367_v61 = vadd.f32 %v1634_v40, %v1619_v51  ;;  %v6369_v62 = vadd.f32 %v1629_v57, %v1618_v52  ;;  %v6371_v63 = vadd.f32 %v1639_v39, %v1620_v53  ;;  %v6373_v0 = vadd.f32 %v1624_v56, %v1617_v54 }
 0x314   : > { %v6376_v58 = vmul.f32 0.70710677, %v6367_v61  ;;  %v6379_v59 = vmul.f32 0.70710677, %v6369_v62  ;;  %v6382_v60 = vmul.f32 0.70710677, %v6371_v63 }
 0x315   : > { %v6385_v1 = vmul.f32 0.70710677, %v6373_v0 }
 0x316   : > { %v6388_v2 = vand.u32 2147483647, %v6376_v58  ;;  %v6391_v3 = vand.u32 2147483647, %v6379_v59  ;;  %v6394_v4 = vand.u32 2147483647, %v6382_v60 }
 0x317   : > { %v6397_v6 = vand.u32 2147483647, %v6385_v1 }
 0x318   : > { %v1659_v7 = vmul.f32 0.3275911, %v6388_v2  ;;  %v1658_v8 = vmul.f32 0.3275911, %v6391_v3  ;;  %v1660_v9 = vmul.f32 0.3275911, %v6394_v4 }
 0x319   : > { %v1657_v12 = vmul.f32 0.3275911, %v6397_v6  ;;  %v1763_v22 = vsub.f32 0.0, %v6388_v2  ;;  %v1762_v25 = vsub.f32 0.0, %v6391_v3  ;;  %v1764_v26 = vsub.f32 0.0, %v6394_v4 }
 0x31a   : > { %v1663_v10 = vadd.f32 1.0, %v1659_v7  ;;  %v1662_v11 = vadd.f32 1.0, %v1658_v8  ;;  %v1664_v13 = vadd.f32 1.0, %v1660_v9 }
 0x31b   : > { %v6403_v14 = vadd.f32 1.0, %v1657_v12  ;;  %v1767_v7 = vmul.f32 %v1763_v22, %v6388_v2  ;;  %v1761_v22 = vsub.f32 0.0, %v6397_v6 }
 0x31c   : > { %4846 = vrcp.f32 %v1663_v10  ;;  %v1704_v18 = vand.u32 2147483647, %v1663_v10  ;;  %v1706_v21 = vand.u32 2147483648, %v1663_v10  ;;  %v1689_v23 = vand.u32 2147483647, %v1662_v11 }
 0x31d   : > { %4848 = vrcp.f32 %v1662_v11  ;;  %vm1700_vm11 = vweird.f32 %v1663_v10  ;;  %vm1685_vm13 = vweird.f32 %v1662_v11  ;;  %v1691_v29 = vand.u32 2147483648, %v1662_v11 }
 0x31e   : > { %4850 = vrcp.f32 %v1664_v13  ;;  %vm6409_vm14 = vcmp.eq.f32.partialorder %v1704_v18, 8.507059e+37  ;;  %v1707_v36 = vor.u32 1.1754944e-38, %v1706_v21  ;;  %vm6413_vm5 = vcmp.eq.f32.partialorder %v1689_v23, 8.507059e+37 }
 0x31f   : > { %4852 = vrcp.f32 %v6403_v14  ;;  %vm1715_vm6 = vweird.f32 %v1664_v13  ;;  %v1719_v40 = vand.u32 2147483647, %v1664_v13  ;;  %v1692_v43 = vor.u32 1.1754944e-38, %v1691_v29 }
 0x320   : > { %v1721_v44 = vand.u32 2147483648, %v1664_v13  ;;  %v1674_v51 = vand.u32 2147483647, %v6403_v14  ;;  %v1676_v52 = vand.u32 2147483648, %v6403_v14 }
 0x322   : > { %v4847_v15 = vpop.eup %4846  ;;  %v1722_v8 = vor.u32 1.1754944e-38, %v1721_v44 }
 0x323   : > { %v4849_v16 = vpop.eup %4848  ;;  %v1696_v17 = vmul.f32 %v4847_v15, %v1663_v10  ;;  %vm1701_vm12 = vweird.f32 %v4847_v15 }
 0x324   : > { %v1681_v19 = vmul.f32 %v4849_v16, %v1662_v11  ;;  %v4851_v27 = vpop.eup %4850  ;;  %vm1686_vm15 = vweird.f32 %v4849_v16  ;;  %vm1702_vm7 = vmor %vm1700_vm11, %vm1701_vm12  ;;  %vm1720_vm12 = vcmp.eq.f32.partialorder %v1719_v40, 8.507059e+37 }
 0x325   : > { %v1697_v20 = vsub.f32 1.0, %v1696_v17  ;;  %v1711_v32 = vmul.f32 %v4851_v27, %v1664_v13  ;;  %v4853_v33 = vpop.eup %4852  ;;  %vm1687_vm8 = vmor %vm1685_vm13, %vm1686_vm15  ;;  %vm1716_vm9 = vweird.f32 %v4851_v27  ;;  %vm1670_vm13 = vweird.f32 %v6403_v14 }
 0x326   : > { %v1682_v24 = vsub.f32 1.0, %v1681_v19  ;;  %v1666_v41 = vmul.f32 %v4853_v33, %v6403_v14  ;;  %vm1671_vm10 = vweird.f32 %v4853_v33  ;;  %vm1717_vm11 = vmor %vm1715_vm6, %vm1716_vm9  ;;  %v1677_v17 = vor.u32 1.1754944e-38, %v1676_v52 }
 0x327   : > { %v1698_v28 = vmul.f32 %v4847_v15, %v1697_v20  ;;  %v1712_v39 = vsub.f32 1.0, %v1711_v32  ;;  %vm1675_vm15 = vcmp.eq.f32.partialorder %v1674_v51, 8.507059e+37  ;;  %v1773_v13 = vmul.f32 1.442695, %v1767_v7 }
 0x328   : > { %v1683_v31 = vmul.f32 %v4849_v16, %v1682_v24  ;;  %v1667_v48 = vsub.f32 1.0, %v1666_v41  ;;  %v1765_v32 = vmul.f32 %v1761_v22, %v6397_v6  ;;  %vm1786_vm6 = vcmp.ge.f32.partialorder %v6379_v59, 0.0 }
 0x329   : > { %v1699_v35 = vadd.f32 %v4847_v15, %v1698_v28  ;;  %v1713_v47 = vmul.f32 %v4851_v27, %v1712_v39  ;;  %4854 = vpow2.f32 %v1773_v13  ;;  %v1648_v59 = vmul.f32 0.5, %v6371_v63 }
 0x32a   : > { %v1684_v38 = vadd.f32 %v4849_v16, %v1683_v31  ;;  %v1668_v56 = vmul.f32 %v4853_v33, %v1667_v48  ;;  %vm1190_vm9 = vcmask 326656  }
 0x32b   : > { %v1703_v42 = vsel %vm1702_vm7, %v4847_v15, %v1699_v35  ;;  %v1714_v54 = vadd.f32 %v4851_v27, %v1713_v47  ;;  %v1766_v15 = vmul.f32 %v1762_v25, %v6391_v3  ;;  %v1768_v3 = vmul.f32 %v1764_v26, %v6394_v4 }
 0x32c   : > { %v1708_v45 = vsel %vm6409_vm14, %v1707_v36, %v1703_v42  ;;  %v1688_v46 = vsel %vm1687_vm8, %v4849_v16, %v1684_v38  ;;  %v1669_v11 = vadd.f32 %v4853_v33, %v1668_v56  ;;  %vm1672_vm14 = vmor %vm1670_vm13, %vm1671_vm10  ;;  %vm1788_vm7 = vcmp.ge.f32.partialorder %v6382_v60, 0.0 }
 0x32d   : > { %v1727_v49 = vmul.f32 1.0614054, %v1708_v45  ;;  %v1693_v50 = vsel %vm6413_vm5, %v1692_v43, %v1688_v46  ;;  %v1718_v10 = vsel %vm1717_vm11, %v4851_v27, %v1714_v54  ;;  %v1771_v14 = vmul.f32 1.442695, %v1766_v15 }
 0x32e   : > { %v1726_v53 = vmul.f32 1.0614054, %v1693_v50  ;;  %v1723_v16 = vsel %vm1720_vm12, %v1722_v8, %v1718_v10  ;;  %v1673_v20 = vsel %vm1672_vm14, %v4853_v33, %v1669_v11  ;;  %v1775_v38 = vmul.f32 1.442695, %v1768_v3 }
 0x32f   : > { %v4561_v57 = vadd.f32 -1.4531521, %v1727_v49  ;;  %v1728_v19 = vmul.f32 1.0614054, %v1723_v16  ;;  %v1678_v21 = vsel %vm1675_vm15, %v1677_v17, %v1673_v20  ;;  %4856 = vpow2.f32 %v1771_v14  ;;  %v4855_v47 = vpop.eup %4854 }
 0x330   : > { %v4560_v9 = vadd.f32 -1.4531521, %v1726_v53  ;;  %v1725_v27 = vmul.f32 1.0614054, %v1678_v21  ;;  %v1769_v43 = vmul.f32 1.442695, %v1765_v32  ;;  %4858 = vpow2.f32 %v1775_v38 }
 0x331   : > { %v1735_v12 = vmul.f32 %v4561_v57, %v1708_v45  ;;  %v4562_v24 = vadd.f32 -1.4531521, %v1728_v19  ;;  %vm1787_vm5 = vcmp.ge.f32.partialorder %v6376_v58, 0.0  ;;  %v1647_v17 = vmul.f32 0.5, %v6367_v61  ;;  %v1263_v32 = vld [vmem:[#allocation14 + $0x18] sm:$0xff]  ;;  %v1186_v38 = vld [vmem:[#allocation3] sm:$0xff] }
 0x332   : > { %v1734_v18 = vmul.f32 %v4560_v9, %v1693_v50  ;;  %v4559_v30 = vadd.f32 -1.4531521, %v1725_v27  ;;  %4860 = vpow2.f32 %v1769_v43  ;;  %vm1785_vm8 = vcmp.ge.f32.partialorder %v6385_v1, 0.0  ;;  %4551 = vmatmul.msk.f32.vlgmr.msra.gmra.mxu0 %vm1190_vm9, %v1186_v38 }
 0x333   : > { %v1739_v2 = vadd.f32 1.4214138, %v1735_v12  ;;  %v1736_v29 = vmul.f32 %v4562_v24, %v1723_v16  ;;  %v1645_v3 = vmul.f32 0.5, %v6373_v0  ;;  %vm1942_vm10 = vcmask 261120  }
 0x334   : > { %v1738_v23 = vadd.f32 1.4214138, %v1734_v18  ;;  %v1733_v36 = vmul.f32 %v4559_v30, %v1678_v21  ;;  %v1260_v30 = vld [vmem:[#allocation14] sm:$0xff] }
 0x335   : > { %v1743_v28 = vmul.f32 %v1739_v2, %v1708_v45  ;;  %v1740_v35 = vadd.f32 1.4214138, %v1736_v29  ;;  %v4857_v51 = vpop.eup %4856 }
 0x336   : > { %v1742_v25 = vmul.f32 %v1738_v23, %v1693_v50  ;;  %v1737_v41 = vadd.f32 1.4214138, %v1733_v36  ;;  %v4859_v10 = vpop.eup %4858 }
 0x337   : > { %v4565_v31 = vadd.f32 -0.28449672, %v1743_v28  ;;  %v1744_v40 = vmul.f32 %v1740_v35, %v1723_v16 }
 0x338   : > { %v4564_v33 = vadd.f32 -0.28449672, %v1742_v25  ;;  %v1741_v26 = vmul.f32 %v1737_v41, %v1678_v21  ;;  %v1187_v41 = vld [vmem:[#allocation3 + $0x8] sm:$0xff] }
 0x339   : > { %v1751_v37 = vmul.f32 %v4565_v31, %v1708_v45  ;;  %v4566_v4 = vadd.f32 -0.28449672, %v1744_v40  ;;  %v1261_v31 = vld [vmem:[#allocation14 + $0x8] sm:$0xff] }
 0x33a   : > { %v1750_v39 = vmul.f32 %v4564_v33, %v1693_v50  ;;  %v4563_v49 = vadd.f32 -0.28449672, %v1741_v26  ;;  %v1262_v33 = vld [vmem:[#allocation14 + $0x10] sm:$0xff]  ;;  %4552 = vmatmul.msk.f32.gmra.mxu0 %vm1190_vm9, %v1187_v41 }
 0x33b   : > { %v1755_v42 = vadd.f32 0.2548296, %v1751_v37  ;;  %v1752_v6 = vmul.f32 %v4566_v4, %v1723_v16  ;;  %v1188_v26 = vld [vmem:[#allocation3 + $0x10] sm:$0xff] }
 0x33c   : > { %v1754_v44 = vadd.f32 0.2548296, %v1750_v39  ;;  %v1749_v56 = vmul.f32 %v4563_v49, %v1678_v21 }
 0x33d   : > { %v1759_v46 = vmul.f32 %v1755_v42, %v1708_v45  ;;  %v1756_v54 = vadd.f32 0.2548296, %v1752_v6 }
 0x33e   : > { %v1758_v48 = vmul.f32 %v1754_v44, %v1693_v50  ;;  %v1753_v9 = vadd.f32 0.2548296, %v1749_v56  ;;  %v4861_v50 = vpop.eup %4860 }
 0x33f   : > { %v1779_v52 = vmul.f32 %v4855_v47, %v1759_v46  ;;  %v1760_v8 = vmul.f32 %v1756_v54, %v1723_v16  ;;  %v1646_v16 = vmul.f32 0.5, %v6369_v62 }
 0x340   : > { %v1778_v53 = vmul.f32 %v4857_v51, %v1758_v48  ;;  %v1757_v15 = vmul.f32 %v1753_v9, %v1678_v21 }
 0x341   : > { %v1783_v57 = vsub.f32 1.0, %v1779_v52  ;;  %v1780_v12 = vmul.f32 %v4859_v10, %v1760_v8  ;;  %v1189_v52 = vld [vmem:[#allocation3 + $0x18] sm:$0xff] }
 0x342   : > { %v1782_v7 = vsub.f32 1.0, %v1778_v53  ;;  %v1777_v13 = vmul.f32 %v4861_v50, %v1757_v15  ;;  %4553 = vmatmul.msk.f32.gmra.mxu0 %vm1190_vm9, %v1188_v26 }
 0x343   : > { %v1791_v11 = vsub.f32 0.0, %v1783_v57  ;;  %v1784_v2 = vsub.f32 1.0, %v1780_v12 }
 0x344   : > { %v1790_v45 = vsub.f32 0.0, %v1782_v7  ;;  %v1781_v27 = vsub.f32 1.0, %v1777_v13  ;;  %v1253_v13 = vld [vmem:[#allocation12 + $0x8] sm:$0xff] }
 0x345   : > { %v1795_v18 = vsel %vm1787_vm5, %v1783_v57, %v1791_v11  ;;  %v1792_v24 = vsub.f32 0.0, %v1784_v2 }
 0x346   : > { %v1799_v19 = vadd.f32 1.0, %v1795_v18  ;;  %v1794_v20 = vsel %vm1786_vm6, %v1782_v7, %v1790_v45  ;;  %v1789_v61 = vsub.f32 0.0, %v1781_v27  ;;  %v1252_v18 = vld [vmem:[#allocation12] sm:$0xff] }
 0x347   : > { %v1798_v22 = vadd.f32 1.0, %v1794_v20  ;;  %v1796_v21 = vsel %vm1788_vm7, %v1784_v2, %v1792_v24  ;;  %v1254_v2 = vld [vmem:[#allocation12 + $0x10] sm:$0xff] }
 0x348   : > { %v1803_v23 = vmul.f32 %v1799_v19, %v1647_v17  ;;  %v1800_v28 = vadd.f32 1.0, %v1796_v21  ;;  %v1793_v62 = vsel %vm1785_vm8, %v1781_v27, %v1789_v61  ;;  %v1258_v24 = vld [vmem:[#allocation12 + $0x30] sm:$0xff]  ;;  %v1257_v27 = vld [vmem:[#allocation12 + $0x28] sm:$0xff] }
 0x349   : > { %v1802_v58 = vmul.f32 %v1798_v22, %v1646_v16  ;;  %v1797_v60 = vadd.f32 1.0, %v1793_v62  ;;  %v1256_v22 = vld [vmem:[#allocation12 + $0x20] sm:$0xff] }
 0x34a   : > { %1868 = vst.msk [vmem:[#allocation2 + $0x50] sm:$0xff] %vm1272_vm0, %v1803_v23  ;;  %1874 = vrot.lane.b32.xlu0 %v1803_v23, %s5698_s27  ;;  %v1804_v14 = vmul.f32 %v1800_v28, %v1648_v59  ;;  %4554 = vmatmul.msk.f32.gmra.mxu0 %vm1190_vm9, %v1189_v52 }
 0x34b   : > { %1867 = vst.msk [vmem:[#allocation2 + $0x48] sm:$0xff] %vm1272_vm0, %v1802_v58  ;;  %1872 = vrot.lane.b32.xlu2 %v1802_v58, %s5698_s27  ;;  %v1801_v25 = vmul.f32 %v1797_v60, %v1645_v3 }
 0x34c   : > { %1869 = vst.msk [vmem:[#allocation2 + $0x58] sm:$0xff] %vm1272_vm0, %v1804_v14  ;;  %1876 = vrot.lane.b32.xlu1 %v1804_v14, %s5698_s27 }
 0x34d   : > { %1866 = vst.msk [vmem:[#allocation2 + $0x40] sm:$0xff] %vm1272_vm0, %v1801_v25 }
 0x351   : > { %v6451_v29 = vld [vmem:[#allocation2 + $0x50] sm:$0xff] }
 0x352   : > { %1856 = vrot.lane.b32.xlu0 %v1804_v14, %s5699_s2  ;;  %2350 = vst.msk [vmem:[#allocation2 + $0x50] sm:$0xff] %vm1272_vm0, %v5701_v5  ;;  %v6456_v63 = vld [vmem:[#allocation2 + $0x48] sm:$0xff] }
 0x353   : > { %1854 = vrot.lane.b32.xlu2 %v1803_v23, %s5699_s2  ;;  %2349 = vst.msk [vmem:[#allocation2 + $0x48] sm:$0xff] %vm1272_vm0, %v5701_v5  ;;  %v6461_v0 = vld [vmem:[#allocation2 + $0x58] sm:$0xff] }
 0x354   : > { %1870 = vrot.lane.b32.xlu1 %v1801_v25, %s5698_s27  ;;  %2351 = vst.msk [vmem:[#allocation2 + $0x58] sm:$0xff] %vm1272_vm0, %v5701_v5  ;;  %v6466_v1 = vld [vmem:[#allocation2 + $0x40] sm:$0xff] }
 0x355   : > { %2348 = vst.msk [vmem:[#allocation2 + $0x40] sm:$0xff] %vm1272_vm0, %v5701_v5 }
 0x35a   : > { %1850 = vrot.lane.b32.xlu0 %v1801_v25, %s5699_s2 }
 0x35b   : > { %1840 = vrot.lane.b32.xlu2 %v1804_v14, %s5702_s5 }
 0x35c   : > { %1852 = vrot.lane.b32.xlu1 %v1802_v58, %s5699_s2 }
 0x362   : > { %1836 = vrot.lane.b32.xlu0 %v1802_v58, %s5702_s5 }
 0x363   : > { %1834 = vrot.lane.b32.xlu2 %v1801_v25, %s5702_s5 }
 0x364   : > { %1838 = vrot.lane.b32.xlu1 %v1803_v23, %s5702_s5 }
 0x36a   : > { %1890 = vrot.lane.b32.xlu0 %v1803_v23, %s5700_s3  ;;  %v1255_v23 = vld [vmem:[#allocation12 + $0x18] sm:$0xff] }
 0x36b   : > { %1888 = vrot.lane.b32.xlu2 %v1802_v58, %s5700_s3  ;;  %v1259_v58 = vld [vmem:[#allocation12 + $0x38] sm:$0xff] }
 0x36c   : > { %1892 = vrot.lane.b32.xlu1 %v1804_v14, %s5700_s3 }
 0x372   : > { %1924 = vperm.xlu0 %4838, %v1260_v30  }
 0x373   : > { %1929 = vperm.xlu2 %4837, %v1261_v31  }
 0x374   : > { %1886 = vrot.lane.b32.xlu1 %v1801_v25, %s5700_s3 }
 0x37a   : > { %1939 = vperm.xlu0 %4838, %v1263_v32  }
 0x37c   : > { %1934 = vperm.xlu1 %4839, %v1262_v33  }
 0x3a5   : > { %v1873_v35 = vpop.permute.xlu2 %1872 }
 0x3a6   : > { %1883 = vst.msk [vmem:[#allocation2 + $0x68] sm:$0xff] %vm1365_vm3, %v1873_v35 }
 0x3ad   : > { %v1855_v36 = vpop.permute.xlu2 %1854  ;;  %v1915_v37 = vld [vmem:[#allocation2 + $0x68] sm:$0xff] }
 0x3ae   : > { %1864 = vst.msk [vmem:[#allocation2 + $0x30] sm:$0xff] %vm1339_vm1, %v1855_v36 }
 0x3af   : > { %2353 = vst.msk [vmem:[#allocation2 + $0x68] sm:$0xff] %vm1272_vm0, %v5701_v5  ;;  %v6540_v21 = vpop.f32.mrf.mxu0 }
 0x3b5   : > { %v1841_v39 = vpop.permute.xlu2 %1840  ;;  %v1908_v40 = vld [vmem:[#allocation2 + $0x30] sm:$0xff] }
 0x3b6   : > { %1849 = vst.msk [vmem:[#allocation2 + $0x18] sm:$0xff] %vm1318_vm4, %v1841_v39 }
 0x3b7   : > { %2346 = vst.msk [vmem:[#allocation2 + $0x30] sm:$0xff] %vm1272_vm0, %v5701_v5  ;;  %v6542_v61 = vpop.f32.mrf.mxu0 }
 0x3bc   : > { %v1875_v42 = vpop.permute.xlu0 %1874 }
 0x3bd   : > { %1884 = vst.msk [vmem:[#allocation2 + $0x70] sm:$0xff] %vm1365_vm3, %v1875_v42  ;;  %v1835_v43 = vpop.permute.xlu2 %1834  ;;  %v1905_v44 = vld [vmem:[#allocation2 + $0x18] sm:$0xff] }
 0x3be   : > { %1846 = vst.msk [vmem:[#allocation2] sm:$0xff] %vm1318_vm4, %v1835_v43  ;;  %v1877_v4 = vpop.permute.xlu1 %1876 }
 0x3bf   : > { %2343 = vst.msk [vmem:[#allocation2 + $0x18] sm:$0xff] %vm1272_vm0, %v5701_v5  ;;  %v6544_v59 = vpop.f32.mrf.mxu0 }
 0x3c0   : > { %1885 = vst.msk [vmem:[#allocation2 + $0x78] sm:$0xff] %vm1365_vm3, %v1877_v4 }
 0x3c4   : > { %v1857_v46 = vpop.permute.xlu0 %1856  ;;  %v1916_v48 = vld [vmem:[#allocation2 + $0x70] sm:$0xff] }
 0x3c5   : > { %1865 = vst.msk [vmem:[#allocation2 + $0x38] sm:$0xff] %vm1339_vm1, %v1857_v46  ;;  %v1889_v47 = vpop.permute.xlu2 %1888  ;;  %v1902_v6 = vld [vmem:[#allocation2] sm:$0xff] }
 0x3c6   : > { %1899 = vst.msk [vmem:[#allocation2 + $0x88] sm:$0xff] %vm1386_vm2, %v1889_v47  ;;  %v1871_v49 = vpop.permute.xlu1 %1870 }
 0x3c7   : > { %2354 = vst.msk [vmem:[#allocation2 + $0x70] sm:$0xff] %vm1272_vm0, %v5701_v5  ;;  %v1917_v51 = vld [vmem:[#allocation2 + $0x78] sm:$0xff]  ;;  %v6546_v28 = vpop.f32.mrf.mxu0 }
 0x3c8   : > { %2340 = vst.msk [vmem:[#allocation2] sm:$0xff] %vm1272_vm0, %v5701_v5  ;;  %1955 = vmatpush.msra.mxu3 %v1917_v51 }
 0x3c9   : > { %1882 = vst.msk [vmem:[#allocation2 + $0x60] sm:$0xff] %vm1365_vm3, %v1871_v49 }
 0x3ca   : > { %2355 = vst.msk [vmem:[#allocation2 + $0x78] sm:$0xff] %vm1272_vm0, %v5701_v5  ;;  %1956 = vmatpush.msra.mxu3 %v1916_v48 }
 0x3cc   : > { %v1851_v53 = vpop.permute.xlu0 %1850  ;;  %v1909_v54 = vld [vmem:[#allocation2 + $0x38] sm:$0xff]  ;;  %1957 = vmatpush.msra.mxu3 %v1915_v37 }
 0x3cd   : > { %1862 = vst.msk [vmem:[#allocation2 + $0x20] sm:$0xff] %vm1339_vm1, %v1851_v53  ;;  %v1919_v56 = vld [vmem:[#allocation2 + $0x88] sm:$0xff] }
 0x3ce   : > { %2347 = vst.msk [vmem:[#allocation2 + $0x38] sm:$0xff] %vm1272_vm0, %v5701_v5  ;;  %v1853_v57 = vpop.permute.xlu1 %1852 }
 0x3cf   : > { %2357 = vst.msk [vmem:[#allocation2 + $0x88] sm:$0xff] %vm1272_vm0, %v5701_v5 }
 0x3d0   : > { %v1914_v7 = vld [vmem:[#allocation2 + $0x60] sm:$0xff]  ;;  %1863 = vst.msk [vmem:[#allocation2 + $0x28] sm:$0xff] %vm1339_vm1, %v1853_v57 }
 0x3d1   : > { %1958 = vmatpush.msra.mxu3 %v1914_v7  ;;  %2352 = vst.msk [vmem:[#allocation2 + $0x60] sm:$0xff] %vm1272_vm0, %v5701_v5 }
 0x3d3   : > { %1959 = vmatpush.msra.mxu3 %v6461_v0 }
 0x3d4   : > { %v1837_v8 = vpop.permute.xlu0 %1836  ;;  %v1906_v9 = vld [vmem:[#allocation2 + $0x20] sm:$0xff] }
 0x3d5   : > { %1847 = vst.msk [vmem:[#allocation2 + $0x8] sm:$0xff] %vm1318_vm4, %v1837_v8  ;;  %1960 = vmatpush.msra.mxu3 %v6451_v29 }
 0x3d6   : > { %2344 = vst.msk [vmem:[#allocation2 + $0x20] sm:$0xff] %vm1272_vm0, %v5701_v5  ;;  %v1839_v10 = vpop.permute.xlu1 %1838 }
 0x3d7   : > { %1961 = vmatpush.msra.mxu3 %v6456_v63  ;;  %1848 = vst.msk [vmem:[#allocation2 + $0x10] sm:$0xff] %vm1318_vm4, %v1839_v10  ;;  %v1907_v11 = vld [vmem:[#allocation2 + $0x28] sm:$0xff]  ;;  %v1930_v63 = vpop.permute.xlu2 %1929 }
 0x3d8   : > { %2345 = vst.msk [vmem:[#allocation2 + $0x28] sm:$0xff] %vm1272_vm0, %v5701_v5 }
 0x3d9   : > { %1962 = vmatpush.msra.mxu3 %v6466_v1 }
 0x3db   : > { %1963 = vmatpush.msra.mxu3 %v1909_v54 }
 0x3dc   : > { %v1891_v45 = vpop.permute.xlu0 %1890  ;;  %v1903_v12 = vld [vmem:[#allocation2 + $0x8] sm:$0xff] }
 0x3dd   : > { %1900 = vst.msk [vmem:[#allocation2 + $0x90] sm:$0xff] %vm1386_vm2, %v1891_v45  ;;  %1964 = vmatpush.msra.mxu3 %v1908_v40 }
 0x3de   : > { %2341 = vst.msk [vmem:[#allocation2 + $0x8] sm:$0xff] %vm1272_vm0, %v5701_v5  ;;  %v1893_v15 = vpop.permute.xlu1 %1892  ;;  %v1904_v50 = vld [vmem:[#allocation2 + $0x10] sm:$0xff] }
 0x3df   : > { %1965 = vmatpush.msra.mxu3 %v1907_v11  ;;  %1901 = vst.msk [vmem:[#allocation2 + $0x98] sm:$0xff] %vm1386_vm2, %v1893_v15 }
 0x3e0   : > { %2342 = vst.msk [vmem:[#allocation2 + $0x10] sm:$0xff] %vm1272_vm0, %v5701_v5 }
 0x3e1   : > { %1966 = vmatpush.msra.mxu3 %v1906_v9 }
 0x3e3   : > { %1967 = vmatpush.msra.mxu3 %v1905_v44 }
 0x3e4   : > { %v1920_v17 = vld [vmem:[#allocation2 + $0x90] sm:$0xff]  ;;  %v1925_v62 = vpop.permute.xlu0 %1924 }
 0x3e5   : > { %2358 = vst.msk [vmem:[#allocation2 + $0x90] sm:$0xff] %vm1272_vm0, %v5701_v5  ;;  %1968 = vmatpush.msra.mxu3 %v1904_v50 }
 0x3e6   : > { %v1887_v19 = vpop.permute.xlu1 %1886  ;;  %v1921_v20 = vld [vmem:[#allocation2 + $0x98] sm:$0xff] }
 0x3e7   : > { %1969 = vmatpush.msra.mxu3 %v1903_v12  ;;  %1898 = vst.msk [vmem:[#allocation2 + $0x80] sm:$0xff] %vm1386_vm2, %v1887_v19  ;;  %1996 = vmatpush.msrb.mxu0 %v1921_v20 }
 0x3e8   : > { %2359 = vst.msk [vmem:[#allocation2 + $0x98] sm:$0xff] %vm1272_vm0, %v5701_v5 }
 0x3e9   : > { %1970 = vmatpush.msra.mxu3 %v1902_v6  ;;  %1997 = vmatpush.msrb.mxu0 %v1920_v17 }
 0x3ea   : > { %1971 = vmatmul.f32.vlgmr.msra.gmra.mxu3 %v1252_v18 }
 0x3eb   : > { %1998 = vmatpush.msrb.mxu0 %v1919_v56 }
 0x3ec   : > { %v1940_v40 = vpop.permute.xlu0 %1939 }
 0x3ee   : > { %v1918_v16 = vld [vmem:[#allocation2 + $0x80] sm:$0xff]  ;;  %v1935_v33 = vpop.permute.xlu1 %1934 }
 0x3ef   : > { %1999 = vmatpush.msrb.mxu0 %v1918_v16  ;;  %2356 = vst.msk [vmem:[#allocation2 + $0x80] sm:$0xff] %vm1272_vm0, %v5701_v5 }
 0x3f0   : > { %4567 = vmatmul.msk.f32.vlgmr.msrb.gmra.mxu0 %vm1942_vm10, %v1253_v13 }
 0x3f2   : > { %1974 = vmatmul.f32.gmra.mxu3 %v1254_v2 }
 0x3f8   : > { %4568 = vmatmul.msk.f32.gmra.mxu0 %vm1942_vm10, %v1255_v23 }
 0x3fa   : > { %1977 = vmatmul.f32.gmra.mxu3 %v1256_v22 }
 0x400   : > { %4569 = vmatmul.msk.f32.gmra.mxu0 %vm1942_vm10, %v1257_v27  ;;  %v1266_v27 = vld [vmem:[#allocation15 + $0x10] sm:$0xff] }
 0x402   : > { %1980 = vmatmul.f32.gmra.mxu3 %v1258_v24  ;;  %v1267_v24 = vld [vmem:[#allocation15 + $0x18] sm:$0xff] }
 0x408   : > { %4570 = vmatmul.msk.f32.gmra.mxu0 %vm1942_vm10, %v1259_v58  ;;  %v1265_v58 = vld [vmem:[#allocation15 + $0x8] sm:$0xff] }
 0x46d   : > { %v1972_v14 = vpop.f32.mrf.mxu3  ;;  %v2001_v60 = vpop.f32.mrf.mxu0 }
 0x46e   : > { %v1973_v3 = vadd.f32 %v1972_v14, %v1925_v62  ;;  %v1270_v62 = vld [vmem:[#allocation17 + $0x10] sm:$0xff]  ;;  %v1271_v14 = vld [vmem:[#allocation17 + $0x18] sm:$0xff] }
 0x470   : > { %v2002_v25 = vadd.f32 %v2001_v60, %v1973_v3  ;;  %v1264_v3 = vld [vmem:[#allocation15] sm:$0xff] }
 0x471   : > { %v1268_v60 = vld [vmem:[#allocation17] sm:$0xff] }
 0x472   : > { %v2013_v29 = vsel %vm1272_vm0, %v2002_v25, 0.0 }
 0x473   : > { %2014 = vadd.xlane.f32.xlu2 %v2013_v29 }
 0x475   : > { %v1975_v0 = vpop.f32.mrf.mxu3  ;;  %v2004_v30 = vpop.f32.mrf.mxu0 }
 0x476   : > { %v1976_v1 = vadd.f32 %v1975_v0, %v1930_v63 }
 0x478   : > { %v2005_v31 = vadd.f32 %v2004_v30, %v1976_v1 }
 0x47a   : > { %v2016_v32 = vsel %vm1272_vm0, %v2005_v31, 0.0 }
 0x47b   : > { %2017 = vadd.xlane.f32.xlu1 %v2016_v32 }
 0x47d   : > { %v1978_v35 = vpop.f32.mrf.mxu3  ;;  %v2007_v37 = vpop.f32.mrf.mxu0 }
 0x47e   : > { %v1979_v36 = vadd.f32 %v1978_v35, %v1935_v33 }
 0x480   : > { %v2008_v38 = vadd.f32 %v2007_v37, %v1979_v36 }
 0x482   : > { %v2019_v39 = vsel %vm1272_vm0, %v2008_v38, 0.0 }
 0x483   : > { %2020 = vadd.xlane.f32.xlu0 %v2019_v39 }
 0x485   : > { %v1981_v41 = vpop.f32.mrf.mxu3  ;;  %v2010_v43 = vpop.f32.mrf.mxu0 }
 0x486   : > { %v1982_v42 = vadd.f32 %v1981_v41, %v1940_v40 }
 0x488   : > { %v2011_v44 = vadd.f32 %v2010_v43, %v1982_v42 }
 0x48a   : > { %v2022_v4 = vsel %vm1272_vm0, %v2011_v44, 0.0 }
 0x48b   : > { %2023 = vadd.xlane.f32.xlu2 %v2022_v4 }
 0x4e6   : > { %v2015_v26 = vpop.xlane.xlu2 %2014 }
 0x4e7   : > { %v2025_v6 = vmul.f32 %v2015_v26, %v6333_v34 }
 0x4ee   : > { %v2018_v46 = vpop.xlane.xlu1 %2017 }
 0x4ef   : > { %v2026_v48 = vmul.f32 %v2018_v46, %v6333_v34 }
 0x4f1   : > { %v2029_v51 = vadd.f32 %v2026_v48, %v2025_v6 }
 0x4f6   : > { %v2021_v47 = vpop.xlane.xlu0 %2020 }
 0x4f7   : > { %v2027_v49 = vmul.f32 %v2021_v47, %v6333_v34 }
 0x4f9   : > { %v2030_v53 = vadd.f32 %v2029_v51, %v2027_v49 }
 0x4fe   : > { %v2024_v52 = vpop.xlane.xlu2 %2023 }
 0x4ff   : > { %v2028_v54 = vmul.f32 %v2024_v52, %v6333_v34 }
 0x501   : > { %v2031_v56 = vadd.f32 %v2030_v53, %v2028_v54 }
 0x503   : > { %v2032_v57 = vrot.slane %v2031_v56, 4 }
 0x505   : > { %v2033_v7 = vadd.f32 %v2032_v57, %v2031_v56 }
 0x507   : > { %v2034_v8 = vrot.slane %v2033_v7, 2 }
 0x509   : > { %v2035_v9 = vadd.f32 %v2034_v8, %v2033_v7 }
 0x50b   : > { %v2036_v10 = vrot.slane %v2035_v9, 1 }
 0x50d   : > { %v2037_v11 = vadd.f32 %v2036_v10, %v2035_v9 }
 0x50f   : > { %v2038_v45 = vmul.f32 %v2037_v11, %v6339_v55 }
 0x511   : > { %v6557_v12 = vsub.f32 %v2008_v38, %v2038_v45  ;;  %v6559_v15 = vsub.f32 %v2005_v31, %v2038_v45  ;;  %v6561_v50 = vsub.f32 %v2002_v25, %v2038_v45  ;;  %v2042_v16 = vsub.f32 %v2011_v44, %v2038_v45  ;;  %v1269_v25 = vld [vmem:[#allocation17 + $0x8] sm:$0xff] }
 0x513   : > { %v2045_v17 = vmul.f32 %v6557_v12, %v6557_v12  ;;  %v2044_v18 = vmul.f32 %v6559_v15, %v6559_v15  ;;  %v2043_v19 = vmul.f32 %v6561_v50, %v6561_v50  ;;  %v2046_v22 = vmul.f32 %v2042_v16, %v2042_v16 }
 0x515   : > { %v2053_v20 = vsel %vm1272_vm0, %v2045_v17, 0.0  ;;  %v2050_v2 = vsel %vm1272_vm0, %v2044_v18, 0.0  ;;  %v2047_v13 = vsel %vm1272_vm0, %v2043_v19, 0.0  ;;  %v2056_v23 = vsel %vm1272_vm0, %v2046_v22, 0.0 }
 0x516   : > { %2054 = vadd.xlane.f32.xlu2 %v2053_v20  ;;  %2051 = vadd.xlane.f32.xlu0 %v2050_v2 }
 0x517   : > { %2048 = vadd.xlane.f32.xlu1 %v2047_v13 }
 0x51f   : > { %2057 = vadd.xlane.f32.xlu1 %v2056_v23 }
 0x52a   : > { %2105 = vperm.xlu0 %4838, %v1267_v24  }
 0x52e   : > { %2100 = vperm.xlu2 %4837, %v1266_v27  }
 0x532   : > { %2095 = vperm.xlu0 %4838, %v1265_v58  }
 0x536   : > { %2124 = vperm.xlu2 %4837, %v1270_v62  }
 0x538   : > { %2129 = vperm.xlu1 %4839, %v1271_v14  }
 0x53a   : > { %2090 = vperm.xlu0 %4838, %v1264_v3  }
 0x53e   : > { %2114 = vperm.xlu2 %4837, %v1268_v60  }
 0x540   : > { %2119 = vperm.xlu1 %4839, %v1269_v25  }
 0x589   : > { %v2052_v29 = vpop.xlane.xlu0 %2051  ;;  %v2055_v30 = vpop.xlane.xlu2 %2054 }
 0x58a   : > { %v2049_v63 = vpop.xlane.xlu1 %2048  ;;  %v2060_v0 = vmul.f32 %v2052_v29, %v6333_v34  ;;  %v2061_v32 = vmul.f32 %v2055_v30, %v6333_v34 }
 0x58b   : > { %v2059_v1 = vmul.f32 %v2049_v63, %v6333_v34 }
 0x58d   : > { %v2063_v31 = vadd.f32 %v2060_v0, %v2059_v1 }
 0x58f   : > { %v2064_v35 = vadd.f32 %v2063_v31, %v2061_v32 }
 0x591   : > { %v2101_v46 = vpop.permute.xlu2 %2100 }
 0x592   : > { %v2058_v33 = vpop.xlane.xlu1 %2057 }
 0x593   : > { %v2062_v36 = vmul.f32 %v2058_v33, %v6333_v34 }
 0x595   : > { %v2065_v37 = vadd.f32 %v2064_v35, %v2062_v36 }
 0x597   : > { %v2066_v38 = vrot.slane %v2065_v37, 4 }
 0x599   : > { %v2067_v39 = vadd.f32 %v2066_v38, %v2065_v37  ;;  %v2125_v51 = vpop.permute.xlu2 %2124 }
 0x59b   : > { %v2068_v40 = vrot.slane %v2067_v39, 2 }
 0x59c   : > { %v2106_v26 = vpop.permute.xlu0 %2105 }
 0x59d   : > { %v2069_v41 = vadd.f32 %v2068_v40, %v2067_v39 }
 0x59f   : > { %v2070_v42 = vrot.slane %v2069_v41, 1 }
 0x5a1   : > { %v2071_v43 = vadd.f32 %v2070_v42, %v2069_v41  ;;  %v2115_v20 = vpop.permute.xlu2 %2114 }
 0x5a3   : > { %v2072_v44 = vmul.f32 %v2071_v43, %v6339_v55 }
 0x5a4   : > { %v2096_v49 = vpop.permute.xlu0 %2095 }
 0x5a5   : > { %v2073_v4 = vadd.f32 1e-05, %v2072_v44 }
 0x5a7   : > { %4862 = vrsqrt.f32 %v2073_v4  ;;  %vm2080_vm12 = vweird.f32 %v2073_v4 }
 0x5aa   : > { %v2130_v53 = vpop.permute.xlu1 %2129 }
 0x5ac   : > { %v2091_v11 = vpop.permute.xlu0 %2090 }
 0x5ad   : > { %v4863_v47 = vpop.eup %4862 }
 0x5ae   : > { %v2075_v48 = vmul.f32 %v4863_v47, %v2073_v4  ;;  %vm2081_vm11 = vweird.f32 %v4863_v47 }
 0x5af   : > { %vm2082_vm13 = vmor %vm2080_vm12, %vm2081_vm11 }
 0x5b0   : > { %v2076_v6 = vmul.f32 %v4863_v47, %v2075_v48 }
 0x5b2   : > { %v2077_v52 = vmul.f32 0.5, %v2076_v6  ;;  %v2120_v2 = vpop.permute.xlu1 %2119 }
 0x5b4   : > { %v2078_v54 = vsub.f32 1.5, %v2077_v52 }
 0x5b6   : > { %v2079_v56 = vmul.f32 %v4863_v47, %v2078_v54 }
 0x5b8   : > { %v2083_v57 = vsel %vm2082_vm13, %v4863_v47, %v2079_v56 }
 0x5b9   : > { %v2086_v7 = vmul.f32 %v2083_v57, %v6557_v12  ;;  %v2087_v8 = vmul.f32 %v2083_v57, %v2042_v16  ;;  %v2085_v9 = vmul.f32 %v2083_v57, %v6559_v15  ;;  %v2084_v10 = vmul.f32 %v2083_v57, %v6561_v50 }
 0x5bb   : > { %v2110_v45 = vmul.f32 %v2101_v46, %v2086_v7  ;;  %v2111_v17 = vmul.f32 %v2106_v26, %v2087_v8  ;;  %v2109_v18 = vmul.f32 %v2096_v49, %v2085_v9  ;;  %v2108_v19 = vmul.f32 %v2091_v11, %v2084_v10 }
 0x5bd   : > { %v6581_v13 = vadd.f32 %v2125_v51, %v2110_v45  ;;  %v6583_v22 = vadd.f32 %v2130_v53, %v2111_v17  ;;  %v6585_v23 = vadd.f32 %v2115_v20, %v2108_v19  ;;  %v6587_v24 = vadd.f32 %v2120_v2, %v2109_v18 }
 0x5bf   : > { %v6590_v12 = vmul.f32 0.70710677, %v6581_v13  ;;  %v6593_v15 = vmul.f32 0.70710677, %v6583_v22  ;;  %v6596_v50 = vmul.f32 0.70710677, %v6585_v23 }
 0x5c0   : > { %v6599_v16 = vmul.f32 0.70710677, %v6587_v24 }
 0x5c1   : > { %v6602_v27 = vand.u32 2147483647, %v6590_v12  ;;  %v6605_v58 = vand.u32 2147483647, %v6593_v15  ;;  %v6608_v62 = vand.u32 2147483647, %v6596_v50 }
 0x5c2   : > { %v6611_v14 = vand.u32 2147483647, %v6599_v16 }
 0x5c3   : > { %v2150_v3 = vmul.f32 0.3275911, %v6602_v27  ;;  %v2151_v60 = vmul.f32 0.3275911, %v6605_v58  ;;  %v2148_v25 = vmul.f32 0.3275911, %v6608_v62 }
 0x5c4   : > { %v2149_v0 = vmul.f32 0.3275911, %v6611_v14  ;;  %v2254_v39 = vsub.f32 0.0, %v6602_v27  ;;  %v2255_v42 = vsub.f32 0.0, %v6605_v58  ;;  %v2252_v43 = vsub.f32 0.0, %v6608_v62 }
 0x5c5   : > { %v2154_v29 = vadd.f32 1.0, %v2150_v3  ;;  %v2155_v63 = vadd.f32 1.0, %v2151_v60  ;;  %v2152_v1 = vadd.f32 1.0, %v2148_v25 }
 0x5c6   : > { %v6617_v30 = vadd.f32 1.0, %v2149_v0 }
 0x5c7   : > { %4864 = vrcp.f32 %v2154_v29  ;;  %v2195_v35 = vand.u32 2147483647, %v2154_v29  ;;  %v2197_v38 = vand.u32 2147483648, %v2154_v29  ;;  %v2210_v40 = vand.u32 2147483647, %v2155_v63 }
 0x5c8   : > { %4866 = vrcp.f32 %v2155_v63  ;;  %vm2191_vm14 = vweird.f32 %v2154_v29  ;;  %vm2206_vm5 = vweird.f32 %v2155_v63  ;;  %v2212_v26 = vand.u32 2147483648, %v2155_v63 }
 0x5c9   : > { %4868 = vrcp.f32 %v2152_v1  ;;  %vm6623_vm6 = vcmp.eq.f32.partialorder %v2195_v35, 8.507059e+37  ;;  %v2198_v51 = vor.u32 1.1754944e-38, %v2197_v38  ;;  %vm6627_vm8 = vcmp.eq.f32.partialorder %v2210_v40, 8.507059e+37 }
 0x5ca   : > { %4870 = vrcp.f32 %v6617_v30  ;;  %vm2161_vm9 = vweird.f32 %v2152_v1  ;;  %v2165_v56 = vand.u32 2147483647, %v2152_v1  ;;  %v2213_v8 = vor.u32 1.1754944e-38, %v2212_v26 }
 0x5cb   : > { %v2167_v9 = vand.u32 2147483648, %v2152_v1  ;;  %v2180_v20 = vand.u32 2147483647, %v6617_v30  ;;  %v2182_v2 = vand.u32 2147483648, %v6617_v30  ;;  %v2253_v26 = vsub.f32 0.0, %v6611_v14 }
 0x5cd   : > { %v4865_v31 = vpop.eup %4864  ;;  %v2168_v0 = vor.u32 1.1754944e-38, %v2167_v9  ;;  %v2183_v38 = vor.u32 1.1754944e-38, %v2182_v2 }
 0x5ce   : > { %v4867_v32 = vpop.eup %4866  ;;  %v2187_v33 = vmul.f32 %v4865_v31, %v2154_v29  ;;  %vm2192_vm15 = vweird.f32 %v4865_v31 }
 0x5cf   : > { %v2202_v36 = vmul.f32 %v4867_v32, %v2155_v63  ;;  %v4869_v44 = vpop.eup %4868  ;;  %vm2207_vm7 = vweird.f32 %v4867_v32  ;;  %vm2193_vm11 = vmor %vm2191_vm14, %vm2192_vm15  ;;  %v2258_v63 = vmul.f32 %v2254_v39, %v6602_v27 }
 0x5d0   : > { %v2188_v37 = vsub.f32 1.0, %v2187_v33  ;;  %v2157_v48 = vmul.f32 %v4869_v44, %v2152_v1  ;;  %v4871_v6 = vpop.eup %4870  ;;  %vm2208_vm12 = vmor %vm2206_vm5, %vm2207_vm7  ;;  %vm2162_vm13 = vweird.f32 %v4869_v44  ;;  %vm2166_vm5 = vcmp.eq.f32.partialorder %v2165_v56, 8.507059e+37 }
 0x5d1   : > { %v2203_v41 = vsub.f32 1.0, %v2202_v36  ;;  %v2172_v57 = vmul.f32 %v4871_v6, %v6617_v30  ;;  %vm2177_vm14 = vweird.f32 %v4871_v6  ;;  %vm2163_vm15 = vmor %vm2161_vm9, %vm2162_vm13  ;;  %v2259_v36 = vmul.f32 %v2255_v42, %v6605_v58 }
 0x5d2   : > { %v2189_v4 = vmul.f32 %v4865_v31, %v2188_v37  ;;  %v2158_v54 = vsub.f32 1.0, %v2157_v48  ;;  %v2264_v1 = vmul.f32 1.442695, %v2258_v63  ;;  %v2256_v58 = vmul.f32 %v2252_v43, %v6608_v62 }
 0x5d3   : > { %v2204_v47 = vmul.f32 %v4867_v32, %v2203_v41  ;;  %v2173_v17 = vsub.f32 1.0, %v2172_v57  ;;  %vm2278_vm9 = vcmp.ge.f32.partialorder %v6590_v12, 0.0  ;;  %vm2277_vm13 = vcmp.ge.f32.partialorder %v6599_v16, 0.0 }
 0x5d4   : > { %v2190_v49 = vadd.f32 %v4865_v31, %v2189_v4  ;;  %v2159_v45 = vmul.f32 %v4869_v44, %v2158_v54  ;;  %4872 = vpow2.f32 %v2264_v1 }
 0x5d5   : > { %v2205_v53 = vadd.f32 %v4867_v32, %v2204_v47  ;;  %v2174_v25 = vmul.f32 %v4871_v6, %v2173_v17 }
 0x5d6   : > { %v2194_v7 = vsel %vm2193_vm11, %v4865_v31, %v2190_v49  ;;  %v2160_v60 = vadd.f32 %v4869_v44, %v2159_v45  ;;  %vm2279_vm11 = vcmp.ge.f32.partialorder %v6593_v15, 0.0 }
 0x5d7   : > { %v2199_v10 = vsel %vm6623_vm6, %v2198_v51, %v2194_v7  ;;  %v2209_v11 = vsel %vm2208_vm12, %v4867_v32, %v2205_v53  ;;  %v2175_v33 = vadd.f32 %v4871_v6, %v2174_v25  ;;  %vm2176_vm6 = vweird.f32 %v6617_v30 }
 0x5d8   : > { %v2218_v18 = vmul.f32 1.0614054, %v2199_v10  ;;  %v2214_v19 = vsel %vm6627_vm8, %v2213_v8, %v2209_v11  ;;  %v2164_v32 = vsel %vm2163_vm15, %v4869_v44, %v2160_v60  ;;  %vm2178_vm7 = vmor %vm2176_vm6, %vm2177_vm14  ;;  %vm2181_vm8 = vcmp.eq.f32.partialorder %v2180_v20, 8.507059e+37 }
 0x5d9   : > { %v2219_v3 = vmul.f32 1.0614054, %v2214_v19  ;;  %v2169_v37 = vsel %vm2166_vm5, %v2168_v0, %v2164_v32  ;;  %v2179_v4 = vsel %vm2178_vm7, %v4871_v6, %v2175_v33  ;;  %v2266_v30 = vmul.f32 1.442695, %v2259_v36 }
 0x5da   : > { %v4573_v29 = vadd.f32 -1.4531521, %v2218_v18  ;;  %v2216_v41 = vmul.f32 1.0614054, %v2169_v37  ;;  %v2184_v39 = vsel %vm2181_vm8, %v2183_v38, %v2179_v4  ;;  %v2257_v6 = vmul.f32 %v2253_v26, %v6611_v14  ;;  %v4873_v2 = vpop.eup %4872 }
 0x5db   : > { %v4574_v31 = vadd.f32 -1.4531521, %v2219_v3  ;;  %v2217_v47 = vmul.f32 1.0614054, %v2184_v39  ;;  %4874 = vpow2.f32 %v2266_v30  ;;  %v2260_v7 = vmul.f32 1.442695, %v2256_v58 }
 0x5dc   : > { %v2226_v35 = vmul.f32 %v4573_v29, %v2199_v10  ;;  %v4571_v44 = vadd.f32 -1.4531521, %v2216_v41  ;;  %v2262_v17 = vmul.f32 1.442695, %v2257_v6  ;;  %vm2276_vm12 = vcmp.ge.f32.partialorder %v6596_v50, 0.0 }
 0x5dd   : > { %v2227_v40 = vmul.f32 %v4574_v31, %v2214_v19  ;;  %v4572_v51 = vadd.f32 -1.4531521, %v2217_v47  ;;  %4876 = vpow2.f32 %v2260_v7  ;;  %v2137_v50 = vmul.f32 0.5, %v6587_v24  ;;  %v2310_v7 = vld [vmem:[#allocation18 + $0x10] sm:$0xff] }
 0x5de   : > { %v2230_v27 = vadd.f32 1.4214138, %v2226_v35  ;;  %v2224_v49 = vmul.f32 %v4571_v44, %v2169_v37  ;;  %4878 = vpow2.f32 %v2262_v17 }
 0x5df   : > { %v2231_v46 = vadd.f32 1.4214138, %v2227_v40  ;;  %v2225_v56 = vmul.f32 %v4572_v51, %v2184_v39  ;;  %v2136_v51 = vmul.f32 0.5, %v6585_v23 }
 0x5e0   : > { %v2234_v48 = vmul.f32 %v2230_v27, %v2199_v10  ;;  %v2228_v54 = vadd.f32 1.4214138, %v2224_v49  ;;  %v2138_v27 = vmul.f32 0.5, %v6581_v13 }
 0x5e1   : > { %v2235_v42 = vmul.f32 %v2231_v46, %v2214_v19  ;;  %v2229_v11 = vadd.f32 1.4214138, %v2225_v56  ;;  %v4875_v25 = vpop.eup %4874  ;;  %v2309_v56 = vld [vmem:[#allocation18 + $0x8] sm:$0xff] }
 0x5e2   : > { %v4577_v52 = vadd.f32 -0.28449672, %v2234_v48  ;;  %v2232_v9 = vmul.f32 %v2228_v54, %v2169_v37  ;;  %v2308_v54 = vld [vmem:[#allocation18] sm:$0xff] }
 0x5e3   : > { %v4578_v53 = vadd.f32 -0.28449672, %v2235_v42  ;;  %v2233_v43 = vmul.f32 %v2229_v11, %v2184_v39  ;;  %v4877_v38 = vpop.eup %4876 }
 0x5e4   : > { %v2242_v57 = vmul.f32 %v4577_v52, %v2199_v10  ;;  %v4575_v62 = vadd.f32 -0.28449672, %v2232_v9 }
 0x5e5   : > { %v2243_v8 = vmul.f32 %v4578_v53, %v2214_v19  ;;  %v4576_v60 = vadd.f32 -0.28449672, %v2233_v43 }
 0x5e6   : > { %v2246_v45 = vadd.f32 0.2548296, %v2242_v57  ;;  %v2240_v14 = vmul.f32 %v4575_v62, %v2169_v37  ;;  %v2311_v57 = vld [vmem:[#allocation18 + $0x18] sm:$0xff] }
 0x5e7   : > { %v2247_v18 = vadd.f32 0.2548296, %v2243_v8  ;;  %v2241_v31 = vmul.f32 %v4576_v60, %v2184_v39 }
 0x5e8   : > { %v2250_v20 = vmul.f32 %v2246_v45, %v2199_v10  ;;  %v2244_v0 = vadd.f32 0.2548296, %v2240_v14 }
 0x5e9   : > { %v2251_v3 = vmul.f32 %v2247_v18, %v2214_v19  ;;  %v2245_v36 = vadd.f32 0.2548296, %v2241_v31  ;;  %v4879_v19 = vpop.eup %4878 }
 0x5ea   : > { %v2270_v29 = vmul.f32 %v4873_v2, %v2250_v20  ;;  %v2248_v35 = vmul.f32 %v2244_v0, %v2169_v37  ;;  %v2139_v37 = vmul.f32 0.5, %v6583_v22 }
 0x5eb   : > { %v2271_v63 = vmul.f32 %v4875_v25, %v2251_v3  ;;  %v2249_v4 = vmul.f32 %v2245_v36, %v2184_v39 }
 0x5ec   : > { %v2274_v32 = vsub.f32 1.0, %v2270_v29  ;;  %v2268_v41 = vmul.f32 %v4877_v38, %v2248_v35 }
 0x5ed   : > { %v2275_v33 = vsub.f32 1.0, %v2271_v63  ;;  %v2269_v47 = vmul.f32 %v4879_v19, %v2249_v4 }
 0x5ee   : > { %v2282_v40 = vsub.f32 0.0, %v2274_v32  ;;  %v2272_v44 = vsub.f32 1.0, %v2268_v41 }
 0x5ef   : > { %v2283_v10 = vsub.f32 0.0, %v2275_v33  ;;  %v2273_v42 = vsub.f32 1.0, %v2269_v47  ;;  %v2301_v47 = vld [vmem:[%s7587_s1 + $0x8] sm:$0xff] }
 0x5f0   : > { %v2286_v1 = vsel %vm2278_vm9, %v2274_v32, %v2282_v40  ;;  %v2280_v58 = vsub.f32 0.0, %v2272_v44 }
 0x5f1   : > { %v2290_v26 = vadd.f32 1.0, %v2286_v1  ;;  %v2287_v46 = vsel %vm2279_vm11, %v2275_v33, %v2283_v10  ;;  %v2281_v49 = vsub.f32 0.0, %v2273_v42 }
 0x5f2   : > { %v2291_v48 = vadd.f32 1.0, %v2287_v46  ;;  %v2284_v13 = vsel %vm2276_vm12, %v2272_v44, %v2280_v58  ;;  %v2302_v44 = vld [vmem:[%s7587_s1 + $0x10] sm:$0xff] }
 0x5f3   : > { %v2294_v30 = vmul.f32 %v2290_v26, %v2138_v27  ;;  %v2288_v52 = vadd.f32 1.0, %v2284_v13  ;;  %v2285_v22 = vsel %vm2277_vm13, %v2273_v42, %v2281_v49  ;;  %v2300_v27 = vld [vmem:[%s7586_s30] sm:$0xff]  ;;  %v2306_v58 = vld [vmem:[%s7587_s1 + $0x30] sm:$0xff]  ;;  %v2305_v42 = vld [vmem:[%s7587_s1 + $0x28] sm:$0xff] }
 0x5f4   : > { %v2295_v12 = vmul.f32 %v2291_v48, %v2139_v37  ;;  %v2304_v48 = vld [vmem:[%s7587_s1 + $0x20] sm:$0xff] }
 0x5f5   : > { %v6656_v39 = vadd.f32 %v2294_v30, %v6544_v59  ;;  %v2292_v59 = vmul.f32 %v2288_v52, %v2136_v51  ;;  %v2303_v30 = vld [vmem:[%s7587_s1 + $0x18] sm:$0xff] }
 0x5f6   : > { %v6659_v15 = vadd.f32 %v2295_v12, %v6546_v28  ;;  %v2289_v28 = vadd.f32 1.0, %v2285_v22  ;;  %v2307_v12 = vld [vmem:[%s7587_s1 + $0x38] sm:$0xff] }
 0x5f7   : > { %2403 = vst.msk [vmem:[#allocation2 + $0x50] sm:$0xff] %vm1272_vm0, %v6656_v39  ;;  %2409 = vrot.lane.b32.xlu1 %v6656_v39, %s5698_s27  ;;  %v6673_v23 = vadd.f32 %v2292_v59, %v6540_v21 }
 0x5f8   : > { %2404 = vst.msk [vmem:[#allocation2 + $0x58] sm:$0xff] %vm1272_vm0, %v6659_v15  ;;  %2411 = vrot.lane.b32.xlu0 %v6659_v15, %s5698_s27  ;;  %v2293_v16 = vmul.f32 %v2289_v28, %v2137_v50 }
 0x5f9   : > { %2401 = vst.msk [vmem:[#allocation2 + $0x40] sm:$0xff] %vm1272_vm0, %v6673_v23 }
 0x5fa   : > { %v6678_v6 = vadd.f32 %v2293_v16, %v6542_v61 }
 0x5fc   : > { %2402 = vst.msk [vmem:[#allocation2 + $0x48] sm:$0xff] %vm1272_vm0, %v6678_v6  ;;  %2407 = vrot.lane.b32.xlu2 %v6678_v6, %s5698_s27 }
 0x5fe   : > { %v6684_v24 = vld [vmem:[#allocation2 + $0x50] sm:$0xff] }
 0x5ff   : > { %2391 = vrot.lane.b32.xlu1 %v6659_v15, %s5699_s2  ;;  %v6688_v21 = vld [vmem:[#allocation2 + $0x58] sm:$0xff]  ;;  %2840 = vst.msk [vmem:[#allocation2 + $0x50] sm:$0xff] %vm1272_vm0, %v5701_v5 }
 0x600   : > { %2405 = vrot.lane.b32.xlu0 %v6673_v23, %s5698_s27  ;;  %2841 = vst.msk [vmem:[#allocation2 + $0x58] sm:$0xff] %vm1272_vm0, %v5701_v5  ;;  %v6696_v61 = vld [vmem:[#allocation2 + $0x40] sm:$0xff] }
 0x601   : > { %2838 = vst.msk [vmem:[#allocation2 + $0x40] sm:$0xff] %vm1272_vm0, %v5701_v5 }
 0x603   : > { %v6700_v53 = vld [vmem:[#allocation2 + $0x48] sm:$0xff] }
 0x604   : > { %2389 = vrot.lane.b32.xlu2 %v6656_v39, %s5699_s2  ;;  %2839 = vst.msk [vmem:[#allocation2 + $0x48] sm:$0xff] %vm1272_vm0, %v5701_v5 }
 0x607   : > { %2385 = vrot.lane.b32.xlu1 %v6673_v23, %s5699_s2 }
 0x608   : > { %2387 = vrot.lane.b32.xlu0 %v6678_v6, %s5699_s2 }
 0x60c   : > { %2375 = vrot.lane.b32.xlu2 %v6659_v15, %s5702_s5 }
 0x60f   : > { %2371 = vrot.lane.b32.xlu1 %v6678_v6, %s5702_s5 }
 0x610   : > { %2373 = vrot.lane.b32.xlu0 %v6656_v39, %s5702_s5 }
 0x614   : > { %2369 = vrot.lane.b32.xlu2 %v6673_v23, %s5702_s5 }
 0x617   : > { %2425 = vrot.lane.b32.xlu1 %v6656_v39, %s5700_s3 }
 0x618   : > { %2427 = vrot.lane.b32.xlu0 %v6659_v15, %s5700_s3 }
 0x61c   : > { %2423 = vrot.lane.b32.xlu2 %v6678_v6, %s5700_s3 }
 0x61f   : > { %2459 = vperm.xlu1 %4839, %v2308_v54  }
 0x620   : > { %2421 = vrot.lane.b32.xlu0 %v6673_v23, %s5700_s3 }
 0x624   : > { %2464 = vperm.xlu2 %4837, %v2309_v56  }
 0x627   : > { %2474 = vperm.xlu1 %4839, %v2311_v57  }
 0x628   : > { %2469 = vperm.xlu0 %4838, %v2310_v7  }
 0x656   : > { %v2408_v8 = vpop.permute.xlu2 %2407 }
 0x657   : > { %2418 = vst.msk [vmem:[#allocation2 + $0x68] sm:$0xff] %vm1365_vm3, %v2408_v8 }
 0x65e   : > { %v2390_v9 = vpop.permute.xlu2 %2389  ;;  %v2450_v11 = vld [vmem:[#allocation2 + $0x68] sm:$0xff] }
 0x65f   : > { %2399 = vst.msk [vmem:[#allocation2 + $0x30] sm:$0xff] %vm1339_vm1, %v2390_v9 }
 0x660   : > { %2843 = vst.msk [vmem:[#allocation2 + $0x68] sm:$0xff] %vm1272_vm0, %v5701_v5 }
 0x666   : > { %v2376_v45 = vpop.permute.xlu2 %2375  ;;  %v2443_v62 = vld [vmem:[#allocation2 + $0x30] sm:$0xff] }
 0x667   : > { %2384 = vst.msk [vmem:[#allocation2 + $0x18] sm:$0xff] %vm1318_vm4, %v2376_v45 }
 0x668   : > { %2836 = vst.msk [vmem:[#allocation2 + $0x30] sm:$0xff] %vm1272_vm0, %v5701_v5 }
 0x669   : > { %v2410_v17 = vpop.permute.xlu1 %2409 }
 0x66a   : > { %v2412_v18 = vpop.permute.xlu0 %2411  ;;  %2419 = vst.msk [vmem:[#allocation2 + $0x70] sm:$0xff] %vm1365_vm3, %v2410_v17 }
 0x66b   : > { %2420 = vst.msk [vmem:[#allocation2 + $0x78] sm:$0xff] %vm1365_vm3, %v2412_v18 }
 0x66e   : > { %v2370_v43 = vpop.permute.xlu2 %2369  ;;  %v2440_v60 = vld [vmem:[#allocation2 + $0x18] sm:$0xff] }
 0x66f   : > { %2381 = vst.msk [vmem:[#allocation2] sm:$0xff] %vm1318_vm4, %v2370_v43 }
 0x670   : > { %2833 = vst.msk [vmem:[#allocation2 + $0x18] sm:$0xff] %vm1272_vm0, %v5701_v5 }
 0x671   : > { %v2392_v20 = vpop.permute.xlu1 %2391  ;;  %v2451_v14 = vld [vmem:[#allocation2 + $0x70] sm:$0xff] }
 0x672   : > { %v2406_v2 = vpop.permute.xlu0 %2405  ;;  %2400 = vst.msk [vmem:[#allocation2 + $0x38] sm:$0xff] %vm1339_vm1, %v2392_v20  ;;  %v2452_v3 = vld [vmem:[#allocation2 + $0x78] sm:$0xff] }
 0x673   : > { %2417 = vst.msk [vmem:[#allocation2 + $0x60] sm:$0xff] %vm1365_vm3, %v2406_v2  ;;  %2489 = vmatpush.msrb.mxu2 %v2452_v3 }
 0x674   : > { %2845 = vst.msk [vmem:[#allocation2 + $0x78] sm:$0xff] %vm1272_vm0, %v5701_v5 }
 0x675   : > { %2490 = vmatpush.msrb.mxu2 %v2451_v14  ;;  %2844 = vst.msk [vmem:[#allocation2 + $0x70] sm:$0xff] %vm1272_vm0, %v5701_v5 }
 0x676   : > { %v2424_v25 = vpop.permute.xlu2 %2423  ;;  %v2437_v32 = vld [vmem:[#allocation2] sm:$0xff] }
 0x677   : > { %2491 = vmatpush.msrb.mxu2 %v2450_v11  ;;  %2434 = vst.msk [vmem:[#allocation2 + $0x88] sm:$0xff] %vm1386_vm2, %v2424_v25 }
 0x678   : > { %2830 = vst.msk [vmem:[#allocation2] sm:$0xff] %vm1272_vm0, %v5701_v5 }
 0x679   : > { %v2386_v29 = vpop.permute.xlu1 %2385  ;;  %v2444_v31 = vld [vmem:[#allocation2 + $0x38] sm:$0xff] }
 0x67a   : > { %v2388_v63 = vpop.permute.xlu0 %2387  ;;  %2397 = vst.msk [vmem:[#allocation2 + $0x20] sm:$0xff] %vm1339_vm1, %v2386_v29  ;;  %v2449_v0 = vld [vmem:[#allocation2 + $0x60] sm:$0xff] }
 0x67b   : > { %2398 = vst.msk [vmem:[#allocation2 + $0x28] sm:$0xff] %vm1339_vm1, %v2388_v63  ;;  %2492 = vmatpush.msrb.mxu2 %v2449_v0 }
 0x67c   : > { %2842 = vst.msk [vmem:[#allocation2 + $0x60] sm:$0xff] %vm1272_vm0, %v5701_v5 }
 0x67d   : > { %2493 = vmatpush.msrb.mxu2 %v6688_v21  ;;  %2837 = vst.msk [vmem:[#allocation2 + $0x38] sm:$0xff] %vm1272_vm0, %v5701_v5 }
 0x67e   : > { %v2454_v33 = vld [vmem:[#allocation2 + $0x88] sm:$0xff]  ;;  %v2465_v50 = vpop.permute.xlu2 %2464 }
 0x67f   : > { %2494 = vmatpush.msrb.mxu2 %v6684_v24  ;;  %2847 = vst.msk [vmem:[#allocation2 + $0x88] sm:$0xff] %vm1272_vm0, %v5701_v5 }
 0x681   : > { %2495 = vmatpush.msrb.mxu2 %v6700_v53  ;;  %v2372_v35 = vpop.permute.xlu1 %2371  ;;  %v2441_v40 = vld [vmem:[#allocation2 + $0x20] sm:$0xff] }
 0x682   : > { %v2374_v36 = vpop.permute.xlu0 %2373  ;;  %2382 = vst.msk [vmem:[#allocation2 + $0x8] sm:$0xff] %vm1318_vm4, %v2372_v35  ;;  %v2442_v38 = vld [vmem:[#allocation2 + $0x28] sm:$0xff] }
 0x683   : > { %2383 = vst.msk [vmem:[#allocation2 + $0x10] sm:$0xff] %vm1318_vm4, %v2374_v36  ;;  %2496 = vmatpush.msrb.mxu2 %v6696_v61 }
 0x684   : > { %2835 = vst.msk [vmem:[#allocation2 + $0x28] sm:$0xff] %vm1272_vm0, %v5701_v5 }
 0x685   : > { %2497 = vmatpush.msrb.mxu2 %v2444_v31  ;;  %2834 = vst.msk [vmem:[#allocation2 + $0x20] sm:$0xff] %vm1272_vm0, %v5701_v5 }
 0x687   : > { %2498 = vmatpush.msrb.mxu2 %v2443_v62 }
 0x689   : > { %2499 = vmatpush.msrb.mxu2 %v2442_v38  ;;  %v2426_v10 = vpop.permute.xlu1 %2425  ;;  %v2438_v19 = vld [vmem:[#allocation2 + $0x8] sm:$0xff] }
 0x68a   : > { %v2428_v41 = vpop.permute.xlu0 %2427  ;;  %2435 = vst.msk [vmem:[#allocation2 + $0x90] sm:$0xff] %vm1386_vm2, %v2426_v10  ;;  %v2439_v4 = vld [vmem:[#allocation2 + $0x10] sm:$0xff] }
 0x68b   : > { %2436 = vst.msk [vmem:[#allocation2 + $0x98] sm:$0xff] %vm1386_vm2, %v2428_v41  ;;  %2500 = vmatpush.msrb.mxu2 %v2441_v40 }
 0x68c   : > { %2832 = vst.msk [vmem:[#allocation2 + $0x10] sm:$0xff] %vm1272_vm0, %v5701_v5 }
 0x68d   : > { %2501 = vmatpush.msrb.mxu2 %v2440_v60  ;;  %2831 = vst.msk [vmem:[#allocation2 + $0x8] sm:$0xff] %vm1272_vm0, %v5701_v5 }
 0x68f   : > { %2502 = vmatpush.msrb.mxu2 %v2439_v4 }
 0x691   : > { %2503 = vmatpush.msrb.mxu2 %v2438_v19  ;;  %v2455_v1 = vld [vmem:[#allocation2 + $0x90] sm:$0xff]  ;;  %v2460_v13 = vpop.permute.xlu1 %2459 }
 0x692   : > { %v2422_v26 = vpop.permute.xlu0 %2421  ;;  %v2456_v46 = vld [vmem:[#allocation2 + $0x98] sm:$0xff]  ;;  %2848 = vst.msk [vmem:[#allocation2 + $0x90] sm:$0xff] %vm1272_vm0, %v5701_v5 }
 0x693   : > { %2433 = vst.msk [vmem:[#allocation2 + $0x80] sm:$0xff] %vm1386_vm2, %v2422_v26  ;;  %2504 = vmatpush.msrb.mxu2 %v2437_v32  ;;  %2530 = vmatpush.msrb.mxu1 %v2456_v46 }
 0x694   : > { %2849 = vst.msk [vmem:[#allocation2 + $0x98] sm:$0xff] %vm1272_vm0, %v5701_v5  ;;  %2505 = vmatmul.f32.vlgmr.msrb.gmra.mxu2 %v2300_v27 }
 0x695   : > { %2531 = vmatpush.msrb.mxu1 %v2455_v1 }
 0x697   : > { %2532 = vmatpush.msrb.mxu1 %v2454_v33 }
 0x699   : > { %v2475_v9 = vpop.permute.xlu1 %2474 }
 0x69a   : > { %v2453_v37 = vld [vmem:[#allocation2 + $0x80] sm:$0xff]  ;;  %v2470_v53 = vpop.permute.xlu0 %2469 }
 0x69b   : > { %2533 = vmatpush.msrb.mxu1 %v2453_v37  ;;  %2846 = vst.msk [vmem:[#allocation2 + $0x80] sm:$0xff] %vm1272_vm0, %v5701_v5  ;;  %v2319_v37 = vld [vmem:[#allocation21 + $0x18] sm:$0xff] }
 0x69c   : > { %2508 = vmatmul.f32.gmra.mxu2 %v2302_v44  ;;  %4579 = vmatmul.msk.f32.vlgmr.msrb.gmra.mxu1 %vm1942_vm10, %v2301_v47 }
 0x6a4   : > { %2511 = vmatmul.f32.gmra.mxu2 %v2304_v48  ;;  %4580 = vmatmul.msk.f32.gmra.mxu1 %vm1942_vm10, %v2303_v30  ;;  %v2314_v48 = vld [vmem:[#allocation20 + $0x10] sm:$0xff]  ;;  %v2315_v30 = vld [vmem:[#allocation20 + $0x18] sm:$0xff] }
 0x6ac   : > { %2514 = vmatmul.f32.gmra.mxu2 %v2306_v58  ;;  %4581 = vmatmul.msk.f32.gmra.mxu1 %vm1942_vm10, %v2305_v42  ;;  %v2312_v58 = vld [vmem:[#allocation20] sm:$0xff]  ;;  %v2313_v42 = vld [vmem:[#allocation20 + $0x8] sm:$0xff] }
 0x6b4   : > { %4582 = vmatmul.msk.f32.gmra.mxu1 %vm1942_vm10, %v2307_v12  ;;  %v2317_v12 = vld [vmem:[#allocation21 + $0x8] sm:$0xff] }
 0x717   : > { %v2506_v49 = vpop.f32.mrf.mxu2 }
 0x718   : > { %v2507_v51 = vadd.f32 %v2506_v49, %v2460_v13 }
 0x719   : > { %v2535_v52 = vpop.f32.mrf.mxu1 }
 0x71a   : > { %v2536_v22 = vadd.f32 %v2535_v52, %v2507_v51  ;;  %v2318_v52 = vld [vmem:[#allocation21 + $0x10] sm:$0xff] }
 0x71c   : > { %v2547_v59 = vsel %vm1272_vm0, %v2536_v22, 0.0 }
 0x71d   : > { %2548 = vadd.xlane.f32.xlu2 %v2547_v59 }
 0x71f   : > { %v2509_v28 = vpop.f32.mrf.mxu2 }
 0x720   : > { %v2510_v16 = vadd.f32 %v2509_v28, %v2465_v50 }
 0x721   : > { %v2538_v24 = vpop.f32.mrf.mxu1 }
 0x722   : > { %v2539_v21 = vadd.f32 %v2538_v24, %v2510_v16 }
 0x724   : > { %v2550_v61 = vsel %vm1272_vm0, %v2539_v21, 0.0 }
 0x725   : > { %2551 = vadd.xlane.f32.xlu0 %v2550_v61 }
 0x727   : > { %v2512_v54 = vpop.f32.mrf.mxu2 }
 0x728   : > { %v2513_v56 = vadd.f32 %v2512_v54, %v2470_v53 }
 0x729   : > { %v2541_v57 = vpop.f32.mrf.mxu1 }
 0x72a   : > { %v2542_v7 = vadd.f32 %v2541_v57, %v2513_v56 }
 0x72c   : > { %v2553_v8 = vsel %vm1272_vm0, %v2542_v7, 0.0 }
 0x72d   : > { %2554 = vadd.xlane.f32.xlu1 %v2553_v8 }
 0x72f   : > { %v2515_v11 = vpop.f32.mrf.mxu2 }
 0x730   : > { %v2516_v45 = vadd.f32 %v2515_v11, %v2475_v9 }
 0x731   : > { %v2544_v17 = vpop.f32.mrf.mxu1 }
 0x732   : > { %v2545_v18 = vadd.f32 %v2544_v17, %v2516_v45 }
 0x734   : > { %v2556_v62 = vsel %vm1272_vm0, %v2545_v18, 0.0 }
 0x735   : > { %2557 = vadd.xlane.f32.xlu2 %v2556_v62 }
 0x790   : > { %v2549_v43 = vpop.xlane.xlu2 %2548 }
 0x791   : > { %v2559_v14 = vmul.f32 %v2549_v43, %v6333_v34 }
 0x798   : > { %v2552_v20 = vpop.xlane.xlu0 %2551 }
 0x799   : > { %v2560_v3 = vmul.f32 %v2552_v20, %v6333_v34 }
 0x79b   : > { %v2563_v25 = vadd.f32 %v2560_v3, %v2559_v14 }
 0x7a0   : > { %v2555_v2 = vpop.xlane.xlu1 %2554 }
 0x7a1   : > { %v2561_v60 = vmul.f32 %v2555_v2, %v6333_v34 }
 0x7a3   : > { %v2564_v63 = vadd.f32 %v2563_v25, %v2561_v60 }
 0x7a8   : > { %v2558_v29 = vpop.xlane.xlu2 %2557 }
 0x7a9   : > { %v2562_v0 = vmul.f32 %v2558_v29, %v6333_v34 }
 0x7ab   : > { %v2565_v31 = vadd.f32 %v2564_v63, %v2562_v0 }
 0x7ad   : > { %v2566_v32 = vrot.slane %v2565_v31, 4 }
 0x7af   : > { %v2567_v33 = vadd.f32 %v2566_v32, %v2565_v31 }
 0x7b1   : > { %v2568_v35 = vrot.slane %v2567_v33, 2 }
 0x7b3   : > { %v2569_v36 = vadd.f32 %v2568_v35, %v2567_v33 }
 0x7b5   : > { %v2570_v38 = vrot.slane %v2569_v36, 1 }
 0x7b7   : > { %v2571_v40 = vadd.f32 %v2570_v38, %v2569_v36 }
 0x7b9   : > { %v2572_v10 = vmul.f32 %v2571_v40, %v6339_v55 }
 0x7bb   : > { %v6815_v41 = vsub.f32 %v2542_v7, %v2572_v10  ;;  %v6817_v4 = vsub.f32 %v2539_v21, %v2572_v10  ;;  %v6819_v19 = vsub.f32 %v2536_v22, %v2572_v10  ;;  %v2576_v13 = vsub.f32 %v2545_v18, %v2572_v10  ;;  %v2316_v22 = vld [vmem:[#allocation21] sm:$0xff] }
 0x7bd   : > { %v2579_v27 = vmul.f32 %v6815_v41, %v6815_v41  ;;  %v2578_v1 = vmul.f32 %v6817_v4, %v6817_v4  ;;  %v2577_v26 = vmul.f32 %v6819_v19, %v6819_v19  ;;  %v2580_v49 = vmul.f32 %v2576_v13, %v2576_v13 }
 0x7bf   : > { %v2587_v46 = vsel %vm1272_vm0, %v2579_v27, 0.0  ;;  %v2584_v44 = vsel %vm1272_vm0, %v2578_v1, 0.0  ;;  %v2581_v47 = vsel %vm1272_vm0, %v2577_v26, 0.0  ;;  %v2590_v51 = vsel %vm1272_vm0, %v2580_v49, 0.0 }
 0x7c0   : > { %2588 = vadd.xlane.f32.xlu2 %v2587_v46  ;;  %2585 = vadd.xlane.f32.xlu1 %v2584_v44 }
 0x7c1   : > { %2582 = vadd.xlane.f32.xlu0 %v2581_v47 }
 0x7d5   : > { %2663 = vperm.xlu0 %4838, %v2319_v37  }
 0x7d8   : > { %2634 = vperm.xlu2 %4837, %v2314_v48  }
 0x7d9   : > { %2639 = vperm.xlu1 %4839, %v2315_v30  }
 0x7e0   : > { %2624 = vperm.xlu2 %4837, %v2312_v58  }
 0x7e1   : > { %2629 = vperm.xlu1 %4839, %v2313_v42  }
 0x7e9   : > { %2653 = vperm.xlu1 %4839, %v2317_v12  }
 0x7ff   : > { %2591 = vadd.xlane.f32.xlu0 %v2590_v51 }
 0x813   : > { %2658 = vperm.xlu0 %4838, %v2318_v52  }
 0x81b   : > { %2648 = vperm.xlu0 %4838, %v2316_v22  }
 0x833   : > { %v2586_v50 = vpop.xlane.xlu1 %2585  ;;  %v2589_v21 = vpop.xlane.xlu2 %2588 }
 0x834   : > { %v2583_v59 = vpop.xlane.xlu0 %2582  ;;  %v2594_v16 = vmul.f32 %v2586_v50, %v6333_v34  ;;  %v2595_v53 = vmul.f32 %v2589_v21, %v6333_v34 }
 0x835   : > { %v2593_v24 = vmul.f32 %v2583_v59, %v6333_v34 }
 0x837   : > { %v2597_v61 = vadd.f32 %v2594_v16, %v2593_v24 }
 0x839   : > { %v2598_v56 = vadd.f32 %v2597_v61, %v2595_v53 }
 0x83b   : > { %v2635_v14 = vpop.permute.xlu2 %2634 }
 0x843   : > { %v2625_v40 = vpop.permute.xlu2 %2624 }
 0x847   : > { %v2664_v28 = vpop.permute.xlu0 %2663 }
 0x84b   : > { %v2640_v20 = vpop.permute.xlu1 %2639 }
 0x853   : > { %v2630_v25 = vpop.permute.xlu1 %2629 }
 0x85b   : > { %v2654_v46 = vpop.permute.xlu1 %2653 }
 0x872   : > { %v2592_v54 = vpop.xlane.xlu0 %2591 }
 0x873   : > { %v2596_v57 = vmul.f32 %v2592_v54, %v6333_v34 }
 0x875   : > { %v2599_v7 = vadd.f32 %v2598_v56, %v2596_v57 }
 0x877   : > { %v2600_v8 = vrot.slane %v2599_v7, 4 }
 0x879   : > { %v2601_v9 = vadd.f32 %v2600_v8, %v2599_v7 }
 0x87b   : > { %v2602_v11 = vrot.slane %v2601_v9, 2 }
 0x87d   : > { %v2603_v45 = vadd.f32 %v2602_v11, %v2601_v9 }
 0x87f   : > { %v2604_v17 = vrot.slane %v2603_v45, 1 }
 0x881   : > { %v2605_v18 = vadd.f32 %v2604_v17, %v2603_v45 }
 0x883   : > { %v2606_v62 = vmul.f32 %v2605_v18, %v6339_v55 }
 0x885   : > { %v2607_v43 = vadd.f32 1e-05, %v2606_v62  ;;  %v2659_v63 = vpop.permute.xlu0 %2658 }
 0x887   : > { %4880 = vrsqrt.f32 %v2607_v43  ;;  %vm2614_vm15 = vweird.f32 %v2607_v43 }
 0x88d   : > { %v4881_v2 = vpop.eup %4880  ;;  %v2649_v44 = vpop.permute.xlu0 %2648 }
 0x88e   : > { %v2609_v3 = vmul.f32 %v4881_v2, %v2607_v43  ;;  %vm2615_vm14 = vweird.f32 %v4881_v2 }
 0x88f   : > { %vm2616_vm5 = vmor %vm2614_vm15, %vm2615_vm14 }
 0x890   : > { %v2610_v60 = vmul.f32 %v4881_v2, %v2609_v3 }
 0x892   : > { %v2611_v29 = vmul.f32 0.5, %v2610_v60 }
 0x894   : > { %v2612_v0 = vsub.f32 1.5, %v2611_v29 }
 0x896   : > { %v2613_v31 = vmul.f32 %v4881_v2, %v2612_v0 }
 0x898   : > { %v2617_v32 = vsel %vm2616_vm5, %v4881_v2, %v2613_v31 }
 0x899   : > { %v2619_v33 = vmul.f32 %v2617_v32, %v6817_v4  ;;  %v2620_v35 = vmul.f32 %v2617_v32, %v6815_v41  ;;  %v2621_v36 = vmul.f32 %v2617_v32, %v2576_v13  ;;  %v2618_v38 = vmul.f32 %v2617_v32, %v6819_v19 }
 0x89b   : > { %v2643_v10 = vmul.f32 %v2630_v25, %v2619_v33  ;;  %v2644_v27 = vmul.f32 %v2635_v14, %v2620_v35  ;;  %v2645_v1 = vmul.f32 %v2640_v20, %v2621_v36  ;;  %v2642_v26 = vmul.f32 %v2625_v40, %v2618_v38 }
 0x89d   : > { %v6839_v47 = vadd.f32 %v2659_v63, %v2644_v27  ;;  %v6841_v37 = vadd.f32 %v2649_v44, %v2642_v26  ;;  %v6843_v48 = vadd.f32 %v2664_v28, %v2645_v1  ;;  %v6845_v30 = vadd.f32 %v2654_v46, %v2643_v10 }
 0x89f   : > { %v6848_v41 = vmul.f32 0.70710677, %v6839_v47  ;;  %v6851_v4 = vmul.f32 0.70710677, %v6841_v37  ;;  %v6854_v19 = vmul.f32 0.70710677, %v6843_v48 }
 0x8a0   : > { %v6857_v58 = vmul.f32 0.70710677, %v6845_v30 }
 0x8a1   : > { %v6860_v42 = vand.u32 2147483647, %v6848_v41  ;;  %v6863_v12 = vand.u32 2147483647, %v6851_v4  ;;  %v6866_v13 = vand.u32 2147483647, %v6854_v19 }
 0x8a2   : > { %v6869_v49 = vand.u32 2147483647, %v6857_v58 }
 0x8a3   : > { %v2684_v51 = vmul.f32 0.3275911, %v6860_v42  ;;  %v2682_v52 = vmul.f32 0.3275911, %v6863_v12  ;;  %v2685_v22 = vmul.f32 0.3275911, %v6866_v13 }
 0x8a4   : > { %v2683_v28 = vmul.f32 0.3275911, %v6869_v49  ;;  %v2788_v8 = vsub.f32 0.0, %v6860_v42  ;;  %v2786_v45 = vsub.f32 0.0, %v6863_v12  ;;  %v2789_v17 = vsub.f32 0.0, %v6866_v13 }
 0x8a5   : > { %v2688_v59 = vadd.f32 1.0, %v2684_v51  ;;  %v2686_v50 = vadd.f32 1.0, %v2682_v52  ;;  %v2689_v16 = vadd.f32 1.0, %v2685_v22 }
 0x8a6   : > { %v6875_v24 = vadd.f32 1.0, %v2683_v28 }
 0x8a7   : > { %4882 = vrcp.f32 %v2688_v59  ;;  %v2729_v54 = vand.u32 2147483647, %v2688_v59  ;;  %v2731_v7 = vand.u32 2147483648, %v2688_v59  ;;  %v2699_v9 = vand.u32 2147483647, %v2686_v50 }
 0x8a8   : > { %4884 = vrcp.f32 %v2686_v50  ;;  %vm2725_vm6 = vweird.f32 %v2688_v59  ;;  %vm2695_vm8 = vweird.f32 %v2686_v50  ;;  %v2701_v43 = vand.u32 2147483648, %v2686_v50 }
 0x8a9   : > { %4886 = vrcp.f32 %v2689_v16  ;;  %vm6881_vm9 = vcmp.eq.f32.partialorder %v2729_v54, 8.507059e+37  ;;  %v2732_v25 = vor.u32 1.1754944e-38, %v2731_v7  ;;  %vm6885_vm12 = vcmp.eq.f32.partialorder %v2699_v9, 8.507059e+37 }
 0x8aa   : > { %4888 = vrcp.f32 %v6875_v24  ;;  %vm2740_vm13 = vweird.f32 %v2689_v16  ;;  %v2744_v31 = vand.u32 2147483647, %v2689_v16  ;;  %v2702_v35 = vor.u32 1.1754944e-38, %v2701_v43 }
 0x8ab   : > { %v2746_v36 = vand.u32 2147483648, %v2689_v16  ;;  %v2714_v46 = vand.u32 2147483647, %v6875_v24  ;;  %v2716_v44 = vand.u32 2147483648, %v6875_v24  ;;  %v2787_v43 = vsub.f32 0.0, %v6869_v49 }
 0x8ad   : > { %v4883_v21 = vpop.eup %4882  ;;  %v2747_v28 = vor.u32 1.1754944e-38, %v2746_v36  ;;  %v2717_v7 = vor.u32 1.1754944e-38, %v2716_v44 }
 0x8ae   : > { %v4885_v61 = vpop.eup %4884  ;;  %v2721_v53 = vmul.f32 %v4883_v21, %v2688_v59  ;;  %vm2726_vm7 = vweird.f32 %v4883_v21 }
 0x8af   : > { %v2691_v56 = vmul.f32 %v4885_v61, %v2686_v50  ;;  %v4887_v18 = vpop.eup %4886  ;;  %vm2696_vm11 = vweird.f32 %v4885_v61  ;;  %vm2727_vm14 = vmor %vm2725_vm6, %vm2726_vm7  ;;  %v2792_v50 = vmul.f32 %v2788_v8, %v6860_v42 }
 0x8b0   : > { %v2722_v57 = vsub.f32 1.0, %v2721_v53  ;;  %v2736_v3 = vmul.f32 %v4887_v18, %v2689_v16  ;;  %v4889_v14 = vpop.eup %4888  ;;  %vm2697_vm15 = vmor %vm2695_vm8, %vm2696_vm11  ;;  %vm2741_vm5 = vweird.f32 %v4887_v18  ;;  %vm2745_vm8 = vcmp.eq.f32.partialorder %v2744_v31, 8.507059e+37 }
 0x8b1   : > { %v2692_v11 = vsub.f32 1.0, %v2691_v56  ;;  %v2706_v32 = vmul.f32 %v4889_v14, %v6875_v24  ;;  %vm2711_vm6 = vweird.f32 %v4889_v14  ;;  %vm2742_vm7 = vmor %vm2740_vm13, %vm2741_vm5  ;;  %v2790_v56 = vmul.f32 %v2786_v45, %v6863_v12 }
 0x8b2   : > { %v2723_v62 = vmul.f32 %v4883_v21, %v2722_v57  ;;  %v2737_v0 = vsub.f32 1.0, %v2736_v3  ;;  %v2798_v16 = vmul.f32 1.442695, %v2792_v50  ;;  %v2793_v12 = vmul.f32 %v2789_v17, %v6866_v13 }
 0x8b3   : > { %v2693_v2 = vmul.f32 %v4885_v61, %v2692_v11  ;;  %v2707_v27 = vsub.f32 1.0, %v2706_v32  ;;  %vm2812_vm13 = vcmp.ge.f32.partialorder %v6848_v41, 0.0  ;;  %vm2811_vm5 = vcmp.ge.f32.partialorder %v6857_v58, 0.0 }
 0x8b4   : > { %v2724_v60 = vadd.f32 %v4883_v21, %v2723_v62  ;;  %v2738_v10 = vmul.f32 %v4887_v18, %v2737_v0  ;;  %4890 = vpow2.f32 %v2798_v16 }
 0x8b5   : > { %v2694_v63 = vadd.f32 %v4885_v61, %v2693_v2  ;;  %v2708_v22 = vmul.f32 %v4889_v14, %v2707_v27 }
 0x8b6   : > { %v2728_v33 = vsel %vm2727_vm14, %v4883_v21, %v2724_v60  ;;  %v2739_v52 = vadd.f32 %v4887_v18, %v2738_v10  ;;  %vm2810_vm14 = vcmp.ge.f32.partialorder %v6851_v4, 0.0  ;;  %v2673_v4 = vmul.f32 0.5, %v6843_v48 }
 0x8b7   : > { %v2733_v38 = vsel %vm6881_vm9, %v2732_v25, %v2728_v33  ;;  %v2698_v40 = vsel %vm2697_vm15, %v4885_v61, %v2694_v63  ;;  %v2709_v53 = vadd.f32 %v4889_v14, %v2708_v22  ;;  %vm2710_vm9 = vweird.f32 %v6875_v24 }
 0x8b8   : > { %v2752_v1 = vmul.f32 1.0614054, %v2733_v38  ;;  %v2703_v26 = vsel %vm6885_vm12, %v2702_v35, %v2698_v40  ;;  %v2743_v61 = vsel %vm2742_vm7, %v4887_v18, %v2739_v52  ;;  %vm2712_vm11 = vmor %vm2710_vm9, %vm2711_vm6  ;;  %vm2715_vm12 = vcmp.eq.f32.partialorder %v2714_v46, 8.507059e+37 }
 0x8b9   : > { %v2750_v51 = vmul.f32 1.0614054, %v2703_v26  ;;  %v2748_v57 = vsel %vm2745_vm8, %v2747_v28, %v2743_v61  ;;  %v2713_v62 = vsel %vm2712_vm11, %v4889_v14, %v2709_v53  ;;  %v2794_v24 = vmul.f32 1.442695, %v2790_v56 }
 0x8ba   : > { %v4585_v59 = vadd.f32 -1.4531521, %v2752_v1  ;;  %v2753_v11 = vmul.f32 1.0614054, %v2748_v57  ;;  %v2718_v8 = vsel %vm2715_vm12, %v2717_v7, %v2713_v62  ;;  %v2791_v14 = vmul.f32 %v2787_v43, %v6869_v49  ;;  %v4891_v44 = vpop.eup %4890 }
 0x8bb   : > { %v4583_v21 = vadd.f32 -1.4531521, %v2750_v51  ;;  %v2751_v2 = vmul.f32 1.0614054, %v2718_v8  ;;  %4892 = vpow2.f32 %v2794_v24  ;;  %v2800_v33 = vmul.f32 1.442695, %v2793_v12 }
 0x8bc   : > { %v2760_v54 = vmul.f32 %v4585_v59, %v2733_v38  ;;  %v4586_v18 = vadd.f32 -1.4531521, %v2753_v11  ;;  %v2796_v27 = vmul.f32 1.442695, %v2791_v14  ;;  %vm2813_vm15 = vcmp.ge.f32.partialorder %v6854_v19, 0.0 }
 0x8bd   : > { %v2758_v9 = vmul.f32 %v4583_v21, %v2703_v26  ;;  %v4584_v25 = vadd.f32 -1.4531521, %v2751_v2  ;;  %4894 = vpow2.f32 %v2800_v33  ;;  %v2330_v33 = vld [vmem:[#allocation23 + $0x10] sm:$0xff] }
 0x8be   : > { %v2764_v42 = vadd.f32 1.4214138, %v2760_v54  ;;  %v2761_v60 = vmul.f32 %v4586_v18, %v2748_v57  ;;  %4896 = vpow2.f32 %v2796_v27 }
 0x8bf   : > { %v2762_v20 = vadd.f32 1.4214138, %v2758_v9  ;;  %v2759_v31 = vmul.f32 %v4584_v25, %v2718_v8 }
 0x8c0   : > { %v2768_v3 = vmul.f32 %v2764_v42, %v2733_v38  ;;  %v2765_v0 = vadd.f32 1.4214138, %v2761_v60  ;;  %v2672_v42 = vmul.f32 0.5, %v6839_v47 }
 0x8c1   : > { %v2766_v45 = vmul.f32 %v2762_v20, %v2703_v26  ;;  %v2763_v40 = vadd.f32 1.4214138, %v2759_v31  ;;  %v4893_v22 = vpop.eup %4892  ;;  %v2329_v31 = vld [vmem:[#allocation23 + $0x8] sm:$0xff] }
 0x8c2   : > { %v4589_v29 = vadd.f32 -0.28449672, %v2768_v3  ;;  %v2769_v36 = vmul.f32 %v2765_v0, %v2748_v57  ;;  %v2328_v0 = vld [vmem:[#allocation23] sm:$0xff] }
 0x8c3   : > { %v4587_v63 = vadd.f32 -0.28449672, %v2766_v45  ;;  %v2767_v17 = vmul.f32 %v2763_v40, %v2718_v8  ;;  %v4895_v7 = vpop.eup %4894 }
 0x8c4   : > { %v2776_v32 = vmul.f32 %v4589_v29, %v2733_v38  ;;  %v4590_v13 = vadd.f32 -0.28449672, %v2769_v36  ;;  %v2671_v29 = vmul.f32 0.5, %v6845_v30 }
 0x8c5   : > { %v2774_v35 = vmul.f32 %v4587_v63, %v2703_v26  ;;  %v4588_v52 = vadd.f32 -0.28449672, %v2767_v17 }
 0x8c6   : > { %v2780_v10 = vadd.f32 0.2548296, %v2776_v32  ;;  %v2777_v49 = vmul.f32 %v4590_v13, %v2748_v57  ;;  %v2331_v32 = vld [vmem:[#allocation23 + $0x18] sm:$0xff] }
 0x8c7   : > { %v2778_v1 = vadd.f32 0.2548296, %v2774_v35  ;;  %v2775_v21 = vmul.f32 %v4588_v52, %v2718_v8 }
 0x8c8   : > { %v2784_v46 = vmul.f32 %v2780_v10, %v2733_v38  ;;  %v2781_v28 = vadd.f32 0.2548296, %v2777_v49 }
 0x8c9   : > { %v2782_v51 = vmul.f32 %v2778_v1, %v2703_v26  ;;  %v2779_v56 = vadd.f32 0.2548296, %v2775_v21  ;;  %v4897_v26 = vpop.eup %4896 }
 0x8ca   : > { %v2804_v59 = vmul.f32 %v4891_v44, %v2784_v46  ;;  %v2785_v54 = vmul.f32 %v2781_v28, %v2748_v57  ;;  %v2670_v57 = vmul.f32 0.5, %v6841_v37 }
 0x8cb   : > { %v2802_v50 = vmul.f32 %v4893_v22, %v2782_v51  ;;  %v2783_v62 = vmul.f32 %v2779_v56, %v2718_v8 }
 0x8cc   : > { %v2808_v61 = vsub.f32 1.0, %v2804_v59  ;;  %v2805_v11 = vmul.f32 %v4895_v7, %v2785_v54 }
 0x8cd   : > { %v2806_v53 = vsub.f32 1.0, %v2802_v50  ;;  %v2803_v2 = vmul.f32 %v4897_v26, %v2783_v62 }
 0x8ce   : > { %v2816_v9 = vsub.f32 0.0, %v2808_v61  ;;  %v2809_v18 = vsub.f32 1.0, %v2805_v11 }
 0x8cf   : > { %v2814_v38 = vsub.f32 0.0, %v2806_v53  ;;  %v2807_v45 = vsub.f32 1.0, %v2803_v2  ;;  %v2322_v2 = vld [vmem:[%s7592_s28 + $0x10] sm:$0xff] }
 0x8d0   : > { %v2820_v16 = vsel %vm2812_vm13, %v2808_v61, %v2816_v9  ;;  %v2817_v12 = vsub.f32 0.0, %v2809_v18 }
 0x8d1   : > { %v2824_v43 = vadd.f32 1.0, %v2820_v16  ;;  %v2818_v20 = vsel %vm2810_vm14, %v2806_v53, %v2814_v38  ;;  %v2815_v47 = vsub.f32 0.0, %v2807_v45 }
 0x8d2   : > { %v2822_v3 = vadd.f32 1.0, %v2818_v20  ;;  %v2821_v8 = vsel %vm2813_vm15, %v2809_v18, %v2817_v12  ;;  %v2326_v12 = vld [vmem:[%s7592_s28 + $0x30] sm:$0xff] }
 0x8d3   : > { %v2828_v24 = vmul.f32 %v2824_v43, %v2672_v42  ;;  %v2825_v60 = vadd.f32 1.0, %v2821_v8  ;;  %v2819_v37 = vsel %vm2811_vm5, %v2807_v45, %v2815_v47  ;;  %v2320_v43 = vld [vmem:[%s7592_s28] sm:$0xff]  ;;  %v2325_v45 = vld [vmem:[%s7592_s28 + $0x28] sm:$0xff] }
 0x8d4   : > { %v2826_v41 = vmul.f32 %v2822_v3, %v2670_v57  ;;  %v2823_v14 = vadd.f32 1.0, %v2819_v37  ;;  %v2321_v57 = vld [vmem:[%s7592_s28 + $0x8] sm:$0xff]  ;;  %v2324_v3 = vld [vmem:[%s7592_s28 + $0x20] sm:$0xff] }
 0x8d5   : > { %2893 = vst.msk [vmem:[#allocation2 + $0x50] sm:$0xff] %vm1272_vm0, %v2828_v24  ;;  %2899 = vrot.lane.b32.xlu1 %v2828_v24, %s5698_s27  ;;  %v2829_v25 = vmul.f32 %v2825_v60, %v2673_v4 }
 0x8d6   : > { %2891 = vst.msk [vmem:[#allocation2 + $0x40] sm:$0xff] %vm1272_vm0, %v2826_v41  ;;  %v2827_v19 = vmul.f32 %v2823_v14, %v2671_v29 }
 0x8d7   : > { %2901 = vrot.lane.b32.xlu2 %v2829_v25, %s5698_s27  ;;  %2894 = vst.msk [vmem:[#allocation2 + $0x58] sm:$0xff] %vm1272_vm0, %v2829_v25 }
 0x8d8   : > { %2897 = vrot.lane.b32.xlu0 %v2827_v19, %s5698_s27  ;;  %2892 = vst.msk [vmem:[#allocation2 + $0x48] sm:$0xff] %vm1272_vm0, %v2827_v19 }
 0x8dc   : > { %v6923_v63 = vld [vmem:[#allocation2 + $0x50] sm:$0xff] }
 0x8dd   : > { %2881 = vrot.lane.b32.xlu1 %v2829_v25, %s5699_s2  ;;  %3395 = vst.msk [vmem:[#allocation2 + $0x50] sm:$0xff] %vm1272_vm0, %v5701_v5  ;;  %v6928_v48 = vld [vmem:[#allocation2 + $0x40] sm:$0xff] }
 0x8de   : > { %3393 = vst.msk [vmem:[#allocation2 + $0x40] sm:$0xff] %vm1272_vm0, %v5701_v5  ;;  %v2938_v30 = vld [vmem:[#allocation2 + $0x58] sm:$0xff] }
 0x8df   : > { %2895 = vrot.lane.b32.xlu2 %v2826_v41, %s5698_s27  ;;  %3396 = vst.msk [vmem:[#allocation2 + $0x58] sm:$0xff] %vm1272_vm0, %v5701_v5  ;;  %v6935_v58 = vld [vmem:[#allocation2 + $0x48] sm:$0xff] }
 0x8e0   : > { %2879 = vrot.lane.b32.xlu0 %v2828_v24, %s5699_s2  ;;  %3394 = vst.msk [vmem:[#allocation2 + $0x48] sm:$0xff] %vm1272_vm0, %v5701_v5 }
 0x8e5   : > { %2875 = vrot.lane.b32.xlu1 %v2826_v41, %s5699_s2 }
 0x8e7   : > { %2877 = vrot.lane.b32.xlu2 %v2827_v19, %s5699_s2 }
 0x8e8   : > { %2865 = vrot.lane.b32.xlu0 %v2829_v25, %s5702_s5 }
 0x8ed   : > { %2861 = vrot.lane.b32.xlu1 %v2827_v19, %s5702_s5 }
 0x8ef   : > { %2863 = vrot.lane.b32.xlu2 %v2828_v24, %s5702_s5 }
 0x8f0   : > { %2859 = vrot.lane.b32.xlu0 %v2826_v41, %s5702_s5 }
 0x8f5   : > { %2915 = vrot.lane.b32.xlu1 %v2828_v24, %s5700_s3  ;;  %v2323_v24 = vld [vmem:[%s7592_s28 + $0x18] sm:$0xff] }
 0x8f7   : > { %2917 = vrot.lane.b32.xlu2 %v2829_v25, %s5700_s3 }
 0x8f8   : > { %2913 = vrot.lane.b32.xlu0 %v2827_v19, %s5700_s3 }
 0x8fd   : > { %2949 = vperm.xlu1 %4839, %v2328_v0  }
 0x8ff   : > { %2911 = vrot.lane.b32.xlu2 %v2826_v41, %s5700_s3  ;;  %v2327_v41 = vld [vmem:[%s7592_s28 + $0x38] sm:$0xff] }
 0x900   : > { %2954 = vperm.xlu0 %4838, %v2329_v31  }
 0x905   : > { %2964 = vperm.xlu1 %4839, %v2331_v32  }
 0x907   : > { %2959 = vperm.xlu2 %4837, %v2330_v33  }
 0x931   : > { %v2902_v35 = vpop.permute.xlu2 %2901 }
 0x932   : > { %2910 = vst.msk [vmem:[#allocation2 + $0x78] sm:$0xff] %vm1365_vm3, %v2902_v35 }
 0x939   : > { %v2896_v36 = vpop.permute.xlu2 %2895  ;;  %v2942_v40 = vld [vmem:[#allocation2 + $0x78] sm:$0xff] }
 0x93a   : > { %2907 = vst.msk [vmem:[#allocation2 + $0x60] sm:$0xff] %vm1365_vm3, %v2896_v36  ;;  %2979 = vmatpush.msrb.mxu3 %v2942_v40 }
 0x93b   : > { %3400 = vst.msk [vmem:[#allocation2 + $0x78] sm:$0xff] %vm1272_vm0, %v5701_v5 }
 0x941   : > { %v2878_v10 = vpop.permute.xlu2 %2877  ;;  %v2939_v27 = vld [vmem:[#allocation2 + $0x60] sm:$0xff] }
 0x942   : > { %2888 = vst.msk [vmem:[#allocation2 + $0x28] sm:$0xff] %vm1339_vm1, %v2878_v10 }
 0x943   : > { %3397 = vst.msk [vmem:[#allocation2 + $0x60] sm:$0xff] %vm1272_vm0, %v5701_v5 }
 0x947   : > { %v2900_v1 = vpop.permute.xlu1 %2899 }
 0x948   : > { %2909 = vst.msk [vmem:[#allocation2 + $0x70] sm:$0xff] %vm1365_vm3, %v2900_v1 }
 0x949   : > { %v2864_v13 = vpop.permute.xlu2 %2863  ;;  %v2932_v17 = vld [vmem:[#allocation2 + $0x28] sm:$0xff] }
 0x94a   : > { %2873 = vst.msk [vmem:[#allocation2 + $0x10] sm:$0xff] %vm1318_vm4, %v2864_v13  ;;  %v2898_v46 = vpop.permute.xlu0 %2897 }
 0x94b   : > { %3390 = vst.msk [vmem:[#allocation2 + $0x28] sm:$0xff] %vm1272_vm0, %v5701_v5 }
 0x94c   : > { %2908 = vst.msk [vmem:[#allocation2 + $0x68] sm:$0xff] %vm1365_vm3, %v2898_v46 }
 0x94f   : > { %v2882_v44 = vpop.permute.xlu1 %2881  ;;  %v2941_v51 = vld [vmem:[#allocation2 + $0x70] sm:$0xff] }
 0x950   : > { %2890 = vst.msk [vmem:[#allocation2 + $0x38] sm:$0xff] %vm1339_vm1, %v2882_v44  ;;  %2980 = vmatpush.msrb.mxu3 %v2941_v51 }
 0x951   : > { %3399 = vst.msk [vmem:[#allocation2 + $0x70] sm:$0xff] %vm1272_vm0, %v5701_v5  ;;  %v2918_v49 = vpop.permute.xlu2 %2917  ;;  %v2929_v52 = vld [vmem:[#allocation2 + $0x10] sm:$0xff] }
 0x952   : > { %2926 = vst.msk [vmem:[#allocation2 + $0x98] sm:$0xff] %vm1386_vm2, %v2918_v49  ;;  %v2880_v22 = vpop.permute.xlu0 %2879 }
 0x953   : > { %v2940_v59 = vld [vmem:[#allocation2 + $0x68] sm:$0xff]  ;;  %3387 = vst.msk [vmem:[#allocation2 + $0x10] sm:$0xff] %vm1272_vm0, %v5701_v5 }
 0x954   : > { %2889 = vst.msk [vmem:[#allocation2 + $0x30] sm:$0xff] %vm1339_vm1, %v2880_v22  ;;  %2981 = vmatpush.msrb.mxu3 %v2940_v59 }
 0x955   : > { %3398 = vst.msk [vmem:[#allocation2 + $0x68] sm:$0xff] %vm1272_vm0, %v5701_v5 }
 0x956   : > { %2982 = vmatpush.msrb.mxu3 %v2939_v27 }
 0x957   : > { %v2876_v50 = vpop.permute.xlu1 %2875  ;;  %v2934_v28 = vld [vmem:[#allocation2 + $0x38] sm:$0xff] }
 0x958   : > { %2887 = vst.msk [vmem:[#allocation2 + $0x20] sm:$0xff] %vm1339_vm1, %v2876_v50  ;;  %2983 = vmatpush.msrb.mxu3 %v2938_v30 }
 0x959   : > { %3392 = vst.msk [vmem:[#allocation2 + $0x38] sm:$0xff] %vm1272_vm0, %v5701_v5  ;;  %v2912_v21 = vpop.permute.xlu2 %2911  ;;  %v2946_v61 = vld [vmem:[#allocation2 + $0x98] sm:$0xff] }
 0x95a   : > { %2923 = vst.msk [vmem:[#allocation2 + $0x80] sm:$0xff] %vm1386_vm2, %v2912_v21  ;;  %2984 = vmatpush.msrb.mxu3 %v6923_v63  ;;  %3020 = vmatpush.msra.mxu0 %v2946_v61  ;;  %v2866_v53 = vpop.permute.xlu0 %2865 }
 0x95b   : > { %3404 = vst.msk [vmem:[#allocation2 + $0x98] sm:$0xff] %vm1272_vm0, %v5701_v5  ;;  %v2933_v56 = vld [vmem:[#allocation2 + $0x30] sm:$0xff] }
 0x95c   : > { %2874 = vst.msk [vmem:[#allocation2 + $0x18] sm:$0xff] %vm1318_vm4, %v2866_v53  ;;  %2985 = vmatpush.msrb.mxu3 %v6935_v58 }
 0x95d   : > { %3391 = vst.msk [vmem:[#allocation2 + $0x30] sm:$0xff] %vm1272_vm0, %v5701_v5 }
 0x95e   : > { %2986 = vmatpush.msrb.mxu3 %v6928_v48 }
 0x95f   : > { %v2862_v54 = vpop.permute.xlu1 %2861  ;;  %v2931_v7 = vld [vmem:[#allocation2 + $0x20] sm:$0xff] }
 0x960   : > { %2872 = vst.msk [vmem:[#allocation2 + $0x8] sm:$0xff] %vm1318_vm4, %v2862_v54  ;;  %2987 = vmatpush.msrb.mxu3 %v2934_v28 }
 0x961   : > { %3389 = vst.msk [vmem:[#allocation2 + $0x20] sm:$0xff] %vm1272_vm0, %v5701_v5  ;;  %v2943_v9 = vld [vmem:[#allocation2 + $0x80] sm:$0xff]  ;;  %v2960_v58 = vpop.permute.xlu2 %2959 }
 0x962   : > { %2988 = vmatpush.msrb.mxu3 %v2933_v56  ;;  %3401 = vst.msk [vmem:[#allocation2 + $0x80] sm:$0xff] %vm1272_vm0, %v5701_v5  ;;  %v2860_v38 = vpop.permute.xlu0 %2859 }
 0x963   : > { %2871 = vst.msk [vmem:[#allocation2] sm:$0xff] %vm1318_vm4, %v2860_v38  ;;  %v2930_v11 = vld [vmem:[#allocation2 + $0x18] sm:$0xff] }
 0x964   : > { %2989 = vmatpush.msrb.mxu3 %v2932_v17  ;;  %3388 = vst.msk [vmem:[#allocation2 + $0x18] sm:$0xff] %vm1272_vm0, %v5701_v5  ;;  %v2334_v17 = vld [vmem:[#allocation24 + $0x10] sm:$0xff] }
 0x966   : > { %2990 = vmatpush.msrb.mxu3 %v2931_v7 }
 0x967   : > { %v2916_v62 = vpop.permute.xlu1 %2915  ;;  %v2928_v26 = vld [vmem:[#allocation2 + $0x8] sm:$0xff] }
 0x968   : > { %2925 = vst.msk [vmem:[#allocation2 + $0x90] sm:$0xff] %vm1386_vm2, %v2916_v62  ;;  %2991 = vmatpush.msrb.mxu3 %v2930_v11 }
 0x969   : > { %3386 = vst.msk [vmem:[#allocation2 + $0x8] sm:$0xff] %vm1272_vm0, %v5701_v5 }
 0x96a   : > { %2992 = vmatpush.msrb.mxu3 %v2929_v52  ;;  %v2914_v42 = vpop.permute.xlu0 %2913  ;;  %v2927_v16 = vld [vmem:[#allocation2] sm:$0xff] }
 0x96b   : > { %2924 = vst.msk [vmem:[#allocation2 + $0x88] sm:$0xff] %vm1386_vm2, %v2914_v42 }
 0x96c   : > { %2993 = vmatpush.msrb.mxu3 %v2928_v26  ;;  %3385 = vst.msk [vmem:[#allocation2] sm:$0xff] %vm1272_vm0, %v5701_v5 }
 0x96e   : > { %2994 = vmatpush.msrb.mxu3 %v2927_v16 }
 0x96f   : > { %v2945_v20 = vld [vmem:[#allocation2 + $0x90] sm:$0xff]  ;;  %2995 = vmatmul.f32.vlgmr.msrb.gmra.mxu3 %v2320_v43  ;;  %v2950_v8 = vpop.permute.xlu1 %2949 }
 0x970   : > { %3021 = vmatpush.msra.mxu0 %v2945_v20  ;;  %3403 = vst.msk [vmem:[#allocation2 + $0x90] sm:$0xff] %vm1272_vm0, %v5701_v5 }
 0x972   : > { %v2944_v18 = vld [vmem:[#allocation2 + $0x88] sm:$0xff]  ;;  %v2955_v29 = vpop.permute.xlu0 %2954 }
 0x973   : > { %3022 = vmatpush.msra.mxu0 %v2944_v18  ;;  %3402 = vst.msk [vmem:[#allocation2 + $0x88] sm:$0xff] %vm1272_vm0, %v5701_v5 }
 0x975   : > { %3023 = vmatpush.msra.mxu0 %v2943_v9 }
 0x976   : > { %4591 = vmatmul.msk.f32.vlgmr.msra.gmra.mxu0 %vm1942_vm10, %v2321_v57 }
 0x977   : > { %2998 = vmatmul.f32.gmra.mxu3 %v2322_v2  ;;  %v2965_v36 = vpop.permute.xlu1 %2964 }
 0x97e   : > { %4592 = vmatmul.msk.f32.gmra.mxu0 %vm1942_vm10, %v2323_v24 }
 0x97f   : > { %3001 = vmatmul.f32.gmra.mxu3 %v2324_v3 }
 0x986   : > { %4593 = vmatmul.msk.f32.gmra.mxu0 %vm1942_vm10, %v2325_v45  ;;  %v2333_v45 = vld [vmem:[#allocation24 + $0x8] sm:$0xff] }
 0x987   : > { %3004 = vmatmul.f32.gmra.mxu3 %v2326_v12 }
 0x98e   : > { %4594 = vmatmul.msk.f32.gmra.mxu0 %vm1942_vm10, %v2327_v41  ;;  %v2335_v41 = vld [vmem:[#allocation24 + $0x18] sm:$0xff] }
 0x9f2   : > { %v2996_v47 = vpop.f32.mrf.mxu3 }
 0x9f3   : > { %v2997_v4 = vadd.f32 %v2996_v47, %v2950_v8  ;;  %v3025_v60 = vpop.f32.mrf.mxu0  ;;  %v2337_v8 = vld [vmem:[#allocation26 + $0x8] sm:$0xff]  ;;  %v2339_v47 = vld [vmem:[#allocation26 + $0x18] sm:$0xff] }
 0x9f5   : > { %v3026_v37 = vadd.f32 %v3025_v60, %v2997_v4  ;;  %v2338_v4 = vld [vmem:[#allocation26 + $0x10] sm:$0xff]  ;;  %v2332_v60 = vld [vmem:[#allocation24] sm:$0xff] }
 0x9f7   : > { %v3037_v25 = vsel %vm1272_vm0, %v3026_v37, 0.0 }
 0x9f8   : > { %3038 = vadd.xlane.f32.xlu0 %v3037_v25 }
 0x9fa   : > { %v2999_v14 = vpop.f32.mrf.mxu3 }
 0x9fb   : > { %v3000_v19 = vadd.f32 %v2999_v14, %v2955_v29  ;;  %v3028_v63 = vpop.f32.mrf.mxu0 }
 0x9fd   : > { %v3029_v48 = vadd.f32 %v3028_v63, %v3000_v19 }
 0x9ff   : > { %v3040_v30 = vsel %vm1272_vm0, %v3029_v48, 0.0 }
 0xa00   : > { %3041 = vadd.xlane.f32.xlu2 %v3040_v30 }
 0xa02   : > { %v3002_v0 = vpop.f32.mrf.mxu3 }
 0xa03   : > { %v3003_v31 = vadd.f32 %v3002_v0, %v2960_v58  ;;  %v3031_v32 = vpop.f32.mrf.mxu0 }
 0xa05   : > { %v3032_v33 = vadd.f32 %v3031_v32, %v3003_v31 }
 0xa07   : > { %v3043_v35 = vsel %vm1272_vm0, %v3032_v33, 0.0 }
 0xa08   : > { %3044 = vadd.xlane.f32.xlu1 %v3043_v35 }
 0xa0a   : > { %v3005_v40 = vpop.f32.mrf.mxu3 }
 0xa0b   : > { %v3006_v10 = vadd.f32 %v3005_v40, %v2965_v36  ;;  %v3034_v27 = vpop.f32.mrf.mxu0 }
 0xa0d   : > { %v3035_v1 = vadd.f32 %v3034_v27, %v3006_v10 }
 0xa0f   : > { %v3046_v13 = vsel %vm1272_vm0, %v3035_v1, 0.0 }
 0xa10   : > { %3047 = vadd.xlane.f32.xlu0 %v3046_v13 }
 0xa24   : > { %3124 = vperm.xlu0 %4838, %v2334_v17  }
 0xa6b   : > { %v3039_v46 = vpop.xlane.xlu0 %3038 }
 0xa6c   : > { %v3049_v52 = vmul.f32 %v3039_v46, %v6333_v34 }
 0xa73   : > { %v3042_v44 = vpop.xlane.xlu2 %3041 }
 0xa74   : > { %v3050_v49 = vmul.f32 %v3042_v44, %v6333_v34 }
 0xa76   : > { %v3053_v59 = vadd.f32 %v3050_v49, %v3049_v52 }
 0xa7b   : > { %v3045_v51 = vpop.xlane.xlu1 %3044 }
 0xa7c   : > { %v3051_v22 = vmul.f32 %v3045_v51, %v6333_v34 }
 0xa7e   : > { %v3054_v28 = vadd.f32 %v3053_v59, %v3051_v22 }
 0xa83   : > { %v3048_v50 = vpop.xlane.xlu0 %3047 }
 0xa84   : > { %v3052_v21 = vmul.f32 %v3048_v50, %v6333_v34 }
 0xa86   : > { %v3055_v61 = vadd.f32 %v3054_v28, %v3052_v21 }
 0xa88   : > { %v3056_v53 = vrot.slane %v3055_v61, 4 }
 0xa8a   : > { %v3057_v54 = vadd.f32 %v3056_v53, %v3055_v61 }
 0xa8c   : > { %v3058_v56 = vrot.slane %v3057_v54, 2 }
 0xa8e   : > { %v3059_v7 = vadd.f32 %v3058_v56, %v3057_v54 }
 0xa90   : > { %v3060_v9 = vrot.slane %v3059_v7, 1 }
 0xa92   : > { %v3061_v38 = vadd.f32 %v3060_v9, %v3059_v7 }
 0xa94   : > { %v3062_v11 = vmul.f32 %v3061_v38, %v6339_v55 }
 0xa96   : > { %v7038_v62 = vsub.f32 %v3032_v33, %v3062_v11  ;;  %v7040_v26 = vsub.f32 %v3029_v48, %v3062_v11  ;;  %v7042_v42 = vsub.f32 %v3026_v37, %v3062_v11  ;;  %v3066_v3 = vsub.f32 %v3035_v1, %v3062_v11  ;;  %v2336_v37 = vld [vmem:[#allocation26] sm:$0xff]  ;;  %v3125_v25 = vpop.permute.xlu0 %3124 }
 0xa98   : > { %v3069_v16 = vmul.f32 %v7038_v62, %v7038_v62  ;;  %v3068_v43 = vmul.f32 %v7040_v26, %v7040_v26  ;;  %v3067_v20 = vmul.f32 %v7042_v42, %v7042_v42  ;;  %v3070_v24 = vmul.f32 %v3066_v3, %v3066_v3 }
 0xa9a   : > { %v3077_v18 = vsel %vm1272_vm0, %v3069_v16, 0.0  ;;  %v3074_v2 = vsel %vm1272_vm0, %v3068_v43, 0.0  ;;  %v3071_v57 = vsel %vm1272_vm0, %v3067_v20, 0.0  ;;  %v3080_v12 = vsel %vm1272_vm0, %v3070_v24, 0.0 }
 0xa9b   : > { %3078 = vadd.xlane.f32.xlu0 %v3077_v18  ;;  %3075 = vadd.xlane.f32.xlu1 %v3074_v2 }
 0xa9c   : > { %3072 = vadd.xlane.f32.xlu2 %v3071_v57 }
 0xaa4   : > { %3081 = vadd.xlane.f32.xlu2 %v3080_v12 }
 0xaaf   : > { %3119 = vperm.xlu0 %4838, %v2333_v45  }
 0xab4   : > { %3129 = vperm.xlu1 %4839, %v2335_v41  }
 0xab7   : > { %3143 = vperm.xlu0 %4838, %v2337_v8  }
 0xabc   : > { %3153 = vperm.xlu2 %4837, %v2339_v47   ;;  %3148 = vperm.xlu1 %4839, %v2338_v4  }
 0xac4   : > { %3114 = vperm.xlu2 %4837, %v2332_v60   ;;  %3138 = vperm.xlu1 %4839, %v2336_v37  }
 0xb0e   : > { %v3076_v29 = vpop.xlane.xlu1 %3075  ;;  %v3079_v48 = vpop.xlane.xlu0 %3078 }
 0xb0f   : > { %v3073_v14 = vpop.xlane.xlu2 %3072  ;;  %v3084_v19 = vmul.f32 %v3076_v29, %v6333_v34  ;;  %v3085_v58 = vmul.f32 %v3079_v48, %v6333_v34 }
 0xb10   : > { %v3083_v63 = vmul.f32 %v3073_v14, %v6333_v34 }
 0xb12   : > { %v3087_v30 = vadd.f32 %v3084_v19, %v3083_v63 }
 0xb14   : > { %v3088_v31 = vadd.f32 %v3087_v30, %v3085_v58 }
 0xb17   : > { %v3082_v0 = vpop.xlane.xlu2 %3081 }
 0xb18   : > { %v3086_v32 = vmul.f32 %v3082_v0, %v6333_v34 }
 0xb1a   : > { %v3089_v33 = vadd.f32 %v3088_v31, %v3086_v32 }
 0xb1c   : > { %v3090_v35 = vrot.slane %v3089_v33, 4 }
 0xb1e   : > { %v3091_v36 = vadd.f32 %v3090_v35, %v3089_v33 }
 0xb1f   : > { %v3154_v49 = vpop.permute.xlu2 %3153 }
 0xb20   : > { %v3092_v40 = vrot.slane %v3091_v36, 2 }
 0xb21   : > { %v3120_v59 = vpop.permute.xlu0 %3119 }
 0xb22   : > { %v3093_v10 = vadd.f32 %v3092_v40, %v3091_v36 }
 0xb24   : > { %v3094_v27 = vrot.slane %v3093_v10, 1 }
 0xb26   : > { %v3095_v1 = vadd.f32 %v3094_v27, %v3093_v10  ;;  %v3130_v46 = vpop.permute.xlu1 %3129 }
 0xb27   : > { %v3115_v9 = vpop.permute.xlu2 %3114 }
 0xb28   : > { %v3096_v13 = vmul.f32 %v3095_v1, %v6339_v55 }
 0xb29   : > { %v3144_v20 = vpop.permute.xlu0 %3143 }
 0xb2a   : > { %v3097_v17 = vadd.f32 1e-05, %v3096_v13 }
 0xb2c   : > { %4898 = vrsqrt.f32 %v3097_v17  ;;  %vm3104_vm7 = vweird.f32 %v3097_v17 }
 0xb2e   : > { %v3149_v50 = vpop.permute.xlu1 %3148 }
 0xb32   : > { %v4899_v44 = vpop.eup %4898 }
 0xb33   : > { %v3099_v51 = vmul.f32 %v4899_v44, %v3097_v17  ;;  %vm3105_vm6 = vweird.f32 %v4899_v44 }
 0xb34   : > { %vm3106_vm8 = vmor %vm3104_vm7, %vm3105_vm6 }
 0xb35   : > { %v3100_v52 = vmul.f32 %v4899_v44, %v3099_v51 }
 0xb36   : > { %v3139_v18 = vpop.permute.xlu1 %3138 }
 0xb37   : > { %v3101_v22 = vmul.f32 0.5, %v3100_v52 }
 0xb39   : > { %v3102_v28 = vsub.f32 1.5, %v3101_v22 }
 0xb3b   : > { %v3103_v21 = vmul.f32 %v4899_v44, %v3102_v28 }
 0xb3d   : > { %v3107_v61 = vsel %vm3106_vm8, %v4899_v44, %v3103_v21 }
 0xb3e   : > { %v3109_v53 = vmul.f32 %v3107_v61, %v7040_v26  ;;  %v3111_v54 = vmul.f32 %v3107_v61, %v3066_v3  ;;  %v3108_v56 = vmul.f32 %v3107_v61, %v7042_v42  ;;  %v3110_v7 = vmul.f32 %v3107_v61, %v7038_v62 }
 0xb40   : > { %v3133_v38 = vmul.f32 %v3120_v59, %v3109_v53  ;;  %v3135_v11 = vmul.f32 %v3130_v46, %v3111_v54  ;;  %v3132_v16 = vmul.f32 %v3115_v9, %v3108_v56  ;;  %v3134_v43 = vmul.f32 %v3125_v25, %v3110_v7 }
 0xb42   : > { %v7062_v2 = vadd.f32 %v3154_v49, %v3135_v11  ;;  %v7064_v57 = vadd.f32 %v3144_v20, %v3133_v38  ;;  %v7066_v24 = vadd.f32 %v3149_v50, %v3134_v43  ;;  %v7068_v12 = vadd.f32 %v3139_v18, %v3132_v16 }
 0xb44   : > { %v7071_v26 = vmul.f32 0.70710677, %v7062_v2  ;;  %v7074_v62 = vmul.f32 0.70710677, %v7064_v57  ;;  %v7077_v42 = vmul.f32 0.70710677, %v7066_v24 }
 0xb45   : > { %v7080_v3 = vmul.f32 0.70710677, %v7068_v12 }
 0xb46   : > { %v7083_v45 = vand.u32 2147483647, %v7071_v26  ;;  %v7086_v41 = vand.u32 2147483647, %v7074_v62  ;;  %v7089_v8 = vand.u32 2147483647, %v7077_v42 }
 0xb47   : > { %v7092_v47 = vand.u32 2147483647, %v7080_v3 }
 0xb48   : > { %v3175_v4 = vmul.f32 0.3275911, %v7083_v45  ;;  %v3173_v60 = vmul.f32 0.3275911, %v7086_v41  ;;  %v3174_v37 = vmul.f32 0.3275911, %v7089_v8 }
 0xb49   : > { %v3172_v14 = vmul.f32 0.3275911, %v7092_v47  ;;  %v3279_v35 = vsub.f32 0.0, %v7083_v45  ;;  %v3277_v10 = vsub.f32 0.0, %v7086_v41  ;;  %v3278_v27 = vsub.f32 0.0, %v7089_v8 }
 0xb4a   : > { %v3179_v25 = vadd.f32 1.0, %v3175_v4  ;;  %v3177_v29 = vadd.f32 1.0, %v3173_v60  ;;  %v3178_v19 = vadd.f32 1.0, %v3174_v37 }
 0xb4b   : > { %v7098_v63 = vadd.f32 1.0, %v3172_v14 }
 0xb4c   : > { %4900 = vrcp.f32 %v3179_v25  ;;  %v3234_v0 = vand.u32 2147483647, %v3179_v25  ;;  %v3236_v33 = vand.u32 2147483648, %v3179_v25  ;;  %v3204_v36 = vand.u32 2147483647, %v3177_v29 }
 0xb4d   : > { %4902 = vrcp.f32 %v3177_v29  ;;  %vm3230_vm9 = vweird.f32 %v3179_v25  ;;  %vm3200_vm12 = vweird.f32 %v3177_v29  ;;  %v3206_v17 = vand.u32 2147483648, %v3177_v29 }
 0xb4e   : > { %4904 = vrcp.f32 %v3178_v19  ;;  %vm7104_vm13 = vcmp.eq.f32.partialorder %v3234_v0, 8.507059e+37  ;;  %v3237_v22 = vor.u32 1.1754944e-38, %v3236_v33  ;;  %vm7108_vm15 = vcmp.eq.f32.partialorder %v3204_v36, 8.507059e+37 }
 0xb4f   : > { %4906 = vrcp.f32 %v7098_v63  ;;  %vm3215_vm5 = vweird.f32 %v3178_v19  ;;  %v3219_v21 = vand.u32 2147483647, %v3178_v19  ;;  %v3207_v54 = vor.u32 1.1754944e-38, %v3206_v17 }
 0xb50   : > { %v3221_v56 = vand.u32 2147483648, %v3178_v19  ;;  %v3189_v20 = vand.u32 2147483647, %v7098_v63  ;;  %v3191_v18 = vand.u32 2147483648, %v7098_v63  ;;  %v3276_v17 = vsub.f32 0.0, %v7092_v47 }
 0xb52   : > { %v4901_v48 = vpop.eup %4900  ;;  %v3222_v14 = vor.u32 1.1754944e-38, %v3221_v56  ;;  %v3192_v33 = vor.u32 1.1754944e-38, %v3191_v18 }
 0xb53   : > { %v4903_v30 = vpop.eup %4902  ;;  %v3226_v58 = vmul.f32 %v4901_v48, %v3179_v25  ;;  %vm3231_vm11 = vweird.f32 %v4901_v48 }
 0xb54   : > { %v3196_v31 = vmul.f32 %v4903_v30, %v3177_v29  ;;  %v4905_v1 = vpop.eup %4904  ;;  %vm3201_vm14 = vweird.f32 %v4903_v30  ;;  %vm3232_vm6 = vmor %vm3230_vm9, %vm3231_vm11  ;;  %v3283_v29 = vmul.f32 %v3279_v35, %v7083_v45 }
 0xb55   : > { %v3227_v32 = vsub.f32 1.0, %v3226_v58  ;;  %v3211_v51 = vmul.f32 %v4905_v1, %v3178_v19  ;;  %v4907_v49 = vpop.eup %4906  ;;  %vm3202_vm7 = vmor %vm3200_vm12, %vm3201_vm14  ;;  %vm3216_vm8 = vweird.f32 %v4905_v1  ;;  %vm3220_vm12 = vcmp.eq.f32.partialorder %v3219_v21, 8.507059e+37 }
 0xb56   : > { %v3197_v40 = vsub.f32 1.0, %v3196_v31  ;;  %v3181_v61 = vmul.f32 %v4907_v49, %v7098_v63  ;;  %vm3186_vm9 = vweird.f32 %v4907_v49  ;;  %vm3217_vm11 = vmor %vm3215_vm5, %vm3216_vm8  ;;  %v3281_v31 = vmul.f32 %v3277_v10, %v7086_v41 }
 0xb57   : > { %v3228_v13 = vmul.f32 %v4901_v48, %v3227_v32  ;;  %v3212_v28 = vsub.f32 1.0, %v3211_v51  ;;  %v3290_v19 = vmul.f32 1.442695, %v3283_v29  ;;  %v3282_v41 = vmul.f32 %v3278_v27, %v7089_v8 }
 0xb58   : > { %v3198_v44 = vmul.f32 %v4903_v30, %v3197_v40  ;;  %v3182_v11 = vsub.f32 1.0, %v3181_v61  ;;  %vm3303_vm5 = vcmp.ge.f32.partialorder %v7071_v26, 0.0  ;;  %vm3300_vm8 = vcmp.ge.f32.partialorder %v7080_v3, 0.0 }
 0xb59   : > { %v3229_v52 = vadd.f32 %v4901_v48, %v3228_v13  ;;  %v3213_v38 = vmul.f32 %v4905_v1, %v3212_v28  ;;  %4908 = vpow2.f32 %v3290_v19 }
 0xb5a   : > { %v3199_v50 = vadd.f32 %v4903_v30, %v3198_v44  ;;  %v3183_v37 = vmul.f32 %v4907_v49, %v3182_v11 }
 0xb5b   : > { %v3233_v53 = vsel %vm3232_vm6, %v4901_v48, %v3229_v52  ;;  %v3214_v60 = vadd.f32 %v4905_v1, %v3213_v38  ;;  %vm3301_vm6 = vcmp.ge.f32.partialorder %v7074_v62, 0.0  ;;  %v3162_v62 = vmul.f32 0.5, %v7066_v24 }
 0xb5c   : > { %v3238_v7 = vsel %vm7104_vm13, %v3237_v22, %v3233_v53  ;;  %v3203_v9 = vsel %vm3202_vm7, %v4903_v30, %v3199_v50  ;;  %v3184_v58 = vadd.f32 %v4907_v49, %v3183_v37  ;;  %vm3185_vm13 = vweird.f32 %v7098_v63 }
 0xb5d   : > { %v3243_v16 = vmul.f32 1.0614054, %v3238_v7  ;;  %v3208_v43 = vsel %vm7108_vm15, %v3207_v54, %v3203_v9  ;;  %v3218_v30 = vsel %vm3217_vm11, %v4905_v1, %v3214_v60  ;;  %vm3187_vm14 = vmor %vm3185_vm13, %vm3186_vm9  ;;  %vm3190_vm15 = vcmp.eq.f32.partialorder %v3189_v20, 8.507059e+37 }
 0xb5e   : > { %v3241_v4 = vmul.f32 1.0614054, %v3208_v43  ;;  %v3223_v32 = vsel %vm3220_vm12, %v3222_v14, %v3218_v30  ;;  %v3188_v13 = vsel %vm3187_vm14, %v4907_v49, %v3184_v58  ;;  %v3286_v63 = vmul.f32 1.442695, %v3281_v31 }
 0xb5f   : > { %v4598_v25 = vadd.f32 -1.4531521, %v3243_v16  ;;  %v3242_v40 = vmul.f32 1.0614054, %v3223_v32  ;;  %v3193_v35 = vsel %vm3190_vm15, %v3192_v33, %v3188_v13  ;;  %v3280_v49 = vmul.f32 %v3276_v17, %v7092_v47  ;;  %v4909_v18 = vpop.eup %4908 }
 0xb60   : > { %v4596_v48 = vadd.f32 -1.4531521, %v3241_v4  ;;  %v3240_v44 = vmul.f32 1.0614054, %v3193_v35  ;;  %4910 = vpow2.f32 %v3286_v63  ;;  %v3288_v53 = vmul.f32 1.442695, %v3282_v41 }
 0xb61   : > { %v3251_v0 = vmul.f32 %v4598_v25, %v3238_v7  ;;  %v4597_v1 = vadd.f32 -1.4531521, %v3242_v40  ;;  %v3284_v11 = vmul.f32 1.442695, %v3280_v49  ;;  %vm3302_vm7 = vcmp.ge.f32.partialorder %v7077_v42, 0.0 }
 0xb62   : > { %v3249_v36 = vmul.f32 %v4596_v48, %v3208_v43  ;;  %v4595_v22 = vadd.f32 -1.4531521, %v3240_v44  ;;  %4912 = vpow2.f32 %v3288_v53  ;;  %v3366_v53 = vld [vmem:[#allocation29 + $0x18] sm:$0xff] }
 0xb63   : > { %v3255_v45 = vadd.f32 1.4214138, %v3251_v0  ;;  %v3250_v52 = vmul.f32 %v4597_v1, %v3223_v32  ;;  %4914 = vpow2.f32 %v3284_v11 }
 0xb64   : > { %v3253_v46 = vadd.f32 1.4214138, %v3249_v36  ;;  %v3248_v21 = vmul.f32 %v4595_v22, %v3193_v35 }
 0xb65   : > { %v3259_v51 = vmul.f32 %v3255_v45, %v3238_v7  ;;  %v3254_v28 = vadd.f32 1.4214138, %v3250_v52  ;;  %v3163_v45 = vmul.f32 0.5, %v7062_v2 }
 0xb66   : > { %v3257_v10 = vmul.f32 %v3253_v46, %v3208_v43  ;;  %v3252_v9 = vadd.f32 1.4214138, %v3248_v21  ;;  %v4911_v37 = vpop.eup %4910  ;;  %v3363_v21 = vld [vmem:[#allocation29] sm:$0xff] }
 0xb67   : > { %v4602_v59 = vadd.f32 -0.28449672, %v3259_v51  ;;  %v3258_v56 = vmul.f32 %v3254_v28, %v3223_v32  ;;  %v3364_v28 = vld [vmem:[#allocation29 + $0x8] sm:$0xff] }
 0xb68   : > { %v4600_v50 = vadd.f32 -0.28449672, %v3257_v10  ;;  %v3256_v27 = vmul.f32 %v3252_v9, %v3193_v35  ;;  %v4913_v33 = vpop.eup %4912 }
 0xb69   : > { %v3267_v61 = vmul.f32 %v4602_v59, %v3238_v7  ;;  %v4601_v8 = vadd.f32 -0.28449672, %v3258_v56 }
 0xb6a   : > { %v3265_v54 = vmul.f32 %v4600_v50, %v3208_v43  ;;  %v4599_v60 = vadd.f32 -0.28449672, %v3256_v27 }
 0xb6b   : > { %v3271_v38 = vadd.f32 0.2548296, %v3267_v61  ;;  %v3266_v47 = vmul.f32 %v4601_v8, %v3223_v32  ;;  %v3365_v61 = vld [vmem:[#allocation29 + $0x10] sm:$0xff] }
 0xb6c   : > { %v3269_v16 = vadd.f32 0.2548296, %v3265_v54  ;;  %v3264_v48 = vmul.f32 %v4599_v60, %v3193_v35 }
 0xb6d   : > { %v3275_v20 = vmul.f32 %v3271_v38, %v3238_v7  ;;  %v3270_v14 = vadd.f32 0.2548296, %v3266_v47 }
 0xb6e   : > { %v3273_v4 = vmul.f32 %v3269_v16, %v3208_v43  ;;  %v3268_v31 = vadd.f32 0.2548296, %v3264_v48  ;;  %v4915_v43 = vpop.eup %4914 }
 0xb6f   : > { %v3295_v25 = vmul.f32 %v4909_v18, %v3275_v20  ;;  %v3274_v0 = vmul.f32 %v3270_v14, %v3223_v32  ;;  %v3161_v32 = vmul.f32 0.5, %v7064_v57 }
 0xb70   : > { %v3293_v29 = vmul.f32 %v4911_v37, %v3273_v4  ;;  %v3272_v13 = vmul.f32 %v3268_v31, %v3193_v35 }
 0xb71   : > { %v3299_v30 = vsub.f32 1.0, %v3295_v25  ;;  %v3294_v40 = vmul.f32 %v4913_v33, %v3274_v0 }
 0xb72   : > { %v3297_v58 = vsub.f32 1.0, %v3293_v29  ;;  %v3292_v44 = vmul.f32 %v4915_v43, %v3272_v13 }
 0xb73   : > { %v3307_v36 = vsub.f32 0.0, %v3299_v30  ;;  %v3298_v1 = vsub.f32 1.0, %v3294_v40 }
 0xb74   : > { %v3305_v7 = vsub.f32 0.0, %v3297_v58  ;;  %v3296_v10 = vsub.f32 1.0, %v3292_v44 }
 0xb75   : > { %v3311_v19 = vsel %vm3303_vm5, %v3299_v30, %v3307_v36  ;;  %v3306_v41 = vsub.f32 0.0, %v3298_v1 }
 0xb76   : > { %v3315_v17 = vadd.f32 1.0, %v3311_v19  ;;  %v3309_v46 = vsel %vm3301_vm6, %v3297_v58, %v3305_v7  ;;  %v3304_v2 = vsub.f32 0.0, %v3296_v10 }
 0xb77   : > { %v3313_v51 = vadd.f32 1.0, %v3309_v46  ;;  %v3310_v52 = vsel %vm3302_vm7, %v3298_v1, %v3306_v41  ;;  %v3355_v46 = vld [vmem:[%s7597_s10] sm:$0xff]  ;;  %v3356_v1 = vld [vmem:[%s7597_s10 + $0x8] sm:$0xff]  ;;  %v3361_v41 = vld [vmem:[%s7597_s10 + $0x30] sm:$0xff] }
 0xb78   : > { %v3319_v63 = vmul.f32 %v3315_v17, %v3163_v45  ;;  %v3314_v59 = vadd.f32 1.0, %v3310_v52  ;;  %v3308_v57 = vsel %vm3300_vm8, %v3296_v10, %v3304_v2  ;;  %v3362_v10 = vld [vmem:[%s7597_s10 + $0x38] sm:$0xff] }
 0xb79   : > { %v3317_v26 = vmul.f32 %v3313_v51, %v3161_v32  ;;  %v3312_v49 = vadd.f32 1.0, %v3308_v57  ;;  %v3357_v32 = vld [vmem:[%s7597_s10 + $0x10] sm:$0xff]  ;;  %v3358_v51 = vld [vmem:[%s7597_s10 + $0x18] sm:$0xff] }
 0xb7a   : > { %v3323_v35 = vadd.f32 %v3319_v63, %v6659_v15  ;;  %v3318_v42 = vmul.f32 %v3314_v59, %v3162_v62  ;;  %v3160_v15 = vmul.f32 0.5, %v7068_v12  ;;  %v3359_v63 = vld [vmem:[%s7597_s10 + $0x20] sm:$0xff] }
 0xb7b   : > { %v3321_v22 = vadd.f32 %v3317_v26, %v6678_v6 }
 0xb7c   : > { %3449 = vst.msk [vmem:[#allocation2 + $0x58] sm:$0xff] %vm1272_vm0, %v3323_v35  ;;  %3456 = vrot.lane.b32.xlu2 %v3323_v35, %s5698_s27  ;;  %3344 = vmatpush.msra.mxu2 %v3323_v35  ;;  %v3322_v6 = vadd.f32 %v3318_v42, %v6656_v39  ;;  %v3316_v24 = vmul.f32 %v3312_v49, %v3160_v15 }
 0xb7d   : > { %3447 = vst.msk [vmem:[#allocation2 + $0x48] sm:$0xff] %vm1272_vm0, %v3321_v22  ;;  %3452 = vrot.lane.b32.xlu1 %v3321_v22, %s5698_s27 }
 0xb7e   : > { %3448 = vst.msk [vmem:[#allocation2 + $0x50] sm:$0xff] %vm1272_vm0, %v3322_v6  ;;  %v3320_v3 = vadd.f32 %v3316_v24, %v6673_v23  ;;  %3454 = vrot.lane.b32.xlu0 %v3322_v6, %s5698_s27  ;;  %3345 = vmatpush.msra.mxu2 %v3322_v6 }
 0xb80   : > { %3446 = vst.msk [vmem:[#allocation2 + $0x40] sm:$0xff] %vm1272_vm0, %v3320_v3  ;;  %3346 = vmatpush.msra.mxu2 %v3321_v22 }
 0xb82   : > { %3347 = vmatpush.msra.mxu2 %v3320_v3 }
 0xb83   : > { %v7150_v50 = vld [vmem:[#allocation2 + $0x58] sm:$0xff] }
 0xb84   : > { %3450 = vrot.lane.b32.xlu2 %v3320_v3, %s5698_s27  ;;  %3886 = vst.msk [vmem:[#allocation2 + $0x58] sm:$0xff] %vm1272_vm0, %v5701_v5  ;;  %v7155_v12 = vld [vmem:[#allocation2 + $0x48] sm:$0xff] }
 0xb85   : > { %3434 = vrot.lane.b32.xlu1 %v3322_v6, %s5699_s2  ;;  %3884 = vst.msk [vmem:[#allocation2 + $0x48] sm:$0xff] %vm1272_vm0, %v5701_v5  ;;  %v7160_v39 = vld [vmem:[#allocation2 + $0x50] sm:$0xff] }
 0xb86   : > { %3436 = vrot.lane.b32.xlu0 %v3323_v35, %s5699_s2  ;;  %3885 = vst.msk [vmem:[#allocation2 + $0x50] sm:$0xff] %vm1272_vm0, %v5701_v5 }
 0xb87   : > { %v7165_v23 = vld [vmem:[#allocation2 + $0x40] sm:$0xff] }
 0xb88   : > { %3883 = vst.msk [vmem:[#allocation2 + $0x40] sm:$0xff] %vm1272_vm0, %v5701_v5 }
 0xb8c   : > { %3432 = vrot.lane.b32.xlu2 %v3321_v22, %s5699_s2 }
 0xb8d   : > { %3430 = vrot.lane.b32.xlu1 %v3320_v3, %s5699_s2 }
 0xb8e   : > { %3472 = vrot.lane.b32.xlu0 %v3323_v35, %s5700_s3 }
 0xb94   : > { %3470 = vrot.lane.b32.xlu2 %v3322_v6, %s5700_s3 }
 0xb95   : > { %3468 = vrot.lane.b32.xlu1 %v3321_v22, %s5700_s3 }
 0xb96   : > { %3420 = vrot.lane.b32.xlu0 %v3323_v35, %s5702_s5 }
 0xb9c   : > { %3418 = vrot.lane.b32.xlu2 %v3322_v6, %s5702_s5 }
 0xb9d   : > { %3416 = vrot.lane.b32.xlu1 %v3321_v22, %s5702_s5 }
 0xb9e   : > { %3466 = vrot.lane.b32.xlu0 %v3320_v3, %s5700_s3 }
 0xba4   : > { %3414 = vrot.lane.b32.xlu2 %v3320_v3, %s5702_s5 }
 0xba5   : > { %3509 = vperm.xlu1 %4839, %v3364_v28  }
 0xba6   : > { %3504 = vperm.xlu0 %4838, %v3363_v21  }
 0xbac   : > { %3514 = vperm.xlu2 %4837, %v3365_v61  }
 0xbae   : > { %3519 = vperm.xlu0 %4838, %v3366_v53  }
 0xbd6   : > { %v3457_v54 = vpop.permute.xlu2 %3456 }
 0xbd7   : > { %3465 = vst.msk [vmem:[#allocation2 + $0x78] sm:$0xff] %vm1365_vm3, %v3457_v54 }
 0xbde   : > { %v3451_v56 = vpop.permute.xlu2 %3450  ;;  %v3497_v9 = vld [vmem:[#allocation2 + $0x78] sm:$0xff] }
 0xbdf   : > { %3462 = vst.msk [vmem:[#allocation2 + $0x60] sm:$0xff] %vm1365_vm3, %v3451_v56  ;;  %3534 = vmatpush.msra.mxu1 %v3497_v9 }
 0xbe0   : > { %3890 = vst.msk [vmem:[#allocation2 + $0x78] sm:$0xff] %vm1272_vm0, %v5701_v5 }
 0xbe6   : > { %v3433_v38 = vpop.permute.xlu2 %3432  ;;  %v3494_v11 = vld [vmem:[#allocation2 + $0x60] sm:$0xff] }
 0xbe7   : > { %3443 = vst.msk [vmem:[#allocation2 + $0x28] sm:$0xff] %vm1339_vm1, %v3433_v38 }
 0xbe8   : > { %3887 = vst.msk [vmem:[#allocation2 + $0x60] sm:$0xff] %vm1272_vm0, %v5701_v5 }
 0xbee   : > { %v3471_v16 = vpop.permute.xlu2 %3470  ;;  %v3487_v27 = vld [vmem:[#allocation2 + $0x28] sm:$0xff] }
 0xbef   : > { %3480 = vst.msk [vmem:[#allocation2 + $0x90] sm:$0xff] %vm1386_vm2, %v3471_v16  ;;  %v3453_v8 = vpop.permute.xlu1 %3452 }
 0xbf0   : > { %3463 = vst.msk [vmem:[#allocation2 + $0x68] sm:$0xff] %vm1365_vm3, %v3453_v8  ;;  %v3455_v20 = vpop.permute.xlu0 %3454 }
 0xbf1   : > { %3880 = vst.msk [vmem:[#allocation2 + $0x28] sm:$0xff] %vm1272_vm0, %v5701_v5 }
 0xbf2   : > { %3464 = vst.msk [vmem:[#allocation2 + $0x70] sm:$0xff] %vm1365_vm3, %v3455_v20 }
 0xbf6   : > { %v3419_v18 = vpop.permute.xlu2 %3418  ;;  %v3500_v60 = vld [vmem:[#allocation2 + $0x90] sm:$0xff] }
 0xbf7   : > { %3428 = vst.msk [vmem:[#allocation2 + $0x10] sm:$0xff] %vm1318_vm4, %v3419_v18  ;;  %v3435_v4 = vpop.permute.xlu1 %3434  ;;  %v3495_v47 = vld [vmem:[#allocation2 + $0x68] sm:$0xff] }
 0xbf8   : > { %3444 = vst.msk [vmem:[#allocation2 + $0x30] sm:$0xff] %vm1339_vm1, %v3435_v4  ;;  %v3437_v37 = vpop.permute.xlu0 %3436 }
 0xbf9   : > { %3888 = vst.msk [vmem:[#allocation2 + $0x68] sm:$0xff] %vm1272_vm0, %v5701_v5  ;;  %v3496_v25 = vld [vmem:[#allocation2 + $0x70] sm:$0xff] }
 0xbfa   : > { %3893 = vst.msk [vmem:[#allocation2 + $0x90] sm:$0xff] %vm1272_vm0, %v5701_v5  ;;  %3535 = vmatpush.msra.mxu1 %v3496_v25 }
 0xbfb   : > { %3445 = vst.msk [vmem:[#allocation2 + $0x38] sm:$0xff] %vm1339_vm1, %v3437_v37 }
 0xbfc   : > { %3889 = vst.msk [vmem:[#allocation2 + $0x70] sm:$0xff] %vm1272_vm0, %v5701_v5  ;;  %3536 = vmatpush.msra.mxu1 %v3495_v47 }
 0xbfe   : > { %v3415_v29 = vpop.permute.xlu2 %3414  ;;  %3537 = vmatpush.msra.mxu1 %v3494_v11  ;;  %v3484_v30 = vld [vmem:[#allocation2 + $0x10] sm:$0xff] }
 0xbff   : > { %3426 = vst.msk [vmem:[#allocation2] sm:$0xff] %vm1318_vm4, %v3415_v29  ;;  %v3431_v14 = vpop.permute.xlu1 %3430  ;;  %v3488_v48 = vld [vmem:[#allocation2 + $0x30] sm:$0xff] }
 0xc00   : > { %3442 = vst.msk [vmem:[#allocation2 + $0x20] sm:$0xff] %vm1339_vm1, %v3431_v14  ;;  %3538 = vmatpush.msra.mxu1 %v7150_v50  ;;  %v3473_v58 = vpop.permute.xlu0 %3472 }
 0xc01   : > { %3881 = vst.msk [vmem:[#allocation2 + $0x30] sm:$0xff] %vm1272_vm0, %v5701_v5 }
 0xc02   : > { %3877 = vst.msk [vmem:[#allocation2 + $0x10] sm:$0xff] %vm1272_vm0, %v5701_v5  ;;  %3539 = vmatpush.msra.mxu1 %v7160_v39  ;;  %v3489_v0 = vld [vmem:[#allocation2 + $0x38] sm:$0xff] }
 0xc03   : > { %3481 = vst.msk [vmem:[#allocation2 + $0x98] sm:$0xff] %vm1386_vm2, %v3473_v58 }
 0xc04   : > { %3882 = vst.msk [vmem:[#allocation2 + $0x38] sm:$0xff] %vm1272_vm0, %v5701_v5  ;;  %3540 = vmatpush.msra.mxu1 %v7155_v12 }
 0xc06   : > { %v3482_v31 = vld [vmem:[#allocation2] sm:$0xff]  ;;  %3541 = vmatpush.msra.mxu1 %v7165_v23  ;;  %v3515_v3 = vpop.permute.xlu2 %3514 }
 0xc07   : > { %v3469_v33 = vpop.permute.xlu1 %3468  ;;  %3875 = vst.msk [vmem:[#allocation2] sm:$0xff] %vm1272_vm0, %v5701_v5  ;;  %v3486_v36 = vld [vmem:[#allocation2 + $0x20] sm:$0xff] }
 0xc08   : > { %3479 = vst.msk [vmem:[#allocation2 + $0x88] sm:$0xff] %vm1386_vm2, %v3469_v33  ;;  %3542 = vmatpush.msra.mxu1 %v3489_v0  ;;  %v3421_v7 = vpop.permute.xlu0 %3420 }
 0xc09   : > { %3879 = vst.msk [vmem:[#allocation2 + $0x20] sm:$0xff] %vm1272_vm0, %v5701_v5 }
 0xc0a   : > { %v3501_v40 = vld [vmem:[#allocation2 + $0x98] sm:$0xff]  ;;  %3429 = vst.msk [vmem:[#allocation2 + $0x18] sm:$0xff] %vm1318_vm4, %v3421_v7  ;;  %3543 = vmatpush.msra.mxu1 %v3488_v48 }
 0xc0b   : > { %3575 = vmatpush.msra.mxu3 %v3501_v40  ;;  %3894 = vst.msk [vmem:[#allocation2 + $0x98] sm:$0xff] %vm1272_vm0, %v5701_v5 }
 0xc0c   : > { %3544 = vmatpush.msra.mxu1 %v3487_v27 }
 0xc0d   : > { %3576 = vmatpush.msra.mxu3 %v3500_v60 }
 0xc0e   : > { %3545 = vmatpush.msra.mxu1 %v3486_v36 }
 0xc0f   : > { %v3417_v13 = vpop.permute.xlu1 %3416  ;;  %v3499_v43 = vld [vmem:[#allocation2 + $0x88] sm:$0xff] }
 0xc10   : > { %3427 = vst.msk [vmem:[#allocation2 + $0x8] sm:$0xff] %vm1318_vm4, %v3417_v13  ;;  %3577 = vmatpush.msra.mxu3 %v3499_v43  ;;  %v3467_v45 = vpop.permute.xlu0 %3466 }
 0xc11   : > { %3892 = vst.msk [vmem:[#allocation2 + $0x88] sm:$0xff] %vm1272_vm0, %v5701_v5  ;;  %v3485_v19 = vld [vmem:[#allocation2 + $0x18] sm:$0xff] }
 0xc12   : > { %3478 = vst.msk [vmem:[#allocation2 + $0x80] sm:$0xff] %vm1386_vm2, %v3467_v45  ;;  %3546 = vmatpush.msra.mxu1 %v3485_v19 }
 0xc13   : > { %3878 = vst.msk [vmem:[#allocation2 + $0x18] sm:$0xff] %vm1272_vm0, %v5701_v5 }
 0xc14   : > { %3547 = vmatpush.msra.mxu1 %v3484_v30 }
 0xc17   : > { %v3483_v17 = vld [vmem:[#allocation2 + $0x8] sm:$0xff]  ;;  %v3510_v57 = vpop.permute.xlu1 %3509 }
 0xc18   : > { %3548 = vmatpush.msra.mxu1 %v3483_v17  ;;  %3876 = vst.msk [vmem:[#allocation2 + $0x8] sm:$0xff] %vm1272_vm0, %v5701_v5  ;;  %v3505_v35 = vpop.permute.xlu0 %3504 }
 0xc19   : > { %v3498_v44 = vld [vmem:[#allocation2 + $0x80] sm:$0xff] }
 0xc1a   : > { %3549 = vmatpush.msra.mxu1 %v3482_v31  ;;  %3578 = vmatpush.msra.mxu3 %v3498_v44  ;;  %3891 = vst.msk [vmem:[#allocation2 + $0x80] sm:$0xff] %vm1272_vm0, %v5701_v5  ;;  %v3360_v5 = vld [vmem:[%s7597_s10 + $0x28] sm:$0xff] }
 0xc1b   : > { %3550 = vmatmul.f32.vlgmr.msra.gmra.mxu1 %v3355_v46  ;;  %4605 = vmatmul.msk.f32.vlgmr.msra.gmra.mxu3 %vm1942_vm10, %v3356_v1  ;;  %v3370_v1 = vld [vmem:[#allocation30 + $0x18] sm:$0xff]  ;;  %v3369_v44 = vld [vmem:[#allocation30 + $0x10] sm:$0xff] }
 0xc20   : > { %v3520_v21 = vpop.permute.xlu0 %3519 }
 0xc23   : > { %3553 = vmatmul.f32.gmra.mxu1 %v3357_v32  ;;  %4606 = vmatmul.msk.f32.gmra.mxu3 %vm1942_vm10, %v3358_v51  ;;  %v3368_v32 = vld [vmem:[#allocation30 + $0x8] sm:$0xff]  ;;  %v3373_v51 = vld [vmem:[#allocation32 + $0x10] sm:$0xff] }
 0xc2b   : > { %3556 = vmatmul.f32.gmra.mxu1 %v3359_v63  ;;  %4607 = vmatmul.msk.f32.gmra.mxu3 %vm1942_vm10, %v3360_v5  ;;  %v3374_v63 = vld [vmem:[#allocation32 + $0x18] sm:$0xff]  ;;  %v3367_v5 = vld [vmem:[#allocation30] sm:$0xff] }
 0xc33   : > { %3559 = vmatmul.f32.gmra.mxu1 %v3361_v41  ;;  %4608 = vmatmul.msk.f32.gmra.mxu3 %vm1942_vm10, %v3362_v10  ;;  %v3371_v41 = vld [vmem:[#allocation32] sm:$0xff]  ;;  %v3372_v10 = vld [vmem:[#allocation32 + $0x8] sm:$0xff] }
 0xc98   : > { %v3551_v26 = vpop.f32.mrf.mxu1 }
 0xc99   : > { %v3552_v52 = vadd.f32 %v3551_v26, %v3505_v35 }
 0xc9e   : > { %v3580_v2 = vpop.f32.mrf.mxu3 }
 0xc9f   : > { %v3581_v62 = vadd.f32 %v3580_v2, %v3552_v52 }
 0xca0   : > { %v3554_v22 = vpop.f32.mrf.mxu1 }
 0xca1   : > { %v3592_v59 = vsel %vm1272_vm0, %v3581_v62, 0.0  ;;  %v3555_v42 = vadd.f32 %v3554_v22, %v3510_v57 }
 0xca2   : > { %3593 = vadd.xlane.f32.xlu1 %v3592_v59 }
 0xca6   : > { %v3583_v15 = vpop.f32.mrf.mxu3 }
 0xca7   : > { %v3584_v49 = vadd.f32 %v3583_v15, %v3555_v42 }
 0xca8   : > { %v3557_v6 = vpop.f32.mrf.mxu1 }
 0xca9   : > { %v3595_v24 = vsel %vm1272_vm0, %v3584_v49, 0.0  ;;  %v3558_v50 = vadd.f32 %v3557_v6, %v3515_v3 }
 0xcaa   : > { %3596 = vadd.xlane.f32.xlu2 %v3595_v24 }
 0xcae   : > { %v3586_v12 = vpop.f32.mrf.mxu3 }
 0xcaf   : > { %v3587_v39 = vadd.f32 %v3586_v12, %v3558_v50 }
 0xcb0   : > { %v3560_v28 = vpop.f32.mrf.mxu1 }
 0xcb1   : > { %v3598_v23 = vsel %vm1272_vm0, %v3587_v39, 0.0  ;;  %v3561_v61 = vadd.f32 %v3560_v28, %v3520_v21 }
 0xcb2   : > { %3599 = vadd.xlane.f32.xlu0 %v3598_v23 }
 0xcb6   : > { %v3589_v53 = vpop.f32.mrf.mxu3 }
 0xcb7   : > { %v3590_v54 = vadd.f32 %v3589_v53, %v3561_v61 }
 0xcb9   : > { %v3601_v56 = vsel %vm1272_vm0, %v3590_v54, 0.0 }
 0xcba   : > { %3602 = vadd.xlane.f32.xlu2 %v3601_v56 }
 0xd15   : > { %v3594_v38 = vpop.xlane.xlu1 %3593 }
 0xd16   : > { %v3604_v8 = vmul.f32 %v3594_v38, %v6333_v34 }
 0xd1d   : > { %v3597_v9 = vpop.xlane.xlu2 %3596 }
 0xd1e   : > { %v3605_v16 = vmul.f32 %v3597_v9, %v6333_v34 }
 0xd20   : > { %v3608_v20 = vadd.f32 %v3605_v16, %v3604_v8 }
 0xd25   : > { %v3600_v11 = vpop.xlane.xlu0 %3599 }
 0xd26   : > { %v3606_v27 = vmul.f32 %v3600_v11, %v6333_v34 }
 0xd28   : > { %v3609_v4 = vadd.f32 %v3608_v20, %v3606_v27 }
 0xd2d   : > { %v3603_v18 = vpop.xlane.xlu2 %3602 }
 0xd2e   : > { %v3607_v47 = vmul.f32 %v3603_v18, %v6333_v34 }
 0xd30   : > { %v3610_v60 = vadd.f32 %v3609_v4, %v3607_v47 }
 0xd32   : > { %v3611_v37 = vrot.slane %v3610_v60, 4 }
 0xd34   : > { %v3612_v25 = vadd.f32 %v3611_v37, %v3610_v60 }
 0xd36   : > { %v3613_v29 = vrot.slane %v3612_v25, 2 }
 0xd38   : > { %v3614_v14 = vadd.f32 %v3613_v29, %v3612_v25 }
 0xd3a   : > { %v3615_v48 = vrot.slane %v3614_v14, 1 }
 0xd3c   : > { %v3616_v30 = vadd.f32 %v3615_v48, %v3614_v14 }
 0xd3e   : > { %v3617_v58 = vmul.f32 %v3616_v30, %v6339_v55 }
 0xd40   : > { %v7268_v0 = vsub.f32 %v3587_v39, %v3617_v58  ;;  %v7270_v31 = vsub.f32 %v3584_v49, %v3617_v58  ;;  %v7272_v33 = vsub.f32 %v3581_v62, %v3617_v58  ;;  %v3621_v19 = vsub.f32 %v3590_v54, %v3617_v58 }
 0xd42   : > { %v3624_v36 = vmul.f32 %v7268_v0, %v7268_v0  ;;  %v3623_v7 = vmul.f32 %v7270_v31, %v7270_v31  ;;  %v3622_v40 = vmul.f32 %v7272_v33, %v7272_v33  ;;  %v3625_v17 = vmul.f32 %v3621_v19, %v3621_v19 }
 0xd44   : > { %v3632_v13 = vsel %vm1272_vm0, %v3624_v36, 0.0  ;;  %v3629_v43 = vsel %vm1272_vm0, %v3623_v7, 0.0  ;;  %v3626_v45 = vsel %vm1272_vm0, %v3622_v40, 0.0  ;;  %v3635_v46 = vsel %vm1272_vm0, %v3625_v17, 0.0 }
 0xd45   : > { %3633 = vadd.xlane.f32.xlu2 %v3632_v13  ;;  %3630 = vadd.xlane.f32.xlu0 %v3629_v43 }
 0xd46   : > { %3627 = vadd.xlane.f32.xlu1 %v3626_v45 }
 0xd4e   : > { %3636 = vadd.xlane.f32.xlu1 %v3635_v46 }
 0xd59   : > { %3684 = vperm.xlu0 %4838, %v3370_v1  }
 0xd5d   : > { %3679 = vperm.xlu2 %4837, %v3369_v44  }
 0xd61   : > { %3674 = vperm.xlu0 %4838, %v3368_v32  }
 0xd65   : > { %3703 = vperm.xlu2 %4837, %v3373_v51  }
 0xd67   : > { %3708 = vperm.xlu1 %4839, %v3374_v63  }
 0xd69   : > { %3669 = vperm.xlu0 %4838, %v3367_v5  }
 0xd6d   : > { %3693 = vperm.xlu2 %4837, %v3371_v41  }
 0xd6f   : > { %3698 = vperm.xlu1 %4839, %v3372_v10  }
 0xdb8   : > { %v3631_v26 = vpop.xlane.xlu0 %3630  ;;  %v3634_v22 = vpop.xlane.xlu2 %3633 }
 0xdb9   : > { %v3628_v35 = vpop.xlane.xlu1 %3627  ;;  %v3639_v52 = vmul.f32 %v3631_v26, %v6333_v34  ;;  %v3640_v59 = vmul.f32 %v3634_v22, %v6333_v34 }
 0xdba   : > { %v3638_v2 = vmul.f32 %v3628_v35, %v6333_v34 }
 0xdbc   : > { %v3642_v62 = vadd.f32 %v3639_v52, %v3638_v2 }
 0xdbe   : > { %v3643_v42 = vadd.f32 %v3642_v62, %v3640_v59 }
 0xdc0   : > { %v3680_v61 = vpop.permute.xlu2 %3679 }
 0xdc1   : > { %v3637_v57 = vpop.xlane.xlu1 %3636 }
 0xdc2   : > { %v3641_v15 = vmul.f32 %v3637_v57, %v6333_v34 }
 0xdc4   : > { %v3644_v49 = vadd.f32 %v3643_v42, %v3641_v15 }
 0xdc6   : > { %v3645_v6 = vrot.slane %v3644_v49, 4 }
 0xdc8   : > { %v3646_v24 = vadd.f32 %v3645_v6, %v3644_v49  ;;  %v3704_v38 = vpop.permute.xlu2 %3703 }
 0xdca   : > { %v3647_v3 = vrot.slane %v3646_v24, 2 }
 0xdcb   : > { %v3685_v21 = vpop.permute.xlu0 %3684 }
 0xdcc   : > { %v3648_v50 = vadd.f32 %v3647_v3, %v3646_v24 }
 0xdce   : > { %v3649_v12 = vrot.slane %v3648_v50, 1 }
 0xdd0   : > { %v3650_v39 = vadd.f32 %v3649_v12, %v3648_v50  ;;  %v3694_v48 = vpop.permute.xlu2 %3693 }
 0xdd2   : > { %v3651_v23 = vmul.f32 %v3650_v39, %v6339_v55 }
 0xdd3   : > { %v3675_v9 = vpop.permute.xlu0 %3674 }
 0xdd4   : > { %v3652_v28 = vadd.f32 1e-05, %v3651_v23 }
 0xdd6   : > { %4916 = vrsqrt.f32 %v3652_v28  ;;  %vm3659_vm11 = vweird.f32 %v3652_v28 }
 0xdd9   : > { %v3709_v16 = vpop.permute.xlu1 %3708 }
 0xddb   : > { %v3670_v60 = vpop.permute.xlu0 %3669 }
 0xddc   : > { %v4917_v53 = vpop.eup %4916 }
 0xddd   : > { %v3654_v54 = vmul.f32 %v4917_v53, %v3652_v28  ;;  %vm3660_vm9 = vweird.f32 %v4917_v53 }
 0xdde   : > { %vm3661_vm12 = vmor %vm3659_vm11, %vm3660_vm9 }
 0xddf   : > { %v3655_v56 = vmul.f32 %v4917_v53, %v3654_v54 }
 0xde1   : > { %v3656_v11 = vmul.f32 0.5, %v3655_v56  ;;  %v3699_v30 = vpop.permute.xlu1 %3698 }
 0xde3   : > { %v3657_v8 = vsub.f32 1.5, %v3656_v11 }
 0xde5   : > { %v3658_v27 = vmul.f32 %v4917_v53, %v3657_v8 }
 0xde7   : > { %v3662_v20 = vsel %vm3661_vm12, %v4917_v53, %v3658_v27 }
 0xde8   : > { %v3665_v18 = vmul.f32 %v3662_v20, %v7268_v0  ;;  %v3666_v55 = vmul.f32 %v3662_v20, %v3621_v19  ;;  %v3664_v4 = vmul.f32 %v3662_v20, %v7270_v31  ;;  %v3663_v47 = vmul.f32 %v3662_v20, %v7272_v33 }
 0xdea   : > { %v3689_v37 = vmul.f32 %v3680_v61, %v3665_v18  ;;  %v3690_v25 = vmul.f32 %v3685_v21, %v3666_v55  ;;  %v3688_v29 = vmul.f32 %v3675_v9, %v3664_v4  ;;  %v3687_v14 = vmul.f32 %v3670_v60, %v3663_v47 }
 0xdec   : > { %v7292_v58 = vadd.f32 %v3704_v38, %v3689_v37  ;;  %v7294_v36 = vadd.f32 %v3709_v16, %v3690_v25  ;;  %v7296_v7 = vadd.f32 %v3694_v48, %v3687_v14  ;;  %v7298_v40 = vadd.f32 %v3699_v30, %v3688_v29 }
 0xdee   : > { %v7301_v0 = vmul.f32 0.70710677, %v7292_v58  ;;  %v7304_v31 = vmul.f32 0.70710677, %v7294_v36  ;;  %v7307_v33 = vmul.f32 0.70710677, %v7296_v7 }
 0xdef   : > { %v7310_v13 = vmul.f32 0.70710677, %v7298_v40 }
 0xdf0   : > { %v7313_v43 = vand.u32 2147483647, %v7301_v0  ;;  %v7316_v45 = vand.u32 2147483647, %v7304_v31  ;;  %v7319_v19 = vand.u32 2147483647, %v7307_v33 }
 0xdf1   : > { %v7322_v17 = vand.u32 2147483647, %v7310_v13 }
 0xdf2   : > { %v3729_v46 = vmul.f32 0.3275911, %v7313_v43  ;;  %v3730_v1 = vmul.f32 0.3275911, %v7316_v45  ;;  %v3727_v44 = vmul.f32 0.3275911, %v7319_v19 }
 0xdf3   : > { %v3728_v63 = vmul.f32 0.3275911, %v7322_v17  ;;  %v3833_v59 = vsub.f32 0.0, %v7313_v43  ;;  %v3834_v15 = vsub.f32 0.0, %v7316_v45  ;;  %v3831_v49 = vsub.f32 0.0, %v7319_v19 }
 0xdf4   : > { %v3733_v32 = vadd.f32 1.0, %v3729_v46  ;;  %v3734_v51 = vadd.f32 1.0, %v3730_v1  ;;  %v3731_v5 = vadd.f32 1.0, %v3727_v44 }
 0xdf5   : > { %v7328_v41 = vadd.f32 1.0, %v3728_v63  ;;  %v3837_v48 = vmul.f32 %v3833_v59, %v7313_v43 }
 0xdf6   : > { %4918 = vrcp.f32 %v3733_v32  ;;  %v3774_v52 = vand.u32 2147483647, %v3733_v32  ;;  %v3776_v62 = vand.u32 2147483648, %v3733_v32  ;;  %v3789_v57 = vand.u32 2147483647, %v3734_v51 }
 0xdf7   : > { %4920 = vrcp.f32 %v3734_v51  ;;  %vm3770_vm13 = vweird.f32 %v3733_v32  ;;  %vm3785_vm15 = vweird.f32 %v3734_v51  ;;  %v3791_v3 = vand.u32 2147483648, %v3734_v51 }
 0xdf8   : > { %4922 = vrcp.f32 %v3731_v5  ;;  %vm7334_vm5 = vcmp.eq.f32.partialorder %v3774_v52, 8.507059e+37  ;;  %v3777_v21 = vor.u32 1.1754944e-38, %v3776_v62  ;;  %vm7338_vm7 = vcmp.eq.f32.partialorder %v3789_v57, 8.507059e+37 }
 0xdf9   : > { %4924 = vrcp.f32 %v7328_v41  ;;  %vm3740_vm8 = vweird.f32 %v3731_v5  ;;  %v3744_v56 = vand.u32 2147483647, %v3731_v5  ;;  %v3792_v11 = vor.u32 1.1754944e-38, %v3791_v3 }
 0xdfa   : > { %v3746_v16 = vand.u32 2147483648, %v3731_v5  ;;  %v3759_v47 = vand.u32 2147483647, %v7328_v41  ;;  %v3761_v60 = vand.u32 2147483648, %v7328_v41 }
 0xdfc   : > { %v4919_v10 = vpop.eup %4918  ;;  %v3747_v30 = vor.u32 1.1754944e-38, %v3746_v16 }
 0xdfd   : > { %v4921_v26 = vpop.eup %4920  ;;  %v3766_v35 = vmul.f32 %v4919_v10, %v3733_v32  ;;  %vm3771_vm14 = vweird.f32 %v4919_v10 }
 0xdfe   : > { %v3781_v2 = vmul.f32 %v4921_v26, %v3734_v51  ;;  %v4923_v6 = vpop.eup %4922  ;;  %vm3786_vm6 = vweird.f32 %v4921_v26  ;;  %vm3772_vm9 = vmor %vm3770_vm13, %vm3771_vm14  ;;  %v3838_v51 = vmul.f32 %v3834_v15, %v7316_v45  ;;  %v3835_v45 = vmul.f32 %v3831_v49, %v7319_v19 }
 0xdff   : > { %v3767_v22 = vsub.f32 1.0, %v3766_v35  ;;  %v3736_v39 = vmul.f32 %v4923_v6, %v3731_v5  ;;  %v4925_v23 = vpop.eup %4924  ;;  %vm3787_vm11 = vmor %vm3785_vm15, %vm3786_vm6  ;;  %vm3741_vm12 = vweird.f32 %v4923_v6  ;;  %vm3745_vm15 = vcmp.eq.f32.partialorder %v3744_v56, 8.507059e+37 }
 0xe00   : > { %v3782_v42 = vsub.f32 1.0, %v3781_v2  ;;  %v3751_v9 = vmul.f32 %v4925_v23, %v7328_v41  ;;  %vm3756_vm13 = vweird.f32 %v4925_v23  ;;  %vm3742_vm14 = vmor %vm3740_vm8, %vm3741_vm12  ;;  %v3843_v5 = vmul.f32 1.442695, %v3837_v48 }
 0xe01   : > { %v3768_v24 = vmul.f32 %v4919_v10, %v3767_v22  ;;  %v3737_v54 = vsub.f32 1.0, %v3736_v39  ;;  %v3832_v22 = vsub.f32 0.0, %v7322_v17  ;;  %vm3857_vm8 = vcmp.ge.f32.partialorder %v7301_v0, 0.0 }
 0xe02   : > { %v3783_v12 = vmul.f32 %v4921_v26, %v3782_v42  ;;  %v3752_v18 = vsub.f32 1.0, %v3751_v9  ;;  %4926 = vpow2.f32 %v3843_v5  ;;  %vm3856_vm12 = vcmp.ge.f32.partialorder %v7310_v13, 0.0 }
 0xe03   : > { %v3769_v28 = vadd.f32 %v4919_v10, %v3768_v24  ;;  %v3738_v20 = vmul.f32 %v4923_v6, %v3737_v54  ;;  %v3836_v50 = vmul.f32 %v3832_v22, %v7322_v17 }
 0xe04   : > { %v3784_v53 = vadd.f32 %v4921_v26, %v3783_v12  ;;  %v3753_v29 = vmul.f32 %v4925_v23, %v3752_v18 }
 0xe05   : > { %v3773_v38 = vsel %vm3772_vm9, %v4919_v10, %v3769_v28  ;;  %v3739_v25 = vadd.f32 %v4923_v6, %v3738_v20  ;;  %v3762_v10 = vor.u32 1.1754944e-38, %v3761_v60  ;;  %v3841_v9 = vmul.f32 1.442695, %v3836_v50  ;;  %v3325_v50 = vld [vmem:[#allocation27 + $0x8] sm:$0xff] }
 0xe06   : > { %v3778_v8 = vsel %vm7334_vm5, %v3777_v21, %v3773_v38  ;;  %v3788_v27 = vsel %vm3787_vm11, %v4921_v26, %v3784_v53  ;;  %v3754_v44 = vadd.f32 %v4925_v23, %v3753_v29  ;;  %vm3755_vm5 = vweird.f32 %v7328_v41 }
 0xe07   : > { %v3797_v55 = vmul.f32 1.0614054, %v3778_v8  ;;  %v3793_v4 = vsel %vm7338_vm7, %v3792_v11, %v3788_v27  ;;  %v3743_v1 = vsel %vm3742_vm14, %v4923_v6, %v3739_v25  ;;  %vm3757_vm6 = vmor %vm3755_vm5, %vm3756_vm13  ;;  %vm3760_vm7 = vcmp.eq.f32.partialorder %v3759_v47, 8.507059e+37 }
 0xe08   : > { %v3798_v37 = vmul.f32 1.0614054, %v3793_v4  ;;  %v3748_v63 = vsel %vm3745_vm15, %v3747_v30, %v3743_v1  ;;  %v3758_v52 = vsel %vm3757_vm6, %v4925_v23, %v3754_v44  ;;  %v3845_v41 = vmul.f32 1.442695, %v3838_v51  ;;  %v4927_v16 = vpop.eup %4926 }
 0xe09   : > { %v4611_v14 = vadd.f32 -1.4531521, %v3797_v55  ;;  %v3795_v35 = vmul.f32 1.0614054, %v3748_v63  ;;  %v3763_v2 = vsel %vm3760_vm7, %v3762_v10, %v3758_v52  ;;  %v3839_v21 = vmul.f32 1.442695, %v3835_v45 }
 0xe0a   : > { %v4612_v46 = vadd.f32 -1.4531521, %v3798_v37  ;;  %v3796_v57 = vmul.f32 1.0614054, %v3763_v2  ;;  %4928 = vpow2.f32 %v3845_v41  ;;  %vm3858_vm9 = vcmp.ge.f32.partialorder %v7304_v31, 0.0 }
 0xe0b   : > { %v3805_v32 = vmul.f32 %v4611_v14, %v3778_v8  ;;  %v4609_v59 = vadd.f32 -1.4531521, %v3795_v35  ;;  %4930 = vpow2.f32 %v3839_v21  ;;  %vm3855_vm11 = vcmp.ge.f32.partialorder %v7307_v33, 0.0 }
 0xe0c   : > { %v3806_v26 = vmul.f32 %v4612_v46, %v3793_v4  ;;  %v4610_v24 = vadd.f32 -1.4531521, %v3796_v57  ;;  %4932 = vpow2.f32 %v3841_v9  ;;  %v3715_v31 = vmul.f32 0.5, %v7296_v7  ;;  %v3379_v7 = vld [vmem:[#allocation33] sm:$0xff] }
 0xe0d   : > { %v3809_v43 = vadd.f32 1.4214138, %v3805_v32  ;;  %v3803_v6 = vmul.f32 %v4609_v59, %v3748_v63  ;;  %v3717_v32 = vmul.f32 0.5, %v7292_v58 }
 0xe0e   : > { %v3810_v62 = vadd.f32 1.4214138, %v3806_v26  ;;  %v3804_v23 = vmul.f32 %v4610_v24, %v3763_v2 }
 0xe0f   : > { %v3813_v42 = vmul.f32 %v3809_v43, %v3778_v8  ;;  %v3807_v39 = vadd.f32 1.4214138, %v3803_v6 }
 0xe10   : > { %v3814_v15 = vmul.f32 %v3810_v62, %v3793_v4  ;;  %v3808_v54 = vadd.f32 1.4214138, %v3804_v23  ;;  %v4929_v18 = vpop.eup %4928 }
 0xe11   : > { %v4615_v3 = vadd.f32 -0.28449672, %v3813_v42  ;;  %v3811_v53 = vmul.f32 %v3807_v39, %v3748_v63  ;;  %v4931_v30 = vpop.eup %4930  ;;  %v3716_v42 = vmul.f32 0.5, %v7298_v40  ;;  %v3380_v40 = vld [vmem:[#allocation33 + $0x8] sm:$0xff] }
 0xe12   : > { %v4616_v12 = vadd.f32 -0.28449672, %v3814_v15  ;;  %v3812_v49 = vmul.f32 %v3808_v54, %v3763_v2  ;;  %v3324_v15 = vld [vmem:[#allocation27] sm:$0xff] }
 0xe13   : > { %v3821_v28 = vmul.f32 %v4615_v3, %v3778_v8  ;;  %v4613_v19 = vadd.f32 -0.28449672, %v3811_v53  ;;  %4603 = vmatmul.msk.f32.vlgmr.msra.gmra.mxu2 %vm1942_vm10, %v3324_v15 }
 0xe14   : > { %v3822_v61 = vmul.f32 %v4616_v12, %v3793_v4  ;;  %v4614_v20 = vadd.f32 -0.28449672, %v3812_v49 }
 0xe15   : > { %v3825_v56 = vadd.f32 0.2548296, %v3821_v28  ;;  %v3819_v17 = vmul.f32 %v4613_v19, %v3748_v63 }
 0xe16   : > { %v3826_v38 = vadd.f32 0.2548296, %v3822_v61  ;;  %v3820_v37 = vmul.f32 %v4614_v20, %v3763_v2 }
 0xe17   : > { %v3829_v11 = vmul.f32 %v3825_v56, %v3778_v8  ;;  %v3823_v60 = vadd.f32 0.2548296, %v3819_v17 }
 0xe18   : > { %v3830_v27 = vmul.f32 %v3826_v38, %v3793_v4  ;;  %v3824_v48 = vadd.f32 0.2548296, %v3820_v37  ;;  %v4933_v4 = vpop.eup %4932 }
 0xe19   : > { %v3849_v55 = vmul.f32 %v4927_v16, %v3829_v11  ;;  %v3827_v14 = vmul.f32 %v3823_v60, %v3748_v63  ;;  %v3718_v63 = vmul.f32 0.5, %v7294_v36 }
 0xe1a   : > { %v3850_v47 = vmul.f32 %v4929_v18, %v3830_v27  ;;  %v3828_v44 = vmul.f32 %v3824_v48, %v3763_v2 }
 0xe1b   : > { %v3853_v25 = vsub.f32 1.0, %v3849_v55  ;;  %v3847_v1 = vmul.f32 %v4931_v30, %v3827_v14  ;;  %4604 = vmatmul.msk.f32.gmra.mxu2 %vm1942_vm10, %v3325_v50 }
 0xe1c   : > { %v3854_v29 = vsub.f32 1.0, %v3850_v47  ;;  %v3848_v52 = vmul.f32 %v4933_v4, %v3828_v44 }
 0xe1d   : > { %v3861_v46 = vsub.f32 0.0, %v3853_v25  ;;  %v3851_v35 = vsub.f32 1.0, %v3847_v1 }
 0xe1e   : > { %v3862_v8 = vsub.f32 0.0, %v3854_v29  ;;  %v3852_v62 = vsub.f32 1.0, %v3848_v52 }
 0xe1f   : > { %v3865_v51 = vsel %vm3857_vm8, %v3853_v25, %v3861_v46  ;;  %v3859_v22 = vsub.f32 0.0, %v3851_v35 }
 0xe20   : > { %v3869_v10 = vadd.f32 1.0, %v3865_v51  ;;  %v3866_v26 = vsel %vm3858_vm9, %v3854_v29, %v3862_v8  ;;  %v3860_v58 = vsub.f32 0.0, %v3852_v62 }
 0xe21   : > { %v3870_v43 = vadd.f32 1.0, %v3866_v26  ;;  %v3863_v2 = vsel %vm3855_vm11, %v3851_v35, %v3859_v22 }
 0xe22   : > { %v3873_v5 = vmul.f32 %v3869_v10, %v3717_v32  ;;  %v3867_v59 = vadd.f32 1.0, %v3863_v2  ;;  %v3864_v36 = vsel %vm3856_vm12, %v3852_v62, %v3860_v58 }
 0xe23   : > { %v3874_v0 = vmul.f32 %v3870_v43, %v3718_v63  ;;  %v3868_v33 = vadd.f32 1.0, %v3864_v36  ;;  %v3381_v36 = vld [vmem:[#allocation35] sm:$0xff] }
 0xe24   : > { %3938 = vst.msk [vmem:[#allocation2 + $0x50] sm:$0xff] %vm1272_vm0, %v3873_v5  ;;  %3944 = vrot.lane.b32.xlu1 %v3873_v5, %s5698_s27  ;;  %v3871_v57 = vmul.f32 %v3867_v59, %v3715_v31 }
 0xe25   : > { %3939 = vst.msk [vmem:[#allocation2 + $0x58] sm:$0xff] %vm1272_vm0, %v3874_v0  ;;  %3946 = vrot.lane.b32.xlu0 %v3874_v0, %s5698_s27  ;;  %v3872_v41 = vmul.f32 %v3868_v33, %v3716_v42 }
 0xe26   : > { %3936 = vst.msk [vmem:[#allocation2 + $0x40] sm:$0xff] %vm1272_vm0, %v3871_v57 }
 0xe27   : > { %3937 = vst.msk [vmem:[#allocation2 + $0x48] sm:$0xff] %vm1272_vm0, %v3872_v41  ;;  %3942 = vrot.lane.b32.xlu2 %v3872_v41, %s5698_s27 }
 0xe2b   : > { %v3982_v19 = vld [vmem:[#allocation2 + $0x50] sm:$0xff] }
 0xe2c   : > { %3926 = vrot.lane.b32.xlu1 %v3874_v0, %s5699_s2  ;;  %v3983_v38 = vld [vmem:[#allocation2 + $0x58] sm:$0xff] }
 0xe2d   : > { %3940 = vrot.lane.b32.xlu0 %v3871_v57, %s5698_s27  ;;  %v3980_v17 = vld [vmem:[#allocation2 + $0x40] sm:$0xff]  ;;  %s4223_s27 = scalar_lea.hbm %s7604_s6, %s4628_s11  ;;  %s5580_s11 = scalar_lea.hbm %s7604_s6, 32 }
 0xe2e   : > { %v3981_v49 = vld [vmem:[#allocation2 + $0x48] sm:$0xff]  ;;  %s4226_s0 = sshll.u32 %s4223_s27, 4  ;;  %s4227_s0 = int_to_ptr.hbm [resolvable:$true] %s4226_s0 }
 0xe2f   : > { %3924 = vrot.lane.b32.xlu2 %v3873_v5, %s5699_s2  ;;  %s5574_s7 = sshra.s32 %s4227_s0, 4  ;;  %s5575_s7 = int_to_ptr.hbm [resolvable:$true] %s5574_s7 }
 0xe30   : > { %s5576_s4 = scalar_lea.hbm %s5575_s7, 16  ;;  %p5581_p2 = scmp.lt.s32.totalorder %s5575_s7, %s7604_s6 }
 0xe31   : > { %p5577_p13 = scmp.ne.s32.totalorder %s5575_s7, %s5576_s4  ;;  %p5582_p3 = scmp.lt.s32.totalorder %s5580_s11, %s5576_s4 }
 0xe33   : > { %p5578_p0 = pnand %p5577_p13, %p5886_p5  ;;  %p5583_p4 = por %p5582_p3, %p5581_p2 }
 0xe34   : > { %3962 = vrot.lane.b32.xlu1 %v3874_v0, %s5700_s3 }
 0xe35   : > { %3922 = vrot.lane.b32.xlu0 %v3872_v41, %s5699_s2  ;;  %p5579_p1 = pneg %p5578_p0 }
 0xe37   : > { %3920 = vrot.lane.b32.xlu2 %v3871_v57, %s5699_s2  ;;  %p5584_p7 = pnand %p5583_p4, %p5579_p1 }
 0xe3c   : > { %3910 = vrot.lane.b32.xlu1 %v3874_v0, %s5702_s5 }
 0xe3d   : > { %3960 = vrot.lane.b32.xlu0 %v3873_v5, %s5700_s3 }
 0xe3f   : > { %3958 = vrot.lane.b32.xlu2 %v3872_v41, %s5700_s3 }
 0xe44   : > { %3956 = vrot.lane.b32.xlu1 %v3871_v57, %s5700_s3  ;;  %s7602_s3 = sld [smem:[#allocation75_spill]] }
 0xe45   : > { %3908 = vrot.lane.b32.xlu0 %v3873_v5, %s5702_s5 }
 0xe47   : > { %3906 = vrot.lane.b32.xlu2 %v3872_v41, %s5702_s5 }
 0xe4a   : > { %v3376_v48 = vld [vmem:[%s7602_s3 + $0x8] sm:$0xff]  ;;  %v3378_v44 = vld [vmem:[%s7602_s3 + $0x18] sm:$0xff]  ;;  %v3375_v4 = vld [vmem:[%s7602_s3] sm:$0xff] }
 0xe4b   : > { %v3377_v51 = vld [vmem:[%s7602_s3 + $0x10] sm:$0xff] }
 0xe4c   : > { %3994 = vperm.xlu1 %4839, %v3379_v7  }
 0xe4d   : > { %3904 = vrot.lane.b32.xlu0 %v3871_v57, %s5702_s5  ;;  %v3384_v57 = vld [vmem:[#allocation36 + $0x8] sm:$0xff]  ;;  %s4224_s5 = sshll.u32 %s1175_s9, 4  ;;  %s4225_s5 = int_to_ptr.vmem [resolvable:$true] %s4224_s5 }
 0xe4f   : > { %3999 = vperm.xlu2 %4837, %v3380_v40  }
 0xe81   : > { %v3943_v13 = vpop.permute.xlu2 %3942 }
 0xe82   : > { %3953 = vst.msk [vmem:[#allocation2 + $0x68] sm:$0xff] %vm1365_vm3, %v3943_v13 }
 0xe89   : > { %v3925_v45 = vpop.permute.xlu2 %3924  ;;  %v3985_v61 = vld [vmem:[#allocation2 + $0x68] sm:$0xff] }
 0xe8a   : > { %3934 = vst.msk [vmem:[#allocation2 + $0x30] sm:$0xff] %vm1339_vm1, %v3925_v45 }
 0xe91   : > { %v3921_v6 = vpop.permute.xlu2 %3920  ;;  %v3978_v18 = vld [vmem:[#allocation2 + $0x30] sm:$0xff] }
 0xe92   : > { %3932 = vst.msk [vmem:[#allocation2 + $0x20] sm:$0xff] %vm1339_vm1, %v3921_v6 }
 0xe96   : > { %v3945_v24 = vpop.permute.xlu1 %3944  ;;  %v7421_v10 = vpop.f32.mrf.mxu2 }
 0xe97   : > { %v3947_v3 = vpop.permute.xlu0 %3946  ;;  %3954 = vst.msk [vmem:[#allocation2 + $0x70] sm:$0xff] %vm1365_vm3, %v3945_v24 }
 0xe98   : > { %3955 = vst.msk [vmem:[#allocation2 + $0x78] sm:$0xff] %vm1365_vm3, %v3947_v3 }
 0xe99   : > { %v3959_v12 = vpop.permute.xlu2 %3958  ;;  %v3976_v37 = vld [vmem:[#allocation2 + $0x20] sm:$0xff] }
 0xe9a   : > { %3969 = vst.msk [vmem:[#allocation2 + $0x88] sm:$0xff] %vm1386_vm2, %v3959_v12 }
 0xe9e   : > { %v3927_v39 = vpop.permute.xlu1 %3926  ;;  %v3986_v21 = vld [vmem:[#allocation2 + $0x70] sm:$0xff]  ;;  %v7423_v26 = vpop.f32.mrf.mxu2 }
 0xe9f   : > { %v3941_v23 = vpop.permute.xlu0 %3940  ;;  %3935 = vst.msk [vmem:[#allocation2 + $0x38] sm:$0xff] %vm1339_vm1, %v3927_v39  ;;  %v3987_v28 = vld [vmem:[#allocation2 + $0x78] sm:$0xff] }
 0xea0   : > { %3952 = vst.msk [vmem:[#allocation2 + $0x60] sm:$0xff] %vm1365_vm3, %v3941_v23  ;;  %4008 = vmatpush.msrb.mxu0 %v3987_v28 }
 0xea1   : > { %v3907_v53 = vpop.permute.xlu2 %3906  ;;  %v3989_v14 = vld [vmem:[#allocation2 + $0x88] sm:$0xff] }
 0xea2   : > { %4009 = vmatpush.msrb.mxu0 %v3986_v21  ;;  %3917 = vst.msk [vmem:[#allocation2 + $0x8] sm:$0xff] %vm1318_vm4, %v3907_v53  ;;  %v3383_v53 = vld [vmem:[#allocation36] sm:$0xff] }
 0xea4   : > { %4010 = vmatpush.msrb.mxu0 %v3985_v61 }
 0xea6   : > { %v3963_v54 = vpop.permute.xlu1 %3962  ;;  %v3979_v20 = vld [vmem:[#allocation2 + $0x38] sm:$0xff] }
 0xea7   : > { %v3923_v56 = vpop.permute.xlu0 %3922  ;;  %3971 = vst.msk [vmem:[#allocation2 + $0x98] sm:$0xff] %vm1386_vm2, %v3963_v54  ;;  %v3984_v9 = vld [vmem:[#allocation2 + $0x60] sm:$0xff]  ;;  %v3382_v54 = vld [vmem:[#allocation35 + $0x8] sm:$0xff] }
 0xea8   : > { %3933 = vst.msk [vmem:[#allocation2 + $0x28] sm:$0xff] %vm1339_vm1, %v3923_v56  ;;  %4011 = vmatpush.msrb.mxu0 %v3984_v9 }
 0xea9   : > { %v3973_v1 = vld [vmem:[#allocation2 + $0x8] sm:$0xff]  ;;  %v4000_v62 = vpop.permute.xlu2 %3999 }
 0xeaa   : > { %4012 = vmatpush.msrb.mxu0 %v3983_v38 }
 0xeac   : > { %4013 = vmatpush.msrb.mxu0 %v3982_v19 }
 0xeae   : > { %4014 = vmatpush.msrb.mxu0 %v3981_v49  ;;  %v3911_v11 = vpop.permute.xlu1 %3910  ;;  %v3991_v16 = vld [vmem:[#allocation2 + $0x98] sm:$0xff] }
 0xeaf   : > { %v3961_v27 = vpop.permute.xlu0 %3960  ;;  %3919 = vst.msk [vmem:[#allocation2 + $0x18] sm:$0xff] %vm1318_vm4, %v3911_v11  ;;  %4043 = vmatpush.msrb.mxu2 %v3991_v16  ;;  %v3977_v55 = vld [vmem:[#allocation2 + $0x28] sm:$0xff] }
 0xeb0   : > { %3970 = vst.msk [vmem:[#allocation2 + $0x90] sm:$0xff] %vm1386_vm2, %v3961_v27  ;;  %4015 = vmatpush.msrb.mxu0 %v3980_v17 }
 0xeb2   : > { %4016 = vmatpush.msrb.mxu0 %v3979_v20 }
 0xeb4   : > { %4017 = vmatpush.msrb.mxu0 %v3978_v18 }
 0xeb6   : > { %4018 = vmatpush.msrb.mxu0 %v3977_v55  ;;  %v3957_v47 = vpop.permute.xlu1 %3956  ;;  %v3975_v29 = vld [vmem:[#allocation2 + $0x18] sm:$0xff] }
 0xeb7   : > { %v3909_v60 = vpop.permute.xlu0 %3908  ;;  %3968 = vst.msk [vmem:[#allocation2 + $0x80] sm:$0xff] %vm1386_vm2, %v3957_v47  ;;  %v3990_v25 = vld [vmem:[#allocation2 + $0x90] sm:$0xff] }
 0xeb8   : > { %3918 = vst.msk [vmem:[#allocation2 + $0x10] sm:$0xff] %vm1318_vm4, %v3909_v60  ;;  %4019 = vmatpush.msrb.mxu0 %v3976_v37  ;;  %4044 = vmatpush.msrb.mxu2 %v3990_v25 }
 0xeba   : > { %4020 = vmatpush.msrb.mxu0 %v3975_v29  ;;  %4045 = vmatpush.msrb.mxu2 %v3989_v14 }
 0xebe   : > { %v3988_v30 = vld [vmem:[#allocation2 + $0x80] sm:$0xff]  ;;  %v3995_v52 = vpop.permute.xlu1 %3994 }
 0xebf   : > { %v3905_v46 = vpop.permute.xlu0 %3904  ;;  %v3974_v8 = vld [vmem:[#allocation2 + $0x10] sm:$0xff]  ;;  %4046 = vmatpush.msrb.mxu2 %v3988_v30 }
 0xec0   : > { %3916 = vst.msk [vmem:[#allocation2] sm:$0xff] %vm1318_vm4, %v3905_v46  ;;  %4021 = vmatpush.msrb.mxu0 %v3974_v8  ;;  %4617 = vmatmul.msk.f32.vlgmr.msrb.gmra.mxu2 %vm1942_vm10, %v3376_v48 }
 0xec2   : > { %4022 = vmatpush.msrb.mxu0 %v3973_v1 }
 0xec7   : > { %v3972_v32 = vld [vmem:[#allocation2] sm:$0xff] }
 0xec8   : > { %4023 = vmatpush.msrb.mxu0 %v3972_v32  ;;  %4618 = vmatmul.msk.f32.gmra.mxu2 %vm1942_vm10, %v3378_v44 }
 0xec9   : > { %4024 = vmatmul.f32.vlgmr.msrb.gmra.mxu0 %v3375_v4 }
 0xed1   : > { %4027 = vmatmul.f32.gmra.mxu0 %v3377_v51 }
 0xf43   : > { %v4048_v35 = vpop.f32.mrf.mxu2 }
 0xf46   : > { %v4025_v63 = vpop.f32.mrf.mxu0 }
 0xf47   : > { %v4026_v43 = vadd.f32 %v4025_v63, %v3995_v52 }
 0xf49   : > { %v4049_v5 = vadd.f32 %v4048_v35, %v4026_v43 }
 0xf4b   : > { %v4054_v22 = vsel %vm1272_vm0, %v4049_v5, 0.0  ;;  %v4051_v2 = vpop.f32.mrf.mxu2 }
 0xf4c   : > { %4055 = vadd.xlane.f32.xlu0 %v4054_v22 }
 0xf4e   : > { %v4028_v0 = vpop.f32.mrf.mxu0 }
 0xf4f   : > { %v4029_v58 = vadd.f32 %v4028_v0, %v4000_v62 }
 0xf51   : > { %v4052_v31 = vadd.f32 %v4051_v2, %v4029_v58 }
 0xf53   : > { %v4057_v59 = vsel %vm1272_vm0, %v4052_v31, 0.0 }
 0xf54   : > { %4058 = vadd.xlane.f32.xlu1 %v4057_v59 }
 0xf6d   : > { %4105 = vperm.xlu1 %4839, %v3381_v36  }
 0xf75   : > { %4122 = vperm.xlu1 %4839, %v3384_v57  }
 0xfbf   : > { %v4056_v42 = vpop.xlane.xlu0 %4055 }
 0xfc0   : > { %v4060_v41 = vmul.f32 %v4056_v42, %v6333_v34 }
 0xfc7   : > { %v4059_v33 = vpop.xlane.xlu1 %4058 }
 0xfc8   : > { %v4061_v7 = vmul.f32 %v4059_v33, %v6333_v34 }
 0xfca   : > { %v4062_v40 = vadd.f32 %v4061_v7, %v4060_v41 }
 0xfcc   : > { %v4063_v13 = vrot.slane %v4062_v40, 4 }
 0xfce   : > { %v4064_v45 = vadd.f32 %v4063_v13, %v4062_v40 }
 0xfd0   : > { %v4065_v15 = vrot.slane %v4064_v45, 2 }
 0xfd2   : > { %v4066_v6 = vadd.f32 %v4065_v15, %v4064_v45 }
 0xfd4   : > { %v4067_v24 = vrot.slane %v4066_v6, 1 }
 0xfd6   : > { %v4068_v3 = vadd.f32 %v4067_v24, %v4066_v6 }
 0xfd8   : > { %v4069_v50 = vmul.f32 %v4068_v3, %v6333_v34 }
 0xfda   : > { %v4071_v12 = vsub.f32 %v4052_v31, %v4069_v50  ;;  %v4070_v39 = vsub.f32 %v4049_v5, %v4069_v50 }
 0xfdc   : > { %v4073_v23 = vmul.f32 %v4071_v12, %v4071_v12  ;;  %v4072_v28 = vmul.f32 %v4070_v39, %v4070_v39 }
 0xfde   : > { %v4077_v21 = vsel %vm1272_vm0, %v4073_v23, 0.0  ;;  %v4074_v61 = vsel %vm1272_vm0, %v4072_v28, 0.0 }
 0xfdf   : > { %4078 = vadd.xlane.f32.xlu0 %v4077_v21  ;;  %4075 = vadd.xlane.f32.xlu2 %v4074_v61  ;;  %v4106_v29 = vpop.permute.xlu1 %4105 }
 0xfe7   : > { %v4123_v51 = vpop.permute.xlu1 %4122 }
 0xff3   : > { %4117 = vperm.xlu0 %4838, %v3383_v53  }
 0xff7   : > { %4110 = vperm.xlu2 %4837, %v3382_v54  }
0x1052   : > { %v4079_v56 = vpop.xlane.xlu0 %4078  ;;  %v4076_v9 = vpop.xlane.xlu2 %4075 }
0x1053   : > { %v4081_v38 = vmul.f32 %v4079_v56, %v6333_v34  ;;  %v4080_v19 = vmul.f32 %v4076_v9, %v6333_v34 }
0x1055   : > { %v4082_v49 = vadd.f32 %v4081_v38, %v4080_v19 }
0x1057   : > { %v4083_v11 = vrot.slane %v4082_v49, 4 }
0x1059   : > { %v4084_v16 = vadd.f32 %v4083_v11, %v4082_v49 }
0x105a   : > { %v4111_v44 = vpop.permute.xlu2 %4110 }
0x105b   : > { %v4085_v27 = vrot.slane %v4084_v16, 2 }
0x105d   : > { %v4086_v17 = vadd.f32 %v4085_v27, %v4084_v16 }
0x105f   : > { %v4087_v20 = vrot.slane %v4086_v17, 1 }
0x1061   : > { %v4088_v18 = vadd.f32 %v4087_v20, %v4086_v17 }
0x1063   : > { %v4089_v55 = vmul.f32 %v4088_v18, %v6333_v34 }
0x1065   : > { %v4090_v47 = vadd.f32 1e-05, %v4089_v55  ;;  %v4118_v34 = vpop.permute.xlu0 %4117 }
0x1067   : > { %4934 = vrsqrt.f32 %v4090_v47  ;;  %vm4097_vm2 = vweird.f32 %v4090_v47 }
0x106d   : > { %v4935_v60 = vpop.eup %4934 }
0x106e   : > { %v4092_v37 = vmul.f32 %v4935_v60, %v4090_v47  ;;  %vm4098_vm1 = vweird.f32 %v4935_v60 }
0x106f   : > { %vm4099_vm3 = vmor %vm4097_vm2, %vm4098_vm1 }
0x1070   : > { %v4093_v25 = vmul.f32 %v4935_v60, %v4092_v37 }
0x1072   : > { %v4094_v14 = vmul.f32 0.5, %v4093_v25 }
0x1074   : > { %v4095_v48 = vsub.f32 1.5, %v4094_v14 }
0x1076   : > { %v4096_v30 = vmul.f32 %v4935_v60, %v4095_v48 }
0x1078   : > { %v4100_v46 = vsel %vm4099_vm3, %v4935_v60, %v4096_v30 }
0x1079   : > { %v4102_v8 = vmul.f32 %v4100_v46, %v4071_v12  ;;  %v4101_v1 = vmul.f32 %v4100_v46, %v4070_v39 }
0x107b   : > { %v4114_v4 = vmul.f32 %v4111_v44, %v4102_v8  ;;  %v4113_v32 = vmul.f32 %v4106_v29, %v4101_v1 }
0x107d   : > { %v7435_v35 = vadd.f32 %v4123_v51, %v4114_v4  ;;  %v7437_v52 = vadd.f32 %v4118_v34, %v4113_v32 }
0x107f   : > { %v7440_v63 = vmul.f32 0.70710677, %v7435_v35  ;;  %v7443_v43 = vmul.f32 0.70710677, %v7437_v52 }
0x1081   : > { %v4132_v5 = vand.u32 2147483647, %v7440_v63  ;;  %v4131_v22 = vand.u32 2147483647, %v7443_v43  ;;  %vm4198_vm8 = vcmp.ge.f32.partialorder %v7440_v63, 0.0  ;;  %vm4197_vm9 = vcmp.ge.f32.partialorder %v7443_v43, 0.0 }
0x1083   : > { %v4134_v62 = vmul.f32 0.3275911, %v4132_v5  ;;  %v4133_v0 = vmul.f32 0.3275911, %v4131_v22  ;;  %v4186_v23 = vsub.f32 0.0, %v4132_v5  ;;  %v4185_v53 = vsub.f32 0.0, %v4131_v22 }
0x1085   : > { %v4136_v2 = vadd.f32 1.0, %v4134_v62  ;;  %v4135_v58 = vadd.f32 1.0, %v4133_v0  ;;  %v4188_v9 = vmul.f32 %v4186_v23, %v4132_v5  ;;  %v4187_v49 = vmul.f32 %v4185_v53, %v4131_v22 }
0x1086   : > { %v4128_v22 = vmul.f32 0.5, %v7435_v35 }
0x1087   : > { %4936 = vrcp.f32 %v4136_v2  ;;  %v4163_v33 = vand.u32 2147483648, %v4136_v2  ;;  %v4161_v40 = vand.u32 2147483647, %v4136_v2  ;;  %v4148_v13 = vand.u32 2147483648, %v4135_v58 }
0x1088   : > { %4938 = vrcp.f32 %v4135_v58  ;;  %v4146_v15 = vand.u32 2147483647, %v4135_v58  ;;  %vm4157_vm13 = vweird.f32 %v4136_v2  ;;  %vm4142_vm15 = vweird.f32 %v4135_v58 }
0x1089   : > { %v4164_v24 = vor.u32 1.1754944e-38, %v4163_v33  ;;  %vm4162_vm5 = vcmp.eq.f32.partialorder %v4161_v40, 8.507059e+37  ;;  %v4149_v12 = vor.u32 1.1754944e-38, %v4148_v13  ;;  %v4191_v27 = vmul.f32 1.442695, %v4188_v9 }
0x108a   : > { %vm4147_vm7 = vcmp.eq.f32.partialorder %v4146_v15, 8.507059e+37  ;;  %v4189_v18 = vmul.f32 1.442695, %v4187_v49 }
0x108b   : > { %4940 = vpow2.f32 %v4191_v27 }
0x108c   : > { %4942 = vpow2.f32 %v4189_v18 }
0x108d   : > { %v4937_v31 = vpop.eup %4936 }
0x108e   : > { %v4939_v59 = vpop.eup %4938  ;;  %v4153_v36 = vmul.f32 %v4937_v31, %v4136_v2  ;;  %vm4158_vm4 = vweird.f32 %v4937_v31  ;;  %v4127_v2 = vmul.f32 0.5, %v7437_v52 }
0x108f   : > { %v4138_v57 = vmul.f32 %v4939_v59, %v4135_v58  ;;  %vm4143_vm10 = vweird.f32 %v4939_v59  ;;  %vm4159_vm14 = vmor %vm4157_vm13, %vm4158_vm4 }
0x1090   : > { %v4154_v42 = vsub.f32 1.0, %v4153_v36  ;;  %vm4144_vm6 = vmor %vm4142_vm15, %vm4143_vm10 }
0x1091   : > { %v4139_v41 = vsub.f32 1.0, %v4138_v57  ;;  %v4941_v30 = vpop.eup %4940 }
0x1092   : > { %v4155_v7 = vmul.f32 %v4937_v31, %v4154_v42  ;;  %v4943_v8 = vpop.eup %4942 }
0x1093   : > { %v4140_v45 = vmul.f32 %v4939_v59, %v4139_v41 }
0x1094   : > { %v4156_v6 = vadd.f32 %v4937_v31, %v4155_v7 }
0x1095   : > { %v4141_v3 = vadd.f32 %v4939_v59, %v4140_v45 }
0x1096   : > { %v4160_v50 = vsel %vm4159_vm14, %v4937_v31, %v4156_v6 }
0x1097   : > { %v4165_v39 = vsel %vm4162_vm5, %v4164_v24, %v4160_v50  ;;  %v4145_v28 = vsel %vm4144_vm6, %v4939_v59, %v4141_v3 }
0x1098   : > { %v4168_v21 = vmul.f32 1.0614054, %v4165_v39  ;;  %v4150_v61 = vsel %vm4147_vm7, %v4149_v12, %v4145_v28 }
0x1099   : > { %v4167_v54 = vmul.f32 1.0614054, %v4150_v61 }
0x109a   : > { %v4620_v56 = vadd.f32 -1.4531521, %v4168_v21 }
0x109b   : > { %v4619_v38 = vadd.f32 -1.4531521, %v4167_v54 }
0x109c   : > { %v4172_v19 = vmul.f32 %v4620_v56, %v4165_v39 }
0x109d   : > { %v4171_v11 = vmul.f32 %v4619_v38, %v4150_v61 }
0x109e   : > { %v4174_v16 = vadd.f32 1.4214138, %v4172_v19 }
0x109f   : > { %v4173_v17 = vadd.f32 1.4214138, %v4171_v11 }
0x10a0   : > { %v4176_v20 = vmul.f32 %v4174_v16, %v4165_v39 }
0x10a1   : > { %v4175_v55 = vmul.f32 %v4173_v17, %v4150_v61 }
0x10a2   : > { %v4622_v47 = vadd.f32 -0.28449672, %v4176_v20 }
0x10a3   : > { %v4621_v60 = vadd.f32 -0.28449672, %v4175_v55 }
0x10a4   : > { %v4180_v37 = vmul.f32 %v4622_v47, %v4165_v39 }
0x10a5   : > { %v4179_v25 = vmul.f32 %v4621_v60, %v4150_v61 }
0x10a6   : > { %v4182_v29 = vadd.f32 0.2548296, %v4180_v37 }
0x10a7   : > { %v4181_v14 = vadd.f32 0.2548296, %v4179_v25 }
0x10a8   : > { %v4184_v48 = vmul.f32 %v4182_v29, %v4165_v39 }
0x10a9   : > { %v4183_v46 = vmul.f32 %v4181_v14, %v4150_v61 }
0x10aa   : > { %v4194_v1 = vmul.f32 %v4941_v30, %v4184_v48 }
0x10ab   : > { %v4193_v44 = vmul.f32 %v4943_v8, %v4183_v46 }
0x10ac   : > { %v4196_v4 = vsub.f32 1.0, %v4194_v1 }
0x10ad   : > { %v4195_v32 = vsub.f32 1.0, %v4193_v44 }
0x10ae   : > { %v4200_v51 = vsub.f32 0.0, %v4196_v4 }
0x10af   : > { %v4199_v34 = vsub.f32 0.0, %v4195_v32 }
0x10b0   : > { %v4202_v5 = vsel %vm4198_vm8, %v4196_v4, %v4200_v51 }
0x10b1   : > { %v4204_v62 = vadd.f32 1.0, %v4202_v5  ;;  %v4201_v0 = vsel %vm4197_vm9, %v4195_v32, %v4199_v34 }
0x10b2   : > { %v4203_v58 = vadd.f32 1.0, %v4201_v0 }
0x10b3   : > { %v4206_v63 = vmul.f32 %v4204_v62, %v4128_v22 }
0x10b4   : > { %v4205_v31 = vmul.f32 %v4203_v58, %v4127_v2 }
0x10b5   : > { %v4208_v59 = vadd.f32 %v4206_v63, %v7423_v26 }
0x10b6   : > { %v4207_v43 = vadd.f32 %v4205_v31, %v7421_v10 }
0x10b7   : > { %4210 = vst.msk [vmem:[%s1175_s9 + $0x8] sm:$0xff] %vm1272_vm0, %v4208_v59 }
0x10b8   : > { %4209 = vst.msk [vmem:[%s1175_s9] sm:$0xff] %vm1272_vm0, %v4207_v43 }
0x10b9   : > { %5587 = shalt.err (!%p5584_p7)
}
0x10ba   : > { %s5706_s23 = smov 128   ;;  %s5707_s8 = smov 8  }
0x10bb   : > { %4718 = dma.vmem_to_hbm [thread:$0]  (%p5886_p5), %s4225_s5, 256, %s4227_s0, %s4212_s14, %s5706_s23, %s5706_s23, %s5707_s8  }
0x10bc PF: > { %s7606_s27 = sld [smem:[#allocation55_spill]] }
0x10bd   : > { %s7607_s9 = sld [smem:[#allocation52_spill]] }
0x10c2   : > { %p4768_p8 = scmp.ge.s32.totalorder %s7606_s27, 2 }
0x10c3   : > { %s4241_s30 = sand.u32 1, %s7607_s9  }
0x10c4   : > { %p4721_p9 = pnand %p4768_p8, %p5890_p6  ;;  %s4242_s29 = scalar_lea.sflag [#allocation5], %s4241_s30 }
0x10c6   : > { %p4722_p10 = pneg %p4721_p9 }
0x10c8   : > { %5653 = dma.done.wait (%p4722_p10), %s4242_s29, 256  }
0x10c9   : > { %5655 = vsyncadd (%p4722_p10), %s4242_s29, 4294967040  ;;  %s7609_s30 = sld [smem:[#allocation56_spill]] }
0x10ca   : > { %s7610_s7 = sld [smem:[#allocation53_spill]] }
0x10cb   : > { %s7611_s4 = sld [smem:[#allocation54_spill]] }
0x10cc   : > { %s7612_s8 = sld [smem:[#allocation57_spill]] }
0x10cf   : > { %p49_p11 = scmp.ge.s32.totalorder %s7609_s30, 4  }
0x10d1   :  { %51 = sbr.rel (!%p49_p11) target bundleno = 33 (0x21), region = 252 }
0x10d6   :  { %4248 = vsyncpa [#allocation4], 1 }
0x10d7   :  { %4250 = vsyncpa [#allocation4 + $0x1], 1 }
0x10d8   :  { %4251 = vsyncpa [#allocation7], 1 }
0x10d9   :  { %4252 = vsyncpa [#allocation10], 1 }
0x10da   :  { %4253 = vsyncpa [#allocation13], 1 }
0x10db   :  { %4254 = vsyncpa [#allocation16], 1 }
0x10dc   :  { %4255 = vsyncpa [#allocation19], 1 }
0x10dd   :  { %4256 = vsyncpa [#allocation22], 1 }
0x10de   :  { %4257 = vsyncpa [#allocation25], 1 }
0x10df   :  { %4258 = vsyncpa [#allocation28], 1 }
0x10e0   :  { %4259 = vsyncpa [#allocation31], 1 }
0x10e1   :  { %4260 = vsyncpa [#allocation34], 1 }
0x10e2   :  { %4261 = vsyncpa [#allocation37], 1 }
0x10e3   :  { %4262 = vsyncpa [#allocation5], 1 }
0x10e4   :  { %4264 = vsyncpa [#allocation5 + $0x1], 1 }

</bundles_post_ra>
